<compile_context>
chip_gen: v7x
topology: tpu7x:2x2x1
jax: 0.10.0
libtpu: 0.0.40
codegen_flags: <defaults>
</compile_context>

<pallas_src>
import jax
import jax.numpy as jnp
from jax.experimental import pallas as pl
from jax.experimental.pallas import tpu as pltpu


SQRT_2_OVER_PI = 0.7978845608028654


def _gelu_tanh(z):
    return 0.5 * z * (1.0 + jnp.tanh(SQRT_2_OVER_PI * (z + 0.044715 * (z * z * z))))


def _num_tensorcores():
    """Best-effort TensorCores-per-chip (v7x: 2, v5e/v6e: 1); default 1."""
    try:
        info = pltpu.get_tpu_info()
        for attr in ("num_cores", "core_count", "num_tensorcores"):
            v = getattr(info, attr, None)
            if isinstance(v, int) and v > 0:
                return v
    except Exception:
        pass
    return 1


# ------------------------------ the wrapper -------------------------------

def mixer_forward(x, params, stride=2, groups=None):
    """x: (B, dim, H, W) float32 NCHW.  Returns (B, 4*attn_dim, ceil(H/s), ceil(W/s))."""
    B, C, H, W = x.shape
    P = H * W

    (w_sc, sc_s, sc_b, w_pr, pr_s, pr_b,
     ln1g, ln1b, w1, b1, w2, b2,
     ln2g, ln2b, w3t, b3, w4t, b4,
     nb_s, nb_b, w_out, out_s, out_b) = params

    dim_out = w_sc.shape[0]
    attn_dim = w_pr.shape[0]
    inner1 = w1.shape[0]
    inner2 = w3t.shape[1]
    eps = 1e-5

    # ---- batch grouping: 1 grid step on single-TC chips, 2 on dual-TC parts ----
    if groups is None:
        groups = 2 if (_num_tensorcores() >= 2 and B % 2 == 0) else 1
    G = groups if (groups >= 1 and B % groups == 0) else 1
    Bg = B // G
    if G > 1 and ((Bg * C) % 8 or (Bg * dim_out) % 8):
        G, Bg = 1, B

    # ---- fold BN scales into the adjacent 1x1-conv weights (inference BN) ----
    w_sc_f = (sc_s * w_sc).astype(jnp.float32)      # (dim_out, C)
    w_pr_f = (pr_s * w_pr).astype(jnp.float32)      # (attn_dim, C)
    w_out_f = (out_s * w_out).astype(jnp.float32)   # (dim_out, attn_dim)

    # ---- block-diagonal weights: batch group stacked on the sublane axis ----
    eye = jnp.eye(Bg, dtype=jnp.float32)
    bd = lambda w: jnp.kron(eye, w.astype(jnp.float32))
    tcol = lambda v: jnp.tile(v.astype(jnp.float32), (Bg, 1))

    w_in_bd = jnp.concatenate([bd(w_sc_f), bd(w_pr_f)], axis=0)   # (Bg*(DO+A), Bg*C)
    w1_bd = bd(w1)                                                # (Bg*inner1, Bg*A)
    w2_bd = bd(w2)                                                # (Bg*A, Bg*inner1)
    w_out_bd = bd(w_out_f)                                        # (Bg*DO, Bg*A)

    # ---- pack the per-channel (n,1) bias columns into one buffer ----
    col_parts = [jnp.concatenate([tcol(sc_b), tcol(pr_b)], axis=0),
                 tcol(b1), tcol(b2), tcol(nb_s), tcol(nb_b), tcol(out_b)]
    col_chunks, col_off, off = [], [], 0
    for pc in col_parts:
        n = pc.shape[0]
        npad = -(-n // 8) * 8
        col_chunks.append(jnp.pad(pc, ((0, npad - n), (0, 0))))
        col_off.append(off)
        off += npad
    colp = jnp.concatenate(col_chunks, axis=0)                    # (ncol, 1)
    (o_bin, o_b1, o_b2, o_nbs, o_nbb, o_outb) = col_off

    # ---- pack the per-patch (1, K) rows into one buffer ----
    row_parts = [ln1g, ln1b, ln2g, ln2b, b4, b3]
    rw = max(r.shape[1] for r in row_parts)
    rowp = jnp.concatenate(
        [jnp.pad(r.astype(jnp.float32), ((0, 0), (0, rw - r.shape[1])))
         for r in row_parts], axis=0)                             # (6, rw)

    # bf16 weights for the two FLOP-dominant patch-mix matmuls (f32 accumulate)
    w3_b = w3t.astype(jnp.bfloat16)                               # (P, inner2)
    w4_b = w4t.astype(jnp.bfloat16)                               # (inner2, P)

    x_all = x.reshape(B * C, P).astype(jnp.float32)               # batch-major rows

    ND = Bg * dim_out
    NA = Bg * attn_dim
    NIN = ND + NA

    def kernel(x_ref, win_ref, w1_ref, w2_ref, w3_ref, w4_ref, wout_ref,
               col_ref, row_ref, o_ref):
        f32 = jnp.float32
        b_in = col_ref[o_bin:o_bin + NIN]
        b1c = col_ref[o_b1:o_b1 + Bg * inner1]
        b2c = col_ref[o_b2:o_b2 + NA]
        nbs = col_ref[o_nbs:o_nbs + NA]
        nbb = col_ref[o_nbb:o_nbb + NA]
        outb = col_ref[o_outb:o_outb + ND]
        ln1g_ = row_ref[0:1, 0:P]
        ln1b_ = row_ref[1:2, 0:P]
        ln2g_ = row_ref[2:3, 0:P]
        ln2b_ = row_ref[3:4, 0:P]
        b4_ = row_ref[4:5, 0:P]
        b3_ = row_ref[5:6, 0:inner2]

        xx = x_ref[...]                                           # (Bg*C, P)

        # merged shortcut + proj: one block-diag channel-mix dot, folded BN, ReLU
        y = jnp.maximum(
            jnp.dot(win_ref[...], xx, preferred_element_type=f32) + b_in, 0.0)
        sc = y[:ND]                                               # (Bg*DO, P) shortcut
        t = y[ND:]                                                # (Bg*A, P) tokens

        def layernorm(v, g, b):
            mu = jnp.mean(v, axis=-1, keepdims=True)
            d = v - mu
            var = jnp.mean(d * d, axis=-1, keepdims=True)         # f32, two-pass
            return d * jax.lax.rsqrt(var + eps) * g + b

        # cross_location: LayerNorm(P) -> Conv1d(k=1) channel-mix MLP -> residual
        tn = layernorm(t, ln1g_, ln1b_)
        u = _gelu_tanh(jnp.dot(w1_ref[...], tn, preferred_element_type=f32) + b1c)
        t = t + jnp.dot(w2_ref[...], u, preferred_element_type=f32) + b2c

        # pre_location: LayerNorm(P) -> Linear patch-mix MLP (bf16 MXU) -> residual
        tn = layernorm(t, ln2g_, ln2b_)
        v = _gelu_tanh(
            jnp.dot(tn.astype(jnp.bfloat16), w3_ref[...],
                    preferred_element_type=f32) + b3_)
        t = t + jnp.dot(v.astype(jnp.bfloat16), w4_ref[...],
                        preferred_element_type=f32) + b4_

        # post-MLP BN affine + ReLU
        t = jnp.maximum(t * nbs + nbb, 0.0)

        # out branch at FULL resolution; stride subsample happens in the wrapper
        o = jnp.dot(wout_ref[...], t, preferred_element_type=f32) + outb
        o_ref[...] = jnp.maximum(o + sc, 0.0)                     # lane-dense store

    def full_spec(a):
        return pl.BlockSpec(a.shape, lambda g, _nd=a.ndim: (0,) * _nd)

    param_arrays = (w_in_bd, w1_bd, w2_bd, w3_b, w4_b, w_out_bd, colp, rowp)

    # TODO(synk): when patch_dim scales up, w3t/w4t residency needs a K-tiled
    # grid axis ("arbitrary") + VMEM accumulator + explicit vmem_limit_bytes
    # (v7x has only 64 MiB VMEM per TC); not needed at these shapes (~1.5 MiB).
    out_full = pl.pallas_call(
        kernel,
        out_shape=jax.ShapeDtypeStruct((B * dim_out, P), jnp.float32),
        grid_spec=pltpu.PrefetchScalarGridSpec(
            num_scalar_prefetch=0,
            grid=(G,),
            in_specs=[pl.BlockSpec((Bg * C, P), lambda g: (g, 0))]
                     + [full_spec(a) for a in param_arrays],
            out_specs=pl.BlockSpec((ND, P), lambda g: (g, 0)),
        ),
        compiler_params=pltpu.CompilerParams(dimension_semantics=("parallel",)),
    )(x_all, *param_arrays)

    # stride-2 1x1 convs + BN + ReLU commute with the spatial column selection,
    # so the subsample is just a strided slice on the full-resolution result.
    out = out_full.reshape(B, dim_out, H, W)
    return out[:, :, ::stride, ::stride]


# ------------------------- deterministic parameters -----------------------

def init_params(key, dim, attn_dim, patch_dim, eft, ef):
    dim_out = attn_dim * 4
    inner1 = attn_dim * ef       # cross_location (Conv1d k=1) hidden dim
    inner2 = patch_dim * eft     # pre_location (Linear) hidden dim
    ks = jax.random.split(key, 23)
    n = lambda k, s, scale=0.1: (scale * jax.random.normal(k, s)).astype(jnp.float32)

    w_sc  = n(ks[0], (dim_out, dim))
    sc_s  = 1.0 + n(ks[1], (dim_out, 1));   sc_b  = n(ks[2], (dim_out, 1))
    w_pr  = n(ks[3], (attn_dim, dim))
    pr_s  = 1.0 + n(ks[4], (attn_dim, 1));  pr_b  = n(ks[5], (attn_dim, 1))
    ln1g  = 1.0 + n(ks[6], (1, patch_dim)); ln1b  = n(ks[7], (1, patch_dim))
    w1    = n(ks[8], (inner1, attn_dim));   b1    = n(ks[9], (inner1, 1))
    w2    = n(ks[10], (attn_dim, inner1));  b2    = n(ks[11], (attn_dim, 1))
    ln2g  = 1.0 + n(ks[12], (1, patch_dim)); ln2b = n(ks[13], (1, patch_dim))
    w3t   = n(ks[14], (patch_dim, inner2)); b3    = n(ks[15], (1, inner2))
    w4t   = n(ks[16], (inner2, patch_dim)); b4    = n(ks[17], (1, patch_dim))
    nb_s  = 1.0 + n(ks[18], (attn_dim, 1)); nb_b  = n(ks[19], (attn_dim, 1))
    w_out = n(ks[20], (dim_out, attn_dim))
    out_s = 1.0 + n(ks[21], (dim_out, 1));  out_b = n(ks[22], (dim_out, 1))
    return (w_sc, sc_s, sc_b, w_pr, pr_s, pr_b, ln1g, ln1b, w1, b1, w2, b2,
            ln2g, ln2b, w3t, b3, w4t, b4, nb_s, nb_b, w_out, out_s, out_b)


# ----------------------------- plain-JAX reference ------------------------

def mixer_ref(x, params, stride=2):
    (w_sc, sc_s, sc_b, w_pr, pr_s, pr_b,
     ln1g, ln1b, w1, b1, w2, b2,
     ln2g, ln2b, w3t, b3, w4t, b4,
     nb_s, nb_b, w_out, out_s, out_b) = params
    B, C, H, W = x.shape
    Ho, Wo = -(-H // stride), -(-W // stride)
    hi = "highest"
    gelu = lambda z: jax.nn.gelu(z, approximate=False)   # PyTorch default (exact erf)

    x_ds = x[:, :, ::stride, ::stride].reshape(B, C, -1)
    sc = jnp.einsum('oc,bcp->bop', w_sc, x_ds, precision=hi)
    sc = jnp.maximum(sc * sc_s + sc_b, 0.0)

    t = jnp.einsum('ac,bcp->bap', w_pr, x.reshape(B, C, H * W), precision=hi)
    t = jnp.maximum(t * pr_s + pr_b, 0.0)

    def ln(v, g, bta):
        mu = v.mean(-1, keepdims=True)
        var = ((v - mu) ** 2).mean(-1, keepdims=True)
        return (v - mu) / jnp.sqrt(var + 1e-5) * g + bta

    tn = ln(t, ln1g, ln1b)
    u = gelu(jnp.einsum('ka,bap->bkp', w1, tn, precision=hi) + b1)
    t = t + jnp.einsum('ak,bkp->bap', w2, u, precision=hi) + b2

    tn = ln(t, ln2g, ln2b)
    v = gelu(jnp.einsum('bap,pq->baq', tn, w3t, precision=hi) + b3)
    t = t + jnp.einsum('baq,qp->bap', v, w4t, precision=hi) + b4

    t = jnp.maximum(t * nb_s + nb_b, 0.0)
    A = t.shape[1]
    t_ds = t.reshape(B, A, H, W)[:, :, ::stride, ::stride].reshape(B, A, -1)
    o = jnp.einsum('oa,bap->bop', w_out, t_ds, precision=hi)
    o = o * out_s + out_b
    o = jnp.maximum(o + sc, 0.0)
    return o.reshape(B, -1, Ho, Wo)


# ---------------------------------- main -----------------------------------

if __name__ == "__main__":
    key = jax.random.PRNGKey(0)
    B, dim, H, W = 4, 4, 16, 16
    attn_dim, expansion_factor_token, expansion_factor, stride = 8, 2, 4, 2
    patch_dim = H * W   # MLP's LayerNorm dim must equal the flattened spatial size

    kx, kp = jax.random.split(key)
    x = jax.random.normal(kx, (B, dim, H, W), jnp.float32)
    params = init_params(kp, dim, attn_dim, patch_dim,
                         expansion_factor_token, expansion_factor)

    out = mixer_forward(x, params, stride=stride)
    out = jax.block_until_ready(out)

    assert out.shape == (B, attn_dim * 4, -(-H // stride), -(-W // stride)), out.shape
    ref = mixer_ref(x, params, stride=stride)
    err = float(jnp.max(jnp.abs(out - ref)))
    # bf16 patch-mix matmuls (per perf review) + tanh-GELU give ~1e-2-scale
    # absolute deviation vs the f32/erf reference at these magnitudes.
    tol = 3e-2
    if err < tol:
        print("KERNEL_OK")
    else:
        print(f"MISMATCH max_abs_err={err}")
</pallas_src>

<mosaic_0001>
module attributes {stable_mosaic.version = 11 : i64} {
  func.func @kernel(%arg0: i32, %arg1: memref<16x256xf32, #tpu.memory_space<vmem>>, %arg2: memref<160x16xf32, #tpu.memory_space<vmem>>, %arg3: memref<128x32xf32, #tpu.memory_space<vmem>>, %arg4: memref<32x128xf32, #tpu.memory_space<vmem>>, %arg5: memref<256x512xbf16, #tpu.memory_space<vmem>>, %arg6: memref<512x256xbf16, #tpu.memory_space<vmem>>, %arg7: memref<128x32xf32, #tpu.memory_space<vmem>>, %arg8: memref<512x1xf32, #tpu.memory_space<vmem>>, %arg9: memref<6x512xf32, #tpu.memory_space<vmem>>, %arg10: memref<128x256xf32, #tpu.memory_space<vmem>>) attributes {dimension_semantics = [#tpu.dimension_semantics<parallel>], iteration_bounds = array<i64: 1>, scalar_prefetch = 0 : i64, scratch_operands = 0 : i64, tpu.core_type = #tpu.core_type<tc>, window_params = [{transform_indices = @transform_0, window_bounds = array<i64: 16, 256>}, {pipeline_mode = #tpu.pipeline_mode<synchronous>, transform_indices = @transform_1, window_bounds = array<i64: 160, 16>}, {pipeline_mode = #tpu.pipeline_mode<synchronous>, transform_indices = @transform_2, window_bounds = array<i64: 128, 32>}, {pipeline_mode = #tpu.pipeline_mode<synchronous>, transform_indices = @transform_3, window_bounds = array<i64: 32, 128>}, {pipeline_mode = #tpu.pipeline_mode<synchronous>, transform_indices = @transform_4, window_bounds = array<i64: 256, 512>}, {pipeline_mode = #tpu.pipeline_mode<synchronous>, transform_indices = @transform_5, window_bounds = array<i64: 512, 256>}, {pipeline_mode = #tpu.pipeline_mode<synchronous>, transform_indices = @transform_6, window_bounds = array<i64: 128, 32>}, {pipeline_mode = #tpu.pipeline_mode<synchronous>, transform_indices = @transform_7, window_bounds = array<i64: 512, 1>}, {pipeline_mode = #tpu.pipeline_mode<synchronous>, transform_indices = @transform_8, window_bounds = array<i64: 6, 512>}, {transform_indices = @transform_9, window_bounds = array<i64: 128, 256>}]} {
    %c0 = arith.constant 0 : index
    %c0_0 = arith.constant 0 : index
    %0 = vector.load %arg8[%c0, %c0_0] : memref<512x1xf32, #tpu.memory_space<vmem>>, vector<160x1xf32>
    %c160 = arith.constant 160 : index
    %c0_1 = arith.constant 0 : index
    %1 = vector.load %arg8[%c160, %c0_1] : memref<512x1xf32, #tpu.memory_space<vmem>>, vector<128x1xf32>
    %c288 = arith.constant 288 : index
    %c0_2 = arith.constant 0 : index
    %2 = vector.load %arg8[%c288, %c0_2] : memref<512x1xf32, #tpu.memory_space<vmem>>, vector<32x1xf32>
    %c320 = arith.constant 320 : index
    %c0_3 = arith.constant 0 : index
    %3 = vector.load %arg8[%c320, %c0_3] : memref<512x1xf32, #tpu.memory_space<vmem>>, vector<32x1xf32>
    %c352 = arith.constant 352 : index
    %c0_4 = arith.constant 0 : index
    %4 = vector.load %arg8[%c352, %c0_4] : memref<512x1xf32, #tpu.memory_space<vmem>>, vector<32x1xf32>
    %c384 = arith.constant 384 : index
    %c0_5 = arith.constant 0 : index
    %5 = vector.load %arg8[%c384, %c0_5] : memref<512x1xf32, #tpu.memory_space<vmem>>, vector<128x1xf32>
    %c0_6 = arith.constant 0 : index
    %c0_7 = arith.constant 0 : index
    %6 = vector.load %arg9[%c0_6, %c0_7] : memref<6x512xf32, #tpu.memory_space<vmem>>, vector<1x256xf32>
    %c1 = arith.constant 1 : index
    %c0_8 = arith.constant 0 : index
    %7 = vector.load %arg9[%c1, %c0_8] : memref<6x512xf32, #tpu.memory_space<vmem>>, vector<1x256xf32>
    %c2 = arith.constant 2 : index
    %c0_9 = arith.constant 0 : index
    %8 = vector.load %arg9[%c2, %c0_9] : memref<6x512xf32, #tpu.memory_space<vmem>>, vector<1x256xf32>
    %c3 = arith.constant 3 : index
    %c0_10 = arith.constant 0 : index
    %9 = vector.load %arg9[%c3, %c0_10] : memref<6x512xf32, #tpu.memory_space<vmem>>, vector<1x256xf32>
    %c4 = arith.constant 4 : index
    %c0_11 = arith.constant 0 : index
    %10 = vector.load %arg9[%c4, %c0_11] : memref<6x512xf32, #tpu.memory_space<vmem>>, vector<1x256xf32>
    %c5 = arith.constant 5 : index
    %c0_12 = arith.constant 0 : index
    %11 = vector.load %arg9[%c5, %c0_12] : memref<6x512xf32, #tpu.memory_space<vmem>>, vector<1x512xf32>
    %c0_13 = arith.constant 0 : index
    %c0_14 = arith.constant 0 : index
    %12 = vector.load %arg1[%c0_13, %c0_14] : memref<16x256xf32, #tpu.memory_space<vmem>>, vector<16x256xf32>
    %c0_15 = arith.constant 0 : index
    %c0_16 = arith.constant 0 : index
    %13 = vector.load %arg2[%c0_15, %c0_16] : memref<160x16xf32, #tpu.memory_space<vmem>>, vector<160x16xf32>
    %cst = arith.constant dense<0.000000e+00> : vector<160x256xf32>
    %14 = tpu.matmul %13, %12, %cst {dimension_numbers = #tpu.dot_dimension_numbers<[1], [0], [0], [1], [0, 0, 1, 1], [], []>} : vector<160x16xf32>, vector<16x256xf32>, vector<160x256xf32> -> vector<160x256xf32>
    %15 = vector.broadcast %0 : vector<160x1xf32> to vector<160x256xf32>
    %16 = arith.addf %14, %15 : vector<160x256xf32>
    %cst_17 = arith.constant 0.000000e+00 : f32
    %17 = vector.broadcast %cst_17 : f32 to vector<160x256xf32>
    %18 = arith.maximumf %16, %17 : vector<160x256xf32>
    %19 = vector.extract_strided_slice %18 {offsets = [0, 0], sizes = [128, 256], strides = [1, 1]} : vector<160x256xf32> to vector<128x256xf32>
    %20 = vector.extract_strided_slice %18 {offsets = [128, 0], sizes = [32, 256], strides = [1, 1]} : vector<160x256xf32> to vector<32x256xf32>
    %cst_18 = arith.constant dense<0.000000e+00> : vector<32xf32>
    %21 = vector.multi_reduction <add>, %20, %cst_18 [1] : vector<32x256xf32> to vector<32xf32>
    %22 = vector.shape_cast %21 : vector<32xf32> to vector<32x1xf32>
    %cst_19 = arith.constant 2.560000e+02 : f32
    %23 = vector.broadcast %cst_19 : f32 to vector<32x1xf32>
    %24 = arith.divf %22, %23 : vector<32x1xf32>
    %25 = vector.broadcast %24 : vector<32x1xf32> to vector<32x256xf32>
    %26 = arith.subf %20, %25 : vector<32x256xf32>
    %27 = arith.mulf %26, %26 : vector<32x256xf32>
    %cst_20 = arith.constant dense<0.000000e+00> : vector<32xf32>
    %28 = vector.multi_reduction <add>, %27, %cst_20 [1] : vector<32x256xf32> to vector<32xf32>
    %29 = vector.shape_cast %28 : vector<32xf32> to vector<32x1xf32>
    %cst_21 = arith.constant 2.560000e+02 : f32
    %30 = vector.broadcast %cst_21 : f32 to vector<32x1xf32>
    %31 = arith.divf %29, %30 : vector<32x1xf32>
    %cst_22 = arith.constant 9.99999974E-6 : f32
    %32 = vector.broadcast %cst_22 : f32 to vector<32x1xf32>
    %33 = arith.addf %31, %32 : vector<32x1xf32>
    %34 = math.rsqrt %33 : vector<32x1xf32>
    %35 = vector.broadcast %34 : vector<32x1xf32> to vector<32x256xf32>
    %36 = arith.mulf %26, %35 : vector<32x256xf32>
    %37 = vector.broadcast %6 : vector<1x256xf32> to vector<32x256xf32>
    %38 = arith.mulf %36, %37 : vector<32x256xf32>
    %39 = vector.broadcast %7 : vector<1x256xf32> to vector<32x256xf32>
    %40 = arith.addf %38, %39 : vector<32x256xf32>
    %c0_23 = arith.constant 0 : index
    %c0_24 = arith.constant 0 : index
    %41 = vector.load %arg3[%c0_23, %c0_24] : memref<128x32xf32, #tpu.memory_space<vmem>>, vector<128x32xf32>
    %cst_25 = arith.constant dense<0.000000e+00> : vector<128x256xf32>
    %42 = tpu.matmul %41, %40, %cst_25 {dimension_numbers = #tpu.dot_dimension_numbers<[1], [0], [0], [1], [0, 0, 1, 1], [], []>} : vector<128x32xf32>, vector<32x256xf32>, vector<128x256xf32> -> vector<128x256xf32>
    %43 = vector.broadcast %1 : vector<128x1xf32> to vector<128x256xf32>
    %44 = arith.addf %42, %43 : vector<128x256xf32>
    %cst_26 = arith.constant 5.000000e-01 : f32
    %45 = vector.broadcast %cst_26 : f32 to vector<128x256xf32>
    %46 = arith.mulf %45, %44 : vector<128x256xf32>
    %47 = arith.mulf %44, %44 : vector<128x256xf32>
    %48 = arith.mulf %47, %44 : vector<128x256xf32>
    %cst_27 = arith.constant 4.471500e-02 : f32
    %49 = vector.broadcast %cst_27 : f32 to vector<128x256xf32>
    %50 = arith.mulf %49, %48 : vector<128x256xf32>
    %51 = arith.addf %44, %50 : vector<128x256xf32>
    %cst_28 = arith.constant 0.797884583 : f32
    %52 = vector.broadcast %cst_28 : f32 to vector<128x256xf32>
    %53 = arith.mulf %52, %51 : vector<128x256xf32>
    %54 = math.tanh %53 : vector<128x256xf32>
    %cst_29 = arith.constant 1.000000e+00 : f32
    %55 = vector.broadcast %cst_29 : f32 to vector<128x256xf32>
    %56 = arith.addf %55, %54 : vector<128x256xf32>
    %57 = arith.mulf %46, %56 : vector<128x256xf32>
    %c0_30 = arith.constant 0 : index
    %c0_31 = arith.constant 0 : index
    %58 = vector.load %arg4[%c0_30, %c0_31] : memref<32x128xf32, #tpu.memory_space<vmem>>, vector<32x128xf32>
    %cst_32 = arith.constant dense<0.000000e+00> : vector<32x256xf32>
    %59 = tpu.matmul %58, %57, %cst_32 {dimension_numbers = #tpu.dot_dimension_numbers<[1], [0], [0], [1], [0, 0, 1, 1], [], []>} : vector<32x128xf32>, vector<128x256xf32>, vector<32x256xf32> -> vector<32x256xf32>
    %60 = arith.addf %20, %59 : vector<32x256xf32>
    %61 = vector.broadcast %2 : vector<32x1xf32> to vector<32x256xf32>
    %62 = arith.addf %60, %61 : vector<32x256xf32>
    %cst_33 = arith.constant dense<0.000000e+00> : vector<32xf32>
    %63 = vector.multi_reduction <add>, %62, %cst_33 [1] : vector<32x256xf32> to vector<32xf32>
    %64 = vector.shape_cast %63 : vector<32xf32> to vector<32x1xf32>
    %cst_34 = arith.constant 2.560000e+02 : f32
    %65 = vector.broadcast %cst_34 : f32 to vector<32x1xf32>
    %66 = arith.divf %64, %65 : vector<32x1xf32>
    %67 = vector.broadcast %66 : vector<32x1xf32> to vector<32x256xf32>
    %68 = arith.subf %62, %67 : vector<32x256xf32>
    %69 = arith.mulf %68, %68 : vector<32x256xf32>
    %cst_35 = arith.constant dense<0.000000e+00> : vector<32xf32>
    %70 = vector.multi_reduction <add>, %69, %cst_35 [1] : vector<32x256xf32> to vector<32xf32>
    %71 = vector.shape_cast %70 : vector<32xf32> to vector<32x1xf32>
    %cst_36 = arith.constant 2.560000e+02 : f32
    %72 = vector.broadcast %cst_36 : f32 to vector<32x1xf32>
    %73 = arith.divf %71, %72 : vector<32x1xf32>
    %cst_37 = arith.constant 9.99999974E-6 : f32
    %74 = vector.broadcast %cst_37 : f32 to vector<32x1xf32>
    %75 = arith.addf %73, %74 : vector<32x1xf32>
    %76 = math.rsqrt %75 : vector<32x1xf32>
    %77 = vector.broadcast %76 : vector<32x1xf32> to vector<32x256xf32>
    %78 = arith.mulf %68, %77 : vector<32x256xf32>
    %79 = vector.broadcast %8 : vector<1x256xf32> to vector<32x256xf32>
    %80 = arith.mulf %78, %79 : vector<32x256xf32>
    %81 = vector.broadcast %9 : vector<1x256xf32> to vector<32x256xf32>
    %82 = arith.addf %80, %81 : vector<32x256xf32>
    %83 = arith.truncf %82 : vector<32x256xf32> to vector<32x256xbf16>
    %c0_38 = arith.constant 0 : index
    %c0_39 = arith.constant 0 : index
    %84 = vector.load %arg5[%c0_38, %c0_39] : memref<256x512xbf16, #tpu.memory_space<vmem>>, vector<256x512xbf16>
    %cst_40 = arith.constant dense<0.000000e+00> : vector<32x512xf32>
    %85 = tpu.matmul %83, %84, %cst_40 {dimension_numbers = #tpu.dot_dimension_numbers<[1], [0], [0], [1], [0, 0, 1, 1], [], []>} : vector<32x256xbf16>, vector<256x512xbf16>, vector<32x512xf32> -> vector<32x512xf32>
    %86 = vector.broadcast %11 : vector<1x512xf32> to vector<32x512xf32>
    %87 = arith.addf %85, %86 : vector<32x512xf32>
    %cst_41 = arith.constant 5.000000e-01 : f32
    %88 = vector.broadcast %cst_41 : f32 to vector<32x512xf32>
    %89 = arith.mulf %88, %87 : vector<32x512xf32>
    %90 = arith.mulf %87, %87 : vector<32x512xf32>
    %91 = arith.mulf %90, %87 : vector<32x512xf32>
    %cst_42 = arith.constant 4.471500e-02 : f32
    %92 = vector.broadcast %cst_42 : f32 to vector<32x512xf32>
    %93 = arith.mulf %92, %91 : vector<32x512xf32>
    %94 = arith.addf %87, %93 : vector<32x512xf32>
    %cst_43 = arith.constant 0.797884583 : f32
    %95 = vector.broadcast %cst_43 : f32 to vector<32x512xf32>
    %96 = arith.mulf %95, %94 : vector<32x512xf32>
    %97 = math.tanh %96 : vector<32x512xf32>
    %cst_44 = arith.constant 1.000000e+00 : f32
    %98 = vector.broadcast %cst_44 : f32 to vector<32x512xf32>
    %99 = arith.addf %98, %97 : vector<32x512xf32>
    %100 = arith.mulf %89, %99 : vector<32x512xf32>
    %101 = arith.truncf %100 : vector<32x512xf32> to vector<32x512xbf16>
    %c0_45 = arith.constant 0 : index
    %c0_46 = arith.constant 0 : index
    %102 = vector.load %arg6[%c0_45, %c0_46] : memref<512x256xbf16, #tpu.memory_space<vmem>>, vector<512x256xbf16>
    %cst_47 = arith.constant dense<0.000000e+00> : vector<32x256xf32>
    %103 = tpu.matmul %101, %102, %cst_47 {dimension_numbers = #tpu.dot_dimension_numbers<[1], [0], [0], [1], [0, 0, 1, 1], [], []>} : vector<32x512xbf16>, vector<512x256xbf16>, vector<32x256xf32> -> vector<32x256xf32>
    %104 = arith.addf %62, %103 : vector<32x256xf32>
    %105 = vector.broadcast %10 : vector<1x256xf32> to vector<32x256xf32>
    %106 = arith.addf %104, %105 : vector<32x256xf32>
    %107 = vector.broadcast %3 : vector<32x1xf32> to vector<32x256xf32>
    %108 = arith.mulf %106, %107 : vector<32x256xf32>
    %109 = vector.broadcast %4 : vector<32x1xf32> to vector<32x256xf32>
    %110 = arith.addf %108, %109 : vector<32x256xf32>
    %cst_48 = arith.constant 0.000000e+00 : f32
    %111 = vector.broadcast %cst_48 : f32 to vector<32x256xf32>
    %112 = arith.maximumf %110, %111 : vector<32x256xf32>
    %c0_49 = arith.constant 0 : index
    %c0_50 = arith.constant 0 : index
    %113 = vector.load %arg7[%c0_49, %c0_50] : memref<128x32xf32, #tpu.memory_space<vmem>>, vector<128x32xf32>
    %cst_51 = arith.constant dense<0.000000e+00> : vector<128x256xf32>
    %114 = tpu.matmul %113, %112, %cst_51 {dimension_numbers = #tpu.dot_dimension_numbers<[1], [0], [0], [1], [0, 0, 1, 1], [], []>} : vector<128x32xf32>, vector<32x256xf32>, vector<128x256xf32> -> vector<128x256xf32>
    %115 = vector.broadcast %5 : vector<128x1xf32> to vector<128x256xf32>
    %116 = arith.addf %114, %115 : vector<128x256xf32>
    %117 = arith.addf %116, %19 : vector<128x256xf32>
    %cst_52 = arith.constant 0.000000e+00 : f32
    %118 = vector.broadcast %cst_52 : f32 to vector<128x256xf32>
    %119 = arith.maximumf %117, %118 : vector<128x256xf32>
    %c0_53 = arith.constant 0 : index
    %c0_54 = arith.constant 0 : index
    %120 = vector.load %arg10[%c0_53, %c0_54] : memref<128x256xf32, #tpu.memory_space<vmem>>, vector<128x256xf32>
    tpu.vector_store %arg10[%c0_53, %c0_54], %119 {strides = array<i32>} : memref<128x256xf32, #tpu.memory_space<vmem>>, vector<128x256xf32>,
    return
  }
  func.func @transform_0(%arg0: i32) -> (i32, i32) {
    %c0_i32 = arith.constant 0 : i32
    %c0_i32_0 = arith.constant 0 : i32
    return %arg0, %c0_i32 : i32, i32
  }
  func.func @transform_1(%arg0: i32) -> (i32, i32) {
    %c0_i32 = arith.constant 0 : i32
    %c0_i32_0 = arith.constant 0 : i32
    %c0_i32_1 = arith.constant 0 : i32
    return %c0_i32, %c0_i32_0 : i32, i32
  }
  func.func @transform_2(%arg0: i32) -> (i32, i32) {
    %c0_i32 = arith.constant 0 : i32
    %c0_i32_0 = arith.constant 0 : i32
    %c0_i32_1 = arith.constant 0 : i32
    return %c0_i32, %c0_i32_0 : i32, i32
  }
  func.func @transform_3(%arg0: i32) -> (i32, i32) {
    %c0_i32 = arith.constant 0 : i32
    %c0_i32_0 = arith.constant 0 : i32
    %c0_i32_1 = arith.constant 0 : i32
    return %c0_i32, %c0_i32_0 : i32, i32
  }
  func.func @transform_4(%arg0: i32) -> (i32, i32) {
    %c0_i32 = arith.constant 0 : i32
    %c0_i32_0 = arith.constant 0 : i32
    %c0_i32_1 = arith.constant 0 : i32
    return %c0_i32, %c0_i32_0 : i32, i32
  }
  func.func @transform_5(%arg0: i32) -> (i32, i32) {
    %c0_i32 = arith.constant 0 : i32
    %c0_i32_0 = arith.constant 0 : i32
    %c0_i32_1 = arith.constant 0 : i32
    return %c0_i32, %c0_i32_0 : i32, i32
  }
  func.func @transform_6(%arg0: i32) -> (i32, i32) {
    %c0_i32 = arith.constant 0 : i32
    %c0_i32_0 = arith.constant 0 : i32
    %c0_i32_1 = arith.constant 0 : i32
    return %c0_i32, %c0_i32_0 : i32, i32
  }
  func.func @transform_7(%arg0: i32) -> (i32, i32) {
    %c0_i32 = arith.constant 0 : i32
    %c0_i32_0 = arith.constant 0 : i32
    %c0_i32_1 = arith.constant 0 : i32
    return %c0_i32, %c0_i32_0 : i32, i32
  }
  func.func @transform_8(%arg0: i32) -> (i32, i32) {
    %c0_i32 = arith.constant 0 : i32
    %c0_i32_0 = arith.constant 0 : i32
    %c0_i32_1 = arith.constant 0 : i32
    return %c0_i32, %c0_i32_0 : i32, i32
  }
  func.func @transform_9(%arg0: i32) -> (i32, i32) {
    %c0_i32 = arith.constant 0 : i32
    %c0_i32_0 = arith.constant 0 : i32
    return %arg0, %c0_i32 : i32, i32
  }
}

</mosaic_0001>

<bundles_post_ra>
// kernel: tpu_custom_call.1
= control target key start
LH: loop header
LB: loop body
LE: loop exit
PB: predicated region body
PF: predicated region fallthrough
CT: control target
= control target key end

     0   :  { %14 = vsyncpa [#allocation3], 0  ;;  %s5427_s0 = inlined_call_operand.hbm [shape: f32[16,256], index: 0, kind: input, shape index: {}]   ;;  %s5428_s1 = inlined_call_operand.vmem [shape: f32[160,16], index: 1, kind: input, shape index: {}]   ;;  %s5429_s2 = inlined_call_operand.vmem [shape: f32[128,32], index: 2, kind: input, shape index: {}]   ;;  %s5430_s3 = inlined_call_operand.hbm [shape: f32[32,128], index: 3, kind: input, shape index: {}]   ;;  %s5431_s4 = inlined_call_operand.vmem [shape: bf16[256,512], index: 4, kind: input, shape index: {}]   ;;  %s5432_s5 = inlined_call_operand.vmem [shape: bf16[512,256], index: 5, kind: input, shape index: {}]   ;;  %s5433_s6 = inlined_call_operand.vmem [shape: f32[128,32], index: 6, kind: input, shape index: {}]   ;;  %s5434_s7 = inlined_call_operand.vmem [shape: f32[512,1], index: 7, kind: input, shape index: {}]   ;;  %s5435_s8 = inlined_call_operand.hbm [shape: f32[6,512], index: 8, kind: input, shape index: {}]   ;;  %s5436_s9 = inlined_call_operand.hbm [shape: f32[128,256], index: 9, kind: output, shape index: {}]  }
   0x1   :  { %15 = vsyncpa [#allocation6], 0 }
   0x2   :  { %16 = vsyncpa [#allocation4], 0  ;;  %s3804_s30 = smov [#allocation5]   ;;  %s3710_s13 = scalar_lea.hbm %s5430_s3, 512 }
   0x3   :  { %s38_s10 = sshll.u32 %s3804_s30, 4  ;;  %p3711_p0 = scmp.ne.s32.totalorder %s5430_s3, %s3710_s13  ;;  %s39_s10 = int_to_ptr.vmem [resolvable:$true] %s38_s10 }
   0x4   :  { %p3714_p1 = scmp.lt.u32.totalorder %s3710_s13, %s5430_s3 }
   0x6   :  { %p3716_p2 = pnand %p3714_p1, %p3711_p0 }
   0x8   :  { %3719 = shalt.err (!%p3716_p2)
}
   0x9   :  { %s3720_s18 = scalar_lea.vmem %s39_s10, 512  ;;  %p3725_p4 = scmp.lt.s32.totalorder %s39_s10, %s39_s10 }
   0xa   :  { %p3721_p3 = scmp.ne.s32.totalorder %s39_s10, %s3720_s18  ;;  %p3726_p5 = scmp.lt.s32.totalorder %s3720_s18, %s3720_s18 }
   0xc   :  { %p3727_p6 = por %p3726_p5, %p3725_p4 }
   0xe   :  { %p3728_p7 = pnand %p3727_p6, %p3721_p3 }
  0x10   :  { %3731 = shalt.err (!%p3728_p7)
}
  0x11   :  { %s3805_s19 = smov 128   ;;  %s3806_s20 = smov 8  }
  0x12   :  { %44 = dma.hbm_to_vmem [thread:$0]  %s5430_s3, 512, %s39_s10, [#allocation6], %s3805_s19, %s3805_s19, %s3806_s20  }
  0x13   :  { %s3807_s23 = smov [#allocation2]   ;;  %s3732_s27 = scalar_lea.hbm %s5427_s0, 512 }
  0x14   :  { %s22_s24 = sshll.u32 %s3807_s23, 4  ;;  %p3733_p8 = scmp.ne.s32.totalorder %s5427_s0, %s3732_s27  ;;  %s23_s24 = int_to_ptr.vmem [resolvable:$true] %s22_s24 }
  0x15   :  { %p3736_p9 = scmp.lt.u32.totalorder %s3732_s27, %s5427_s0 }
  0x17   :  { %p3738_p10 = pnand %p3736_p9, %p3733_p8 }
  0x19   :  { %3741 = shalt.err (!%p3738_p10)
}
  0x1a   :  { %s3742_s12 = scalar_lea.vmem %s23_s24, 512  ;;  %p3747_p12 = scmp.lt.s32.totalorder %s23_s24, %s23_s24 }
  0x1b   :  { %p3743_p11 = scmp.ne.s32.totalorder %s23_s24, %s3742_s12  ;;  %p3748_p13 = scmp.lt.s32.totalorder %s3742_s12, %s3742_s12 }
  0x1d   :  { %p3749_p0 = por %p3748_p13, %p3747_p12 }
  0x1f   :  { %p3750_p1 = pnand %p3749_p0, %p3743_p11 }
  0x21   :  { %3753 = shalt.err (!%p3750_p1)
}
  0x22   :  { %s3808_s3 = smov 256   ;;  %s3809_s10 = smov 16  }
  0x23   :  { %28 = dma.hbm_to_vmem [thread:$0]  %s5427_s0, 512, %s23_s24, [#allocation3], %s3808_s3, %s3808_s3, %s3809_s10  }
  0x24   :  { %s3810_s15 = smov [#allocation7]   ;;  %s3754_s19 = scalar_lea.hbm %s5435_s8, 512 }
  0x25   :  { %s59_s16 = sshll.u32 %s3810_s15, 4  ;;  %p3755_p2 = scmp.ne.s32.totalorder %s5435_s8, %s3754_s19  ;;  %s60_s16 = int_to_ptr.vmem [resolvable:$true] %s59_s16 }
  0x26   :  { %p3758_p3 = scmp.lt.u32.totalorder %s3754_s19, %s5435_s8 }
  0x28   :  { %p3760_p4 = pnand %p3758_p3, %p3755_p2 }
  0x2a   :  { %3763 = shalt.err (!%p3760_p4)
}
  0x2b   :  { %s3764_s25 = scalar_lea.vmem %s60_s16, 512  ;;  %p3769_p6 = scmp.lt.s32.totalorder %s60_s16, %s60_s16 }
  0x2c   :  { %p3765_p5 = scmp.ne.s32.totalorder %s60_s16, %s3764_s25  ;;  %p3770_p7 = scmp.lt.s32.totalorder %s3764_s25, %s3764_s25 }
  0x2e   :  { %p3771_p8 = por %p3770_p7, %p3769_p6 }
  0x30   :  { %p3772_p9 = pnand %p3771_p8, %p3765_p5 }
  0x32   :  { %3775 = shalt.err (!%p3772_p9)
}
  0x33   :  { %62 = dma.hbm_to_vmem [thread:$0]  %s5435_s8, 512, %s60_s16, [#allocation6]  }
  0x34   :  { %3798 = dma.done.wait [#allocation3], 512  }
  0x35   :  { %3799 = vsyncadd [#allocation3], 4294966784 }
  0x36   :  { %3800 = dma.done.wait [#allocation6], 1024  }
  0x37   :  { %3801 = vsyncadd [#allocation6], 4294966272  ;;  %v5437_v0 = vmov 0.0   ;;  %v3812_v1 = vmov 0   ;;  %v148_v2 = vld [vmem:[#allocation2 + $0x8] sm:$0xff]  ;;  %v150_v3 = vld [vmem:[#allocation2 + $0x18] sm:$0xff] }
  0x38   :  { %396 = vmatprep.mubr.f32.mxu0 %v5437_v0  ;;  %504 = vmatprep.mubr.f32.mxu1 %v5437_v0  ;;  %v147_v4 = vld [vmem:[#allocation2] sm:$0xff]  ;;  %v3332_v5 = vpack.c.bf16 %v150_v3, %v148_v2  ;;  %v149_v6 = vld [vmem:[#allocation2 + $0x10] sm:$0xff]  ;;  %vm271_vm0 = vcmask 130048   ;;  %v152_v9 = vld [vmem:[%s5428_s1 + $0x8] sm:$0xff]  ;;  %vm756_vm1 = vcmask 261120  }
  0x39   :  { %3404 = vset.pattern.permute.xlu0 %v3812_v1  ;;  %3405 = vset.pattern.permute.xlu1 %v3812_v1  ;;  %v3334_v7 = vpack.c.bf16 %v149_v6, %v147_v4  ;;  %v151_v8 = vld [vmem:[%s5428_s1] sm:$0xff]  ;;  %v169_v10 = vld [vmem:[%s5428_s1 + $0x90] sm:$0xff]  ;;  %v170_v11 = vld [vmem:[%s5428_s1 + $0x98] sm:$0xff] }
  0x3a   :  { %3333 = vmatprep.subr.bf16.mxu0 %v3332_v5  ;;  %3384 = vmatprep.subr.bf16.mxu1 %v3332_v5  ;;  %v88_v12 = vld [vmem:[%s5434_s7 + $0x80] sm:$0xff]  ;;  %v90_v13 = vld [vmem:[%s5434_s7 + $0x90] sm:$0xff]  ;;  %v89_v14 = vld [vmem:[%s5434_s7 + $0x88] sm:$0xff] }
  0x3b   :  { %3335 = vmatpush1.bf16.msra.mxu0 %v3334_v7  ;;  %3385 = vmatpush1.bf16.msra.mxu1 %v3334_v7  ;;  %v91_v15 = vld [vmem:[%s5434_s7 + $0x98] sm:$0xff]  ;;  %v153_v16 = vld [vmem:[%s5428_s1 + $0x10] sm:$0xff]  ;;  %v155_v18 = vld [vmem:[%s5428_s1 + $0x20] sm:$0xff] }
  0x3c   :  { %253 = vperm.xlu0 %3404, %v88_v12   ;;  %263 = vperm.xlu1 %3405, %v90_v13   ;;  %v154_v17 = vld [vmem:[%s5428_s1 + $0x18] sm:$0xff]  ;;  %v156_v19 = vld [vmem:[%s5428_s1 + $0x28] sm:$0xff]  ;;  %v157_v20 = vld [vmem:[%s5428_s1 + $0x30] sm:$0xff] }
  0x3d   :  { %v158_v21 = vld [vmem:[%s5428_s1 + $0x38] sm:$0xff]  ;;  %v159_v22 = vld [vmem:[%s5428_s1 + $0x40] sm:$0xff]  ;;  %v160_v23 = vld [vmem:[%s5428_s1 + $0x48] sm:$0xff] }
  0x3e   :  { %3152 = vmatmul.mubr.msk.f32.vlgmr.msra.gmra.mrb[0].mxu0 %vm271_vm0, %v151_v8  ;;  %3170 = vmatmul.mubr.msk.f32.vlgmr.msra.gmra.mrb[0].mxu1 %vm271_vm0, %v169_v10  ;;  %v161_v24 = vld [vmem:[%s5428_s1 + $0x50] sm:$0xff]  ;;  %v162_v25 = vld [vmem:[%s5428_s1 + $0x58] sm:$0xff]  ;;  %v163_v26 = vld [vmem:[%s5428_s1 + $0x60] sm:$0xff] }
  0x3f   :  { %402 = vmatprep.mubr.f32.mxu0 %v5437_v0  ;;  %510 = vmatprep.mubr.f32.mxu1 %v5437_v0  ;;  %v164_v27 = vld [vmem:[%s5428_s1 + $0x68] sm:$0xff]  ;;  %v165_v28 = vld [vmem:[%s5428_s1 + $0x70] sm:$0xff]  ;;  %v166_v29 = vld [vmem:[%s5428_s1 + $0x78] sm:$0xff] }
  0x40   :  { %258 = vperm.xlu0 %3404, %v89_v14   ;;  %268 = vperm.xlu1 %3405, %v91_v15   ;;  %v167_v30 = vld [vmem:[%s5428_s1 + $0x80] sm:$0xff]  ;;  %v168_v31 = vld [vmem:[%s5428_s1 + $0x88] sm:$0xff] }
  0x42   :  { %3153 = vmatmul.mubr.msk.f32.gmra.mrb[2].mxu0 %vm271_vm0, %v152_v9  ;;  %3171 = vmatmul.mubr.msk.f32.gmra.mrb[2].mxu1 %vm271_vm0, %v170_v11 }
  0x43   :  { %408 = vmatprep.mubr.f32.mxu0 %v5437_v0  ;;  %869 = vmatprep.mubr.f32.mxu1 %v5437_v0 }
  0x46   :  { %3154 = vmatmul.mubr.msk.f32.gmra.mrb[4].mxu0 %vm271_vm0, %v153_v16 }
  0x47   :  { %414 = vmatprep.mubr.f32.mxu0 %v5437_v0 }
  0x4a   :  { %3155 = vmatmul.mubr.msk.f32.gmra.mrb[6].mxu0 %vm271_vm0, %v154_v17 }
  0x4b   :  { %420 = vmatprep.mubr.f32.mxu0 %v5437_v0 }
  0x4e   :  { %3156 = vmatmul.mubr.msk.f32.gmra.mrb[8].mxu0 %vm271_vm0, %v155_v18 }
  0x4f   :  { %426 = vmatprep.mubr.f32.mxu0 %v5437_v0 }
  0x52   :  { %3157 = vmatmul.mubr.msk.f32.gmra.mrb[10].mxu0 %vm271_vm0, %v156_v19 }
  0x53   :  { %432 = vmatprep.mubr.f32.mxu0 %v5437_v0 }
  0x56   :  { %3158 = vmatmul.mubr.msk.f32.gmra.mrb[12].mxu0 %vm271_vm0, %v157_v20 }
  0x57   :  { %438 = vmatprep.mubr.f32.mxu0 %v5437_v0 }
  0x5a   :  { %3159 = vmatmul.mubr.msk.f32.gmra.mrb[14].mxu0 %vm271_vm0, %v158_v21 }
  0x5b   :  { %444 = vmatprep.mubr.f32.mxu0 %v5437_v0 }
  0x5e   :  { %3160 = vmatmul.mubr.msk.f32.gmra.mrb[16].mxu0 %vm271_vm0, %v159_v22 }
  0x5f   :  { %450 = vmatprep.mubr.f32.mxu0 %v5437_v0 }
  0x62   :  { %3161 = vmatmul.mubr.msk.f32.gmra.mrb[18].mxu0 %vm271_vm0, %v160_v23 }
  0x63   :  { %456 = vmatprep.mubr.f32.mxu0 %v5437_v0 }
  0x66   :  { %3162 = vmatmul.mubr.msk.f32.gmra.mrb[20].mxu0 %vm271_vm0, %v161_v24 }
  0x67   :  { %462 = vmatprep.mubr.f32.mxu0 %v5437_v0 }
  0x6a   :  { %3163 = vmatmul.mubr.msk.f32.gmra.mrb[22].mxu0 %vm271_vm0, %v162_v25 }
  0x6b   :  { %468 = vmatprep.mubr.f32.mxu0 %v5437_v0 }
  0x6e   :  { %3164 = vmatmul.mubr.msk.f32.gmra.mrb[24].mxu0 %vm271_vm0, %v163_v26 }
  0x6f   :  { %474 = vmatprep.mubr.f32.mxu0 %v5437_v0 }
  0x72   :  { %3165 = vmatmul.mubr.msk.f32.gmra.mrb[26].mxu0 %vm271_vm0, %v164_v27 }
  0x73   :  { %480 = vmatprep.mubr.f32.mxu0 %v5437_v0 }
  0x76   :  { %3166 = vmatmul.mubr.msk.f32.gmra.mrb[28].mxu0 %vm271_vm0, %v165_v28 }
  0x77   :  { %486 = vmatprep.mubr.f32.mxu0 %v5437_v0 }
  0x7a   :  { %3167 = vmatmul.mubr.msk.f32.gmra.mrb[30].mxu0 %vm271_vm0, %v166_v29 }
  0x7b   :  { %492 = vmatprep.mubr.f32.mxu0 %v5437_v0 }
  0x7e   :  { %3168 = vmatmul.mubr.msk.f32.gmra.mrb[32].mxu0 %vm271_vm0, %v167_v30 }
  0x7f   :  { %498 = vmatprep.mubr.f32.mxu0 %v5437_v0 }
  0x82   :  { %3169 = vmatmul.mubr.msk.f32.gmra.mrb[34].mxu0 %vm271_vm0, %v168_v31 }
  0xbb   :  { %v264_v5 = vpop.permute.xlu1 %263  ;;  %v254_v6 = vpop.permute.xlu0 %253 }
  0xbf   :  { %v269_v14 = vpop.permute.xlu1 %268  ;;  %v259_v16 = vpop.permute.xlu0 %258 }
 0x111   :  { %v4016_v32 = vpop.f32.mrb[0].mxu0  ;;  %v506_v34 = vpop.f32.mrb[0].mxu1 }
 0x112   :  { %v4018_v33 = vpop.f32.mrb[1].mxu0  ;;  %v508_v35 = vpop.f32.mrb[1].mxu1  ;;  %v507_v8 = vadd.f32 %v506_v34, %v264_v5 }
 0x113   :  { %v509_v9 = vadd.f32 %v508_v35, %v264_v5 }
 0x114   :  { %v4084_v17 = vmax.f32 %v507_v8, 0.0 }
 0x115   :  { %v4020_v36 = vpop.f32.mrb[2].mxu0  ;;  %v512_v38 = vpop.f32.mrb[2].mxu1  ;;  %v4086_v18 = vmax.f32 %v509_v9, 0.0 }
 0x116   :  { %5439 = vst [vmem:[#allocation12_spill] sm:$0xff] %v4020_v36  ;;  %v4022_v37 = vpop.f32.mrb[3].mxu0  ;;  %v514_v39 = vpop.f32.mrb[3].mxu1  ;;  %v513_v23 = vadd.f32 %v512_v38, %v269_v14 }
 0x117   :  { %5440 = vst [vmem:[#allocation13_spill] sm:$0xff] %v4022_v37  ;;  %v515_v24 = vadd.f32 %v514_v39, %v269_v14  ;;  %v563_v28 = vadd.f32 %v4086_v18, %v4084_v17 }
 0x118   :  { %v4096_v29 = vmax.f32 %v513_v23, 0.0 }
 0x119   :  { %v4024_v40 = vpop.f32.mrb[4].mxu0  ;;  %v4098_v30 = vmax.f32 %v515_v24, 0.0 }
 0x11a   :  { %5441 = vst [vmem:[#allocation14_spill] sm:$0xff] %v4024_v40  ;;  %v4026_v41 = vpop.f32.mrb[5].mxu0 }
 0x11b   :  { %5442 = vst [vmem:[#allocation15_spill] sm:$0xff] %v4026_v41  ;;  %v566_v34 = vadd.f32 %v4098_v30, %v4096_v29 }
 0x11d   :  { %v4028_v42 = vpop.f32.mrb[6].mxu0 }
 0x11e   :  { %5443 = vst [vmem:[#allocation16_spill] sm:$0xff] %v4028_v42  ;;  %v4030_v43 = vpop.f32.mrb[7].mxu0 }
 0x11f   :  { %5444 = vst [vmem:[#allocation17_spill] sm:$0xff] %v4030_v43 }
 0x121   :  { %v4032_v44 = vpop.f32.mrb[8].mxu0 }
 0x122   :  { %5445 = vst [vmem:[#allocation18_spill] sm:$0xff] %v4032_v44  ;;  %v4034_v45 = vpop.f32.mrb[9].mxu0 }
 0x123   :  { %5446 = vst [vmem:[#allocation19_spill] sm:$0xff] %v4034_v45 }
 0x125   :  { %v4036_v46 = vpop.f32.mrb[10].mxu0 }
 0x126   :  { %5447 = vst [vmem:[#allocation20_spill] sm:$0xff] %v4036_v46  ;;  %v4038_v47 = vpop.f32.mrb[11].mxu0 }
 0x127   :  { %5448 = vst [vmem:[#allocation21_spill] sm:$0xff] %v4038_v47 }
 0x129   :  { %v4040_v48 = vpop.f32.mrb[12].mxu0 }
 0x12a   :  { %5449 = vst [vmem:[#allocation22_spill] sm:$0xff] %v4040_v48  ;;  %v4042_v49 = vpop.f32.mrb[13].mxu0 }
 0x12b   :  { %5450 = vst [vmem:[#allocation23_spill] sm:$0xff] %v4042_v49 }
 0x12d   :  { %v4044_v50 = vpop.f32.mrb[14].mxu0 }
 0x12e   :  { %5451 = vst [vmem:[#allocation24_spill] sm:$0xff] %v4044_v50  ;;  %v4046_v51 = vpop.f32.mrb[15].mxu0 }
 0x12f   :  { %5452 = vst [vmem:[#allocation25_spill] sm:$0xff] %v4046_v51 }
 0x131   :  { %v4048_v52 = vpop.f32.mrb[16].mxu0 }
 0x132   :  { %5453 = vst [vmem:[#allocation26_spill] sm:$0xff] %v4048_v52  ;;  %v4050_v53 = vpop.f32.mrb[17].mxu0 }
 0x133   :  { %5454 = vst [vmem:[#allocation27_spill] sm:$0xff] %v4050_v53 }
 0x135   :  { %v4052_v54 = vpop.f32.mrb[18].mxu0 }
 0x136   :  { %5455 = vst [vmem:[#allocation28_spill] sm:$0xff] %v4052_v54  ;;  %v4054_v55 = vpop.f32.mrb[19].mxu0 }
 0x137   :  { %5456 = vst [vmem:[#allocation29_spill] sm:$0xff] %v4054_v55 }
 0x139   :  { %v4056_v56 = vpop.f32.mrb[20].mxu0 }
 0x13a   :  { %5457 = vst [vmem:[#allocation30_spill] sm:$0xff] %v4056_v56  ;;  %v4058_v57 = vpop.f32.mrb[21].mxu0 }
 0x13b   :  { %5458 = vst [vmem:[#allocation31_spill] sm:$0xff] %v4058_v57 }
 0x13d   :  { %v4060_v58 = vpop.f32.mrb[22].mxu0 }
 0x13e   :  { %5459 = vst [vmem:[#allocation32_spill] sm:$0xff] %v4060_v58  ;;  %v4062_v59 = vpop.f32.mrb[23].mxu0 }
 0x13f   :  { %5460 = vst [vmem:[#allocation33_spill] sm:$0xff] %v4062_v59 }
 0x141   :  { %v4064_v60 = vpop.f32.mrb[24].mxu0 }
 0x142   :  { %5461 = vst [vmem:[#allocation34_spill] sm:$0xff] %v4064_v60  ;;  %v4066_v61 = vpop.f32.mrb[25].mxu0 }
 0x143   :  { %5462 = vst [vmem:[#allocation35_spill] sm:$0xff] %v4066_v61 }
 0x145   :  { %v4068_v62 = vpop.f32.mrb[26].mxu0 }
 0x146   :  { %5463 = vst [vmem:[#allocation36_spill] sm:$0xff] %v4068_v62  ;;  %v4070_v63 = vpop.f32.mrb[27].mxu0 }
 0x147   :  { %5464 = vst [vmem:[#allocation37_spill] sm:$0xff] %v4070_v63 }
 0x149   :  { %v4072_v1 = vpop.f32.mrb[28].mxu0 }
 0x14a   :  { %5465 = vst [vmem:[#allocation38_spill] sm:$0xff] %v4072_v1  ;;  %v4074_v2 = vpop.f32.mrb[29].mxu0 }
 0x14b   :  { %5466 = vst [vmem:[#allocation39_spill] sm:$0xff] %v4074_v2 }
 0x14d   :  { %v4076_v3 = vpop.f32.mrb[30].mxu0 }
 0x14e   :  { %5467 = vst [vmem:[#allocation40_spill] sm:$0xff] %v4076_v3  ;;  %v4078_v4 = vpop.f32.mrb[31].mxu0 }
 0x14f   :  { %5468 = vst [vmem:[#allocation41_spill] sm:$0xff] %v4078_v4 }
 0x151   :  { %v494_v7 = vpop.f32.mrb[32].mxu0 }
 0x152   :  { %v495_v10 = vadd.f32 %v494_v7, %v254_v6  ;;  %v496_v11 = vpop.f32.mrb[33].mxu0 }
 0x153   :  { %v497_v12 = vadd.f32 %v496_v11, %v254_v6 }
 0x154   :  { %v4080_v13 = vmax.f32 %v495_v10, 0.0 }
 0x155   :  { %v4082_v15 = vmax.f32 %v497_v12, 0.0  ;;  %v500_v19 = vpop.f32.mrb[34].mxu0 }
 0x156   :  { %v501_v20 = vadd.f32 %v500_v19, %v259_v16  ;;  %v502_v21 = vpop.f32.mrb[35].mxu0 }
 0x157   :  { %v503_v22 = vadd.f32 %v502_v21, %v259_v16  ;;  %v557_v25 = vadd.f32 %v4082_v15, %v4080_v13 }
 0x158   :  { %v4090_v26 = vmax.f32 %v501_v20, 0.0 }
 0x159   :  { %v4092_v27 = vmax.f32 %v503_v22, 0.0  ;;  %558 = vadd.xlane.f32.xlu0 %v557_v25 }
 0x15b   :  { %v560_v31 = vadd.f32 %v4092_v27, %v4090_v26 }
 0x15d   :  { %564 = vadd.xlane.f32.xlu0 %v563_v28  ;;  %561 = vadd.xlane.f32.xlu1 %v560_v31 }
 0x161   :  { %567 = vadd.xlane.f32.xlu0 %v566_v34 }
 0x1e6   :  { %v559_v35 = vpop.xlane.xlu0 %558 }
 0x1e7   :  { %v570_v38 = vmul.f32 0.00390625, %v559_v35 }
 0x1e9   :  { %v4105_v39 = vsub.f32 %v4080_v13, %v570_v38  ;;  %v4108_v5 = vsub.f32 %v4082_v15, %v570_v38 }
 0x1ea   :  { %v562_v6 = vpop.xlane.xlu1 %561  ;;  %v565_v7 = vpop.xlane.xlu0 %564 }
 0x1eb   :  { %v571_v8 = vmul.f32 0.00390625, %v562_v6  ;;  %v572_v9 = vmul.f32 0.00390625, %v565_v7  ;;  %v582_v10 = vmul.f32 %v4105_v39, %v4105_v39  ;;  %v583_v11 = vmul.f32 %v4108_v5, %v4108_v5 }
 0x1ed   :  { %v4115_v12 = vsub.f32 %v4090_v26, %v571_v8  ;;  %v4118_v14 = vsub.f32 %v4092_v27, %v571_v8  ;;  %v4121_v16 = vsub.f32 %v4084_v17, %v572_v9  ;;  %v4124_v19 = vsub.f32 %v4086_v18, %v572_v9  ;;  %v92_v9 = vld [vmem:[%s5434_s7 + $0xa0] sm:$0xff] }
 0x1ee   :  { %v568_v20 = vpop.xlane.xlu0 %567  ;;  %v590_v21 = vadd.f32 %v583_v11, %v582_v10  ;;  %v94_v10 = vld [vmem:[%s5434_s7 + $0xb0] sm:$0xff]  ;;  %v95_v11 = vld [vmem:[%s5434_s7 + $0xb8] sm:$0xff] }
 0x1ef   :  { %v573_v22 = vmul.f32 0.00390625, %v568_v20  ;;  %v584_v23 = vmul.f32 %v4115_v12, %v4115_v12  ;;  %v585_v24 = vmul.f32 %v4118_v14, %v4118_v14  ;;  %v586_v25 = vmul.f32 %v4121_v16, %v4121_v16  ;;  %v93_v20 = vld [vmem:[%s5434_s7 + $0xa8] sm:$0xff] }
 0x1f0   :  { %591 = vadd.xlane.f32.xlu1 %v590_v21  ;;  %v587_v28 = vmul.f32 %v4124_v19, %v4124_v19  ;;  %v97_v21 = vld [vmem:[%s5434_s7 + $0xc8] sm:$0xff] }
 0x1f1   :  { %v4135_v31 = vsub.f32 %v4096_v29, %v573_v22  ;;  %v4138_v34 = vsub.f32 %v4098_v30, %v573_v22  ;;  %v593_v35 = vadd.f32 %v585_v24, %v584_v23  ;;  %v96_v22 = vld [vmem:[%s5434_s7 + $0xc0] sm:$0xff]  ;;  %v99_v23 = vld [vmem:[%s5434_s7 + $0xd8] sm:$0xff]  ;;  %v98_v24 = vld [vmem:[%s5434_s7 + $0xd0] sm:$0xff] }
 0x1f2   :  { %v596_v38 = vadd.f32 %v587_v28, %v586_v25  ;;  %v101_v25 = vld [vmem:[%s5434_s7 + $0xe8] sm:$0xff]  ;;  %v100_v28 = vld [vmem:[%s5434_s7 + $0xe0] sm:$0xff] }
 0x1f3   :  { %594 = vadd.xlane.f32.xlu0 %v593_v35  ;;  %v588_v6 = vmul.f32 %v4135_v31, %v4135_v31  ;;  %v589_v7 = vmul.f32 %v4138_v34, %v4138_v34  ;;  %v103_v35 = vld [vmem:[%s5434_s7 + $0xf8] sm:$0xff] }
 0x1f4   :  { %597 = vadd.xlane.f32.xlu1 %v596_v38  ;;  %v102_v38 = vld [vmem:[%s5434_s7 + $0xf0] sm:$0xff] }
 0x1f5   :  { %v599_v8 = vadd.f32 %v589_v7, %v588_v6  ;;  %v105_v6 = vld [vmem:[%s5434_s7 + $0x108] sm:$0xff]  ;;  %v104_v7 = vld [vmem:[%s5434_s7 + $0x100] sm:$0xff] }
 0x1f7   :  { %600 = vadd.xlane.f32.xlu0 %v599_v8  ;;  %v107_v8 = vld [vmem:[%s5434_s7 + $0x118] sm:$0xff] }
 0x205   :  { %678 = vperm.xlu1 %3405, %v92_v9   ;;  %v106_v9 = vld [vmem:[%s5434_s7 + $0x110] sm:$0xff] }
 0x209   :  { %688 = vperm.xlu1 %3405, %v94_v10   ;;  %v109_v10 = vld [vmem:[%s5434_s7 + $0x128] sm:$0xff] }
 0x20d   :  { %693 = vperm.xlu1 %3405, %v95_v11   ;;  %683 = vperm.xlu0 %3404, %v93_v20   ;;  %v108_v11 = vld [vmem:[%s5434_s7 + $0x120] sm:$0xff]  ;;  %v111_v20 = vld [vmem:[%s5434_s7 + $0x138] sm:$0xff] }
 0x211   :  { %703 = vperm.xlu1 %3405, %v97_v21   ;;  %698 = vperm.xlu0 %3404, %v96_v22   ;;  %v110_v21 = vld [vmem:[%s5434_s7 + $0x130] sm:$0xff] }
 0x215   :  { %713 = vperm.xlu1 %3405, %v99_v23   ;;  %708 = vperm.xlu0 %3404, %v98_v24   ;;  %v623_v24 = vlaneseq }
 0x219   :  { %723 = vperm.xlu1 %3405, %v101_v25   ;;  %718 = vperm.xlu0 %3404, %v100_v28  }
 0x21d   :  { %733 = vperm.xlu1 %3405, %v103_v35   ;;  %728 = vperm.xlu0 %3404, %v102_v38  }
 0x221   :  { %743 = vperm.xlu1 %3405, %v105_v6   ;;  %738 = vperm.xlu0 %3404, %v104_v7  }
 0x225   :  { %753 = vperm.xlu1 %3405, %v107_v8   ;;  %748 = vperm.xlu0 %3404, %v106_v9   ;;  %v4204_v8 = vshrl.u32 %v623_v24, 7 }
 0x229   :  { %1362 = vperm.xlu1 %3405, %v109_v10   ;;  %1357 = vperm.xlu0 %3404, %v108_v11  }
 0x22d   :  { %1372 = vperm.xlu1 %3405, %v111_v20   ;;  %1367 = vperm.xlu0 %3404, %v110_v21   ;;  %v4207_v20 = vsub.s32 0, %v4204_v8  ;;  %v4210_v21 = vsub.s32 1, %v4204_v8 }
 0x27d   :  { %v592_v22 = vpop.xlane.xlu1 %591 }
 0x27e   :  { %v602_v23 = vmul.f32 0.00390625, %v592_v22  ;;  %v136_v22 = vld [vmem:[#allocation7] ss:$8 sm:$0x3] }
 0x280   :  { %v606_v25 = vadd.f32 1e-05, %v602_v23  ;;  %v595_v28 = vpop.xlane.xlu0 %594  ;;  %v626_v23 = vrot.slane %v136_v22, %v4207_v20 }
 0x281   :  { %v598_v35 = vpop.xlane.xlu1 %597  ;;  %v603_v38 = vmul.f32 0.00390625, %v595_v28  ;;  %v138_v28 = vld [vmem:[#allocation7 + $0x1] ss:$8 sm:$0x3] }
 0x282   :  { %3598 = vrsqrt.f32 %v606_v25  ;;  %v604_v6 = vmul.f32 0.00390625, %v598_v35  ;;  %v630_v25 = vrot.slane %v136_v22, %v4210_v21 }
 0x283   :  { %v607_v7 = vadd.f32 1e-05, %v603_v38 }
 0x284   :  { %v608_v9 = vadd.f32 1e-05, %v604_v6  ;;  %v601_v10 = vpop.xlane.xlu0 %600 }
 0x285   :  { %3600 = vrsqrt.f32 %v607_v7  ;;  %v605_v11 = vmul.f32 0.00390625, %v601_v10  ;;  %v649_v10 = vrot.slane %v138_v28, %v4210_v21 }
 0x286   :  { %3602 = vrsqrt.f32 %v608_v9  ;;  %v645_v9 = vrot.slane %v138_v28, %v4207_v20 }
 0x287   :  { %v609_v0 = vadd.f32 1e-05, %v605_v11 }
 0x289   :  { %3604 = vrsqrt.f32 %v609_v0 }
 0x28c   :  { %v3599_v24 = vpop.eup %3598 }
 0x28d   :  { %v614_v35 = vmul.f32 %v3599_v24, %v4105_v39  ;;  %v615_v38 = vmul.f32 %v3599_v24, %v4108_v5 }
 0x28f   :  { %v3601_v6 = vpop.eup %3600  ;;  %v634_v7 = vmul.f32 %v630_v25, %v615_v38  ;;  %v633_v11 = vmul.f32 %v626_v23, %v614_v35 }
 0x290   :  { %v3603_v4 = vpop.eup %3602  ;;  %v616_v0 = vmul.f32 %v3601_v6, %v4115_v12  ;;  %v617_v3 = vmul.f32 %v3601_v6, %v4118_v14 }
 0x291   :  { %v618_v22 = vmul.f32 %v3603_v4, %v4121_v16  ;;  %v619_v2 = vmul.f32 %v3603_v4, %v4124_v19  ;;  %v653_v5 = vadd.f32 %v649_v10, %v634_v7  ;;  %v652_v24 = vadd.f32 %v645_v9, %v633_v11 }
 0x292   :  { %v636_v1 = vmul.f32 %v630_v25, %v617_v3  ;;  %v635_v39 = vmul.f32 %v626_v23, %v616_v0  ;;  %v672_v0 = vld [vmem:[%s5429_s2 + $0x60] sm:$0xff] }
 0x293   :  { %v3605_v63 = vpop.eup %3604  ;;  %v638_v38 = vmul.f32 %v630_v25, %v619_v2  ;;  %v637_v62 = vmul.f32 %v626_v23, %v618_v22  ;;  %v665_v2 = vld [vmem:[%s5429_s2 + $0x28] sm:$0xff] }
 0x294   :  { %v620_v61 = vmul.f32 %v3605_v63, %v4135_v31  ;;  %v655_v28 = vadd.f32 %v649_v10, %v636_v1  ;;  %v654_v35 = vadd.f32 %v645_v9, %v635_v39  ;;  %v621_v60 = vmul.f32 %v3605_v63, %v4138_v34  ;;  %v660_v1 = vld [vmem:[%s5429_s2] sm:$0xff]  ;;  %v666_v31 = vld [vmem:[%s5429_s2 + $0x30] sm:$0xff]  ;;  %v667_v34 = vld [vmem:[%s5429_s2 + $0x38] sm:$0xff] }
 0x295   :  { %v657_v16 = vadd.f32 %v649_v10, %v638_v38  ;;  %v656_v3 = vadd.f32 %v645_v9, %v637_v62  ;;  %v5469_v63 = vmov 0.0   ;;  %v664_v62 = vld [vmem:[%s5429_s2 + $0x20] sm:$0xff]  ;;  %v673_v22 = vld [vmem:[%s5429_s2 + $0x68] sm:$0xff]  ;;  %v674_v39 = vld [vmem:[%s5429_s2 + $0x70] sm:$0xff] }
 0x296   :  { %v3336_v12 = vpack.c.bf16 %v655_v28, %v653_v5  ;;  %v3338_v59 = vpack.c.bf16 %v654_v35, %v652_v24  ;;  %v640_v14 = vmul.f32 %v630_v25, %v621_v60  ;;  %v639_v6 = vmul.f32 %v626_v23, %v620_v61  ;;  %v661_v60 = vld [vmem:[%s5429_s2 + $0x8] sm:$0xff]  ;;  %v663_v61 = vld [vmem:[%s5429_s2 + $0x18] sm:$0xff]  ;;  %v668_v23 = vld [vmem:[%s5429_s2 + $0x40] sm:$0xff]  ;;  %v679_v24 = vpop.permute.xlu1 %678 }
 0x297   :  { %v669_v25 = vld [vmem:[%s5429_s2 + $0x48] sm:$0xff]  ;;  %v675_v5 = vld [vmem:[%s5429_s2 + $0x78] sm:$0xff] }
 0x298   :  { %3337 = vmatprep.subr.bf16.mxu1 %v3336_v12  ;;  %v659_v4 = vadd.f32 %v649_v10, %v640_v14  ;;  %v658_v19 = vadd.f32 %v645_v9, %v639_v6  ;;  %v670_v9 = vld [vmem:[%s5429_s2 + $0x50] sm:$0xff]  ;;  %v671_v10 = vld [vmem:[%s5429_s2 + $0x58] sm:$0xff]  ;;  %v684_v6 = vpop.permute.xlu0 %683 }
 0x299   :  { %3339 = vmatpush1.bf16.msra.mxu1 %v3338_v59  ;;  %v662_v59 = vld [vmem:[%s5429_s2 + $0x10] sm:$0xff] }
 0x29a   :  { %v3340_v7 = vpack.c.bf16 %v659_v4, %v657_v16  ;;  %v3342_v11 = vpack.c.bf16 %v658_v19, %v656_v3 }
 0x29c   :  { %3341 = vmatprep.subr.bf16.mxu1 %v3340_v7 }
 0x29d   :  { %3343 = vmatpush1.bf16.msra.mxu1 %v3342_v11  ;;  %v689_v11 = vpop.permute.xlu1 %688 }
 0x2a0   :  { %3172 = vmatmul.mubr.msk.f32.vlgmr.msra.gmra.mrb[4].mxu1 %vm756_vm1, %v660_v1 }
 0x2a1   :  { %875 = vmatprep.mubr.f32.mxu1 %v5469_v63 }
 0x2a4   :  { %3173 = vmatmul.mubr.msk.f32.gmra.mrb[6].mxu1 %vm756_vm1, %v661_v60 }
 0x2a5   :  { %881 = vmatprep.mubr.f32.mxu1 %v5469_v63 }
 0x2a8   :  { %3174 = vmatmul.mubr.msk.f32.gmra.mrb[8].mxu1 %vm756_vm1, %v662_v59 }
 0x2a9   :  { %887 = vmatprep.mubr.f32.mxu1 %v5469_v63 }
 0x2ac   :  { %3175 = vmatmul.mubr.msk.f32.gmra.mrb[10].mxu1 %vm756_vm1, %v663_v61 }
 0x2ad   :  { %893 = vmatprep.mubr.f32.mxu1 %v5469_v63 }
 0x2b0   :  { %3176 = vmatmul.mubr.msk.f32.gmra.mrb[12].mxu1 %vm756_vm1, %v664_v62 }
 0x2b1   :  { %899 = vmatprep.mubr.f32.mxu1 %v5469_v63 }
 0x2b4   :  { %3177 = vmatmul.mubr.msk.f32.gmra.mrb[14].mxu1 %vm756_vm1, %v665_v2 }
 0x2b5   :  { %905 = vmatprep.mubr.f32.mxu1 %v5469_v63 }
 0x2b8   :  { %3178 = vmatmul.mubr.msk.f32.gmra.mrb[16].mxu1 %vm756_vm1, %v666_v31 }
 0x2b9   :  { %911 = vmatprep.mubr.f32.mxu1 %v5469_v63 }
 0x2bc   :  { %3179 = vmatmul.mubr.msk.f32.gmra.mrb[18].mxu1 %vm756_vm1, %v667_v34 }
 0x2bd   :  { %917 = vmatprep.mubr.f32.mxu1 %v5469_v63 }
 0x2c0   :  { %3180 = vmatmul.mubr.msk.f32.gmra.mrb[20].mxu1 %vm756_vm1, %v668_v23 }
 0x2c1   :  { %923 = vmatprep.mubr.f32.mxu1 %v5469_v63 }
 0x2c4   :  { %3181 = vmatmul.mubr.msk.f32.gmra.mrb[22].mxu1 %vm756_vm1, %v669_v25 }
 0x2c5   :  { %929 = vmatprep.mubr.f32.mxu1 %v5469_v63 }
 0x2c8   :  { %3182 = vmatmul.mubr.msk.f32.gmra.mrb[24].mxu1 %vm756_vm1, %v670_v9 }
 0x2c9   :  { %935 = vmatprep.mubr.f32.mxu1 %v5469_v63 }
 0x2cc   :  { %3183 = vmatmul.mubr.msk.f32.gmra.mrb[26].mxu1 %vm756_vm1, %v671_v10 }
 0x2cd   :  { %941 = vmatprep.mubr.f32.mxu1 %v5469_v63 }
 0x2d0   :  { %3184 = vmatmul.mubr.msk.f32.gmra.mrb[28].mxu1 %vm756_vm1, %v672_v0 }
 0x2d1   :  { %947 = vmatprep.mubr.f32.mxu1 %v5469_v63 }
 0x2d4   :  { %3185 = vmatmul.mubr.msk.f32.gmra.mrb[30].mxu1 %vm756_vm1, %v673_v22 }
 0x2d5   :  { %953 = vmatprep.mubr.f32.mxu1 %v5469_v63 }
 0x2d8   :  { %3186 = vmatmul.mubr.msk.f32.gmra.mrb[32].mxu1 %vm756_vm1, %v674_v39 }
 0x2d9   :  { %959 = vmatprep.mubr.f32.mxu1 %v5469_v63 }
 0x2dc   :  { %3187 = vmatmul.mubr.msk.f32.gmra.mrb[34].mxu1 %vm756_vm1, %v675_v5 }
 0x2dd   :  { %1322 = vmatprep.mubr.f32.mxu1 %v5469_v63 }
 0x373   :  { %v871_v38 = vpop.f32.mrb[4].mxu1 }
 0x374   :  { %v872_v28 = vadd.f32 %v871_v38, %v679_v24  ;;  %v873_v35 = vpop.f32.mrb[5].mxu1 }
 0x375   :  { %v874_v12 = vadd.f32 %v873_v35, %v679_v24  ;;  %v694_v35 = vpop.permute.xlu1 %693 }
 0x376   :  { %v998_v14 = vmul.f32 %v872_v28, %v872_v28  ;;  %v4304_v39 = vmul.f32 0.5, %v872_v28 }
 0x377   :  { %v999_v16 = vmul.f32 %v874_v12, %v874_v12  ;;  %v877_v4 = vpop.f32.mrb[6].mxu1 }
 0x378   :  { %v1030_v3 = vmul.f32 %v998_v14, %v872_v28  ;;  %v878_v19 = vadd.f32 %v877_v4, %v684_v6  ;;  %v879_v7 = vpop.f32.mrb[7].mxu1 }
 0x379   :  { %v1031_v1 = vmul.f32 %v999_v16, %v874_v12  ;;  %v880_v60 = vadd.f32 %v879_v7, %v684_v6 }
 0x37a   :  { %v1062_v59 = vmul.f32 0.044715, %v1030_v3  ;;  %v1000_v61 = vmul.f32 %v878_v19, %v878_v19  ;;  %v4306_v14 = vmul.f32 0.5, %v878_v19  ;;  %v4308_v3 = vmul.f32 0.5, %v874_v12 }
 0x37b   :  { %v1063_v62 = vmul.f32 0.044715, %v1031_v1  ;;  %v1001_v2 = vmul.f32 %v880_v60, %v880_v60  ;;  %v883_v31 = vpop.f32.mrb[8].mxu1 }
 0x37c   :  { %v1094_v34 = vadd.f32 %v1062_v59, %v872_v28  ;;  %v1032_v23 = vmul.f32 %v1000_v61, %v878_v19  ;;  %v884_v25 = vadd.f32 %v883_v31, %v689_v11  ;;  %v885_v9 = vpop.f32.mrb[9].mxu1 }
 0x37d   :  { %v1095_v10 = vadd.f32 %v1063_v62, %v874_v12  ;;  %v1033_v0 = vmul.f32 %v1001_v2, %v880_v60  ;;  %v886_v22 = vadd.f32 %v885_v9, %v689_v11  ;;  %v4312_v9 = vmul.f32 0.5, %v880_v60 }
 0x37e   :  { %v1126_v5 = vmul.f32 0.7978846, %v1094_v34  ;;  %v1064_v24 = vmul.f32 0.044715, %v1032_v23  ;;  %v1002_v38 = vmul.f32 %v884_v25, %v884_v25  ;;  %v4310_v31 = vmul.f32 0.5, %v884_v25 }
 0x37f   :  { %v1065_v6 = vmul.f32 0.044715, %v1033_v0  ;;  %v1003_v16 = vmul.f32 %v886_v22, %v886_v22  ;;  %v889_v4 = vpop.f32.mrb[10].mxu1  ;;  %v1127_v7 = vmul.f32 0.7978846, %v1095_v10  ;;  %v699_v0 = vpop.permute.xlu0 %698  ;;  %v4314_v10 = vmul.f32 0.5, %v886_v22 }
 0x380   :  { %v1096_v1 = vadd.f32 %v1064_v24, %v878_v19  ;;  %v1034_v59 = vmul.f32 %v1002_v38, %v884_v25  ;;  %v890_v61 = vadd.f32 %v889_v4, %v694_v35  ;;  %v891_v62 = vpop.f32.mrb[11].mxu1  ;;  %3606 = vtanh.f32 %v1126_v5 }
 0x381   :  { %v1097_v11 = vadd.f32 %v1065_v6, %v880_v60  ;;  %v1035_v28 = vmul.f32 %v1003_v16, %v886_v22  ;;  %v892_v2 = vadd.f32 %v891_v62, %v694_v35  ;;  %3608 = vtanh.f32 %v1127_v7 }
 0x382   :  { %v1066_v34 = vmul.f32 0.044715, %v1034_v59  ;;  %v1004_v23 = vmul.f32 %v890_v61, %v890_v61  ;;  %v1128_v19 = vmul.f32 0.7978846, %v1096_v1  ;;  %v4316_v59 = vmul.f32 0.5, %v890_v61 }
 0x383   :  { %v1129_v58 = vmul.f32 0.7978846, %v1097_v11  ;;  %v1067_v57 = vmul.f32 0.044715, %v1035_v28  ;;  %v1005_v12 = vmul.f32 %v892_v2, %v892_v2  ;;  %v895_v56 = vpop.f32.mrb[12].mxu1  ;;  %v4318_v55 = vmul.f32 0.5, %v892_v2  ;;  %v704_v11 = vpop.permute.xlu1 %703 }
 0x384   :  { %v1098_v24 = vadd.f32 %v1066_v34, %v884_v25  ;;  %v1036_v38 = vmul.f32 %v1004_v23, %v890_v61  ;;  %v896_v5 = vadd.f32 %v895_v56, %v699_v0  ;;  %v897_v6 = vpop.f32.mrb[13].mxu1 }
 0x385   :  { %v1099_v35 = vadd.f32 %v1067_v57, %v886_v22  ;;  %v1037_v16 = vmul.f32 %v1005_v12, %v892_v2  ;;  %v898_v4 = vadd.f32 %v897_v6, %v699_v0  ;;  %3610 = vtanh.f32 %v1129_v58 }
 0x386   :  { %v1068_v60 = vmul.f32 0.044715, %v1036_v38  ;;  %v1006_v62 = vmul.f32 %v896_v5, %v896_v5  ;;  %v1130_v28 = vmul.f32 0.7978846, %v1098_v24  ;;  %3612 = vtanh.f32 %v1128_v19  ;;  %v709_v24 = vpop.permute.xlu0 %708 }
 0x387   :  { %v1069_v54 = vmul.f32 0.044715, %v1037_v16  ;;  %v1007_v53 = vmul.f32 %v898_v4, %v898_v4  ;;  %v901_v1 = vpop.f32.mrb[14].mxu1  ;;  %v1131_v57 = vmul.f32 0.7978846, %v1099_v35  ;;  %v4322_v12 = vmul.f32 0.5, %v896_v5  ;;  %v714_v50 = vpop.permute.xlu1 %713 }
 0x388   :  { %v1100_v25 = vadd.f32 %v1068_v60, %v890_v61  ;;  %v1038_v56 = vmul.f32 %v1006_v62, %v896_v5  ;;  %v902_v34 = vadd.f32 %v901_v1, %v704_v11  ;;  %v903_v7 = vpop.f32.mrb[15].mxu1  ;;  %v4324_v52 = vmul.f32 0.5, %v898_v4 }
 0x389   :  { %v1101_v22 = vadd.f32 %v1069_v54, %v892_v2  ;;  %v1039_v23 = vmul.f32 %v1007_v53, %v898_v4  ;;  %v4320_v0 = vadd.f32 %v903_v7, %v704_v11  ;;  %3614 = vtanh.f32 %v1130_v28 }
 0x38a   :  { %v1070_v38 = vmul.f32 0.044715, %v1038_v56  ;;  %v1008_v6 = vmul.f32 %v902_v34, %v902_v34  ;;  %v3607_v58 = vpop.eup %3606  ;;  %v1132_v16 = vmul.f32 0.7978846, %v1100_v25  ;;  %3616 = vtanh.f32 %v1131_v57  ;;  %v719_v47 = vpop.permute.xlu0 %718 }
 0x38b   :  { %v1071_v19 = vmul.f32 0.044715, %v1039_v23  ;;  %v1009_v61 = vmul.f32 %v4320_v0, %v4320_v0  ;;  %v907_v60 = vpop.f32.mrb[16].mxu1  ;;  %v1133_v35 = vmul.f32 0.7978846, %v1101_v22  ;;  %v4331_v7 = vmul.f32 0.5, %v902_v34  ;;  %v3609_v51 = vpop.eup %3608 }
 0x38c   :  { %v1102_v54 = vadd.f32 %v1070_v38, %v896_v5  ;;  %v1040_v53 = vmul.f32 %v1008_v6, %v902_v34  ;;  %v908_v2 = vadd.f32 %v907_v60, %v709_v24  ;;  %v909_v62 = vpop.f32.mrb[17].mxu1  ;;  %v4333_v23 = vadd.f32 1.0, %v3607_v58 }
 0x38d   :  { %v1103_v11 = vadd.f32 %v1071_v19, %v898_v4  ;;  %v1041_v1 = vmul.f32 %v1009_v61, %v4320_v0  ;;  %v4329_v56 = vadd.f32 %v909_v62, %v709_v24  ;;  %3618 = vtanh.f32 %v1132_v16 }
 0x38e   :  { %v1072_v28 = vmul.f32 0.044715, %v1040_v53  ;;  %v1010_v25 = vmul.f32 %v908_v2, %v908_v2  ;;  %v1134_v22 = vmul.f32 0.7978846, %v1102_v54  ;;  %3620 = vtanh.f32 %v1133_v35 }
 0x38f   :  { %v1073_v5 = vmul.f32 0.044715, %v1041_v1  ;;  %v1011_v38 = vmul.f32 %v4329_v56, %v4329_v56  ;;  %v913_v57 = vpop.f32.mrb[18].mxu1  ;;  %v3611_v61 = vpop.eup %3610  ;;  %v1135_v60 = vmul.f32 0.7978846, %v1103_v11  ;;  %v4337_v53 = vmul.f32 0.5, %v908_v2 }
 0x390   :  { %v1104_v4 = vadd.f32 %v1072_v28, %v902_v34  ;;  %v1042_v6 = vmul.f32 %v1010_v25, %v908_v2  ;;  %v914_v24 = vadd.f32 %v913_v57, %v714_v50  ;;  %v915_v19 = vpop.f32.mrb[19].mxu1  ;;  %v3613_v16 = vpop.eup %3612  ;;  %v1191_v48 = vadd.f32 1.0, %v3609_v51 }
 0x391   :  { %v1043_v58 = vmul.f32 %v1011_v38, %v4329_v56  ;;  %v4340_v62 = vadd.f32 %v915_v19, %v714_v50  ;;  %v1105_v54 = vadd.f32 %v1073_v5, %v4320_v0  ;;  %3622 = vtanh.f32 %v1134_v22 }
 0x392   :  { %v1074_v1 = vmul.f32 0.044715, %v1042_v6  ;;  %v1012_v49 = vmul.f32 %v914_v24, %v914_v24  ;;  %v1136_v34 = vmul.f32 0.7978846, %v1104_v4  ;;  %v1193_v50 = vadd.f32 1.0, %v3611_v61 }
 0x393   :  { %v1075_v35 = vmul.f32 0.044715, %v1043_v58  ;;  %v1013_v28 = vmul.f32 %v4340_v62, %v4340_v62  ;;  %v919_v11 = vpop.f32.mrb[20].mxu1  ;;  %v4345_v19 = vpop.eup %3614  ;;  %3624 = vtanh.f32 %v1135_v60  ;;  %v1137_v22 = vmul.f32 0.7978846, %v1105_v54 }
 0x394   :  { %v1106_v25 = vadd.f32 %v1074_v1, %v908_v2  ;;  %v1044_v57 = vmul.f32 %v1012_v49, %v914_v24  ;;  %v920_v46 = vadd.f32 %v919_v11, %v719_v47  ;;  %v921_v38 = vpop.f32.mrb[21].mxu1  ;;  %v4351_v4 = vmul.f32 0.5, %v914_v24  ;;  %v3617_v44 = vpop.eup %3616 }
 0x395   :  { %v1107_v5 = vadd.f32 %v1075_v35, %v4329_v56  ;;  %v1045_v51 = vmul.f32 %v1013_v28, %v4340_v62  ;;  %v4349_v6 = vadd.f32 %v921_v38, %v719_v47  ;;  %3626 = vtanh.f32 %v1136_v34  ;;  %v724_v60 = vpop.permute.xlu1 %723 }
 0x396   :  { %v1076_v58 = vmul.f32 0.044715, %v1044_v57  ;;  %v1014_v45 = vmul.f32 %v920_v46, %v920_v46  ;;  %v1138_v49 = vmul.f32 0.7978846, %v1106_v25  ;;  %v1223_v28 = vmul.f32 %v1191_v48, %v4308_v3 }
 0x397   :  { %v1077_v2 = vmul.f32 0.044715, %v1045_v51  ;;  %v1015_v61 = vmul.f32 %v4349_v6, %v4349_v6  ;;  %v925_v1 = vpop.f32.mrb[22].mxu1  ;;  %v1225_v47 = vmul.f32 %v1193_v50, %v4312_v9  ;;  %v4357_v38 = vpop.eup %3618  ;;  %v1139_v57 = vmul.f32 0.7978846, %v1107_v5 }
 0x398   :  { %v1108_v11 = vadd.f32 %v1076_v58, %v914_v24  ;;  %v1046_v35 = vmul.f32 %v1014_v45, %v920_v46  ;;  %v927_v54 = vpop.f32.mrb[23].mxu1  ;;  %v926_v25 = vadd.f32 %v925_v1, %v724_v60  ;;  %v3621_v51 = vpop.eup %3620  ;;  %3628 = vtanh.f32 %v1137_v22 }
 0x399   :  { %v1109_v43 = vadd.f32 %v1077_v2, %v4340_v62  ;;  %v1047_v34 = vmul.f32 %v1015_v61, %v4349_v6  ;;  %v3344_v41 = vpack.c.bf16 %v1225_v47, %v1223_v28  ;;  %v1192_v40 = vadd.f32 1.0, %v3613_v16  ;;  %v729_v22 = vpop.permute.xlu0 %728 }
 0x39a   :  { %v1078_v42 = vmul.f32 0.044715, %v1046_v35  ;;  %3630 = vtanh.f32 %v1138_v49  ;;  %v4361_v45 = vmul.f32 0.5, %v920_v46  ;;  %v1016_v3 = vmul.f32 %v926_v25, %v926_v25 }
 0x39b   :  { %v1079_v48 = vmul.f32 0.044715, %v1047_v34  ;;  %v931_v9 = vpop.f32.mrb[24].mxu1  ;;  %v1140_v24 = vmul.f32 0.7978846, %v1108_v11  ;;  %3345 = vmatprep.subr.bf16.mxu1 %v3344_v41  ;;  %v1222_v5 = vmul.f32 %v4333_v23, %v4304_v39  ;;  %v1224_v58 = vmul.f32 %v1192_v40, %v4306_v14  ;;  %v4366_v61 = vpop.eup %3622 }
 0x39c   :  { %v1110_v50 = vadd.f32 %v1078_v42, %v920_v46  ;;  %v933_v2 = vpop.f32.mrb[25].mxu1  ;;  %3632 = vtanh.f32 %v1139_v57  ;;  %v1141_v16 = vmul.f32 0.7978846, %v1109_v43  ;;  %v1048_v49 = vmul.f32 %v1016_v3, %v926_v25  ;;  %v734_v34 = vpop.permute.xlu1 %733 }
 0x39d   :  { %v4368_v1 = vadd.f32 %v927_v54, %v724_v60  ;;  %v1111_v35 = vadd.f32 %v1079_v48, %v4349_v6  ;;  %v3346_v28 = vpack.c.bf16 %v1224_v58, %v1222_v5  ;;  %v932_v11 = vadd.f32 %v931_v9, %v729_v22  ;;  %v4373_v41 = vpop.eup %3624 }
 0x39e   :  { %v4371_v42 = vadd.f32 %v933_v2, %v729_v22  ;;  %v4375_v46 = vmul.f32 0.5, %v926_v25  ;;  %v1080_v40 = vmul.f32 0.044715, %v1048_v49  ;;  %v1195_v14 = vadd.f32 1.0, %v3617_v44 }
 0x39f   :  { %v1017_v39 = vmul.f32 %v4368_v1, %v4368_v1  ;;  %v937_v23 = vpop.f32.mrb[26].mxu1  ;;  %3634 = vtanh.f32 %v1140_v24  ;;  %v1142_v43 = vmul.f32 0.7978846, %v1110_v50  ;;  %3347 = vmatpush1.bf16.msra.mxu1 %v3346_v28  ;;  %v1018_v60 = vmul.f32 %v932_v11, %v932_v11  ;;  %v4381_v57 = vpop.eup %3626 }
 0x3a0   :  { %v1019_v47 = vmul.f32 %v4371_v42, %v4371_v42  ;;  %v939_v54 = vpop.f32.mrb[27].mxu1  ;;  %3636 = vtanh.f32 %v1141_v16  ;;  %v1112_v48 = vadd.f32 %v1080_v40, %v926_v25  ;;  %v1197_v9 = vadd.f32 1.0, %v3621_v51 }
 0x3a1   :  { %v1049_v3 = vmul.f32 %v1017_v39, %v4368_v1  ;;  %v1143_v5 = vmul.f32 0.7978846, %v1111_v35  ;;  %v1050_v58 = vmul.f32 %v1018_v60, %v932_v11  ;;  %v938_v24 = vadd.f32 %v937_v23, %v734_v34 }
 0x3a2   :  { %v1051_v44 = vmul.f32 %v1019_v47, %v4371_v42  ;;  %v1227_v2 = vmul.f32 %v1195_v14, %v4314_v10  ;;  %v1229_v22 = vmul.f32 %v1197_v9, %v4318_v55  ;;  %v1194_v49 = vadd.f32 1.0, %v4345_v19  ;;  %v3629_v37 = vpop.eup %3628  ;;  %v739_v10 = vpop.permute.xlu0 %738 }
 0x3a3   :  { %v1081_v50 = vmul.f32 0.044715, %v1049_v3  ;;  %v943_v28 = vpop.f32.mrb[28].mxu1  ;;  %3638 = vtanh.f32 %v1142_v43  ;;  %v1082_v16 = vmul.f32 0.044715, %v1050_v58  ;;  %v1020_v40 = vmul.f32 %v938_v24, %v938_v24 }
 0x3a4   :  { %v1083_v25 = vmul.f32 0.044715, %v1051_v44  ;;  %v945_v39 = vpop.f32.mrb[29].mxu1  ;;  %v4388_v51 = vpop.eup %3630  ;;  %v1144_v35 = vmul.f32 0.7978846, %v1112_v48  ;;  %v3348_v23 = vpack.c.bf16 %v1229_v22, %v1227_v2  ;;  %v1196_v47 = vadd.f32 1.0, %v4357_v38 }
 0x3a5   :  { %v1113_v60 = vadd.f32 %v1081_v50, %v4368_v1  ;;  %v1114_v14 = vadd.f32 %v1082_v16, %v932_v11  ;;  %v1052_v19 = vmul.f32 %v1020_v40, %v938_v24  ;;  %v1226_v3 = vmul.f32 %v1194_v49, %v4310_v31 }
 0x3a6   :  { %v1115_v55 = vadd.f32 %v1083_v25, %v4371_v42  ;;  %v4394_v43 = vpop.eup %3632  ;;  %3349 = vmatprep.subr.bf16.mxu1 %v3348_v23  ;;  %v1228_v58 = vmul.f32 %v1196_v47, %v4316_v59  ;;  %v4397_v44 = vadd.f32 %v939_v54, %v734_v34  ;;  %v4399_v48 = vadd.f32 %v943_v28, %v739_v10  ;;  %v744_v47 = vpop.permute.xlu1 %743 }
 0x3a7   :  { %v1145_v9 = vmul.f32 0.7978846, %v1113_v60  ;;  %v949_v50 = vpop.f32.mrb[30].mxu1  ;;  %3640 = vtanh.f32 %v1143_v5  ;;  %v4401_v38 = vmul.f32 0.5, %v932_v11  ;;  %v1084_v2 = vmul.f32 0.044715, %v1052_v19  ;;  %v749_v36 = vpop.permute.xlu0 %748 }
 0x3a8   :  { %v4403_v22 = vadd.f32 %v945_v39, %v739_v10  ;;  %v1146_v16 = vmul.f32 0.7978846, %v1114_v14  ;;  %v4405_v25 = vmul.f32 0.5, %v938_v24  ;;  %v3350_v31 = vpack.c.bf16 %v1228_v58, %v1226_v3  ;;  %v951_v40 = vpop.f32.mrb[31].mxu1 }
 0x3a9   :  { %v1021_v49 = vmul.f32 %v4397_v44, %v4397_v44  ;;  %v4409_v59 = vpop.eup %3634  ;;  %3642 = vtanh.f32 %v1144_v35  ;;  %v1147_v54 = vmul.f32 0.7978846, %v1115_v55  ;;  %v1022_v34 = vmul.f32 %v4399_v48, %v4399_v48 }
 0x3aa   :  { %v1023_v11 = vmul.f32 %v4403_v22, %v4403_v22  ;;  %v4415_v5 = vpop.eup %3636  ;;  %3644 = vtanh.f32 %v1145_v9  ;;  %v1116_v28 = vadd.f32 %v1084_v2, %v938_v24  ;;  %3351 = vmatpush1.bf16.msra.mxu1 %v3350_v31  ;;  %v1199_v60 = vadd.f32 1.0, %v4373_v41 }
 0x3ab   :  { %v1053_v39 = vmul.f32 %v1021_v49, %v4397_v44  ;;  %v955_v23 = vpop.f32.mrb[32].mxu1  ;;  %v1054_v35 = vmul.f32 %v1022_v34, %v4399_v48  ;;  %v977_v14 = vmul.f32 0.5, %v4320_v0  ;;  %v1201_v55 = vadd.f32 1.0, %v3629_v37 }
 0x3ac   :  { %v1055_v10 = vmul.f32 %v1023_v11, %v4403_v22  ;;  %v957_v19 = vpop.f32.mrb[33].mxu1  ;;  %3646 = vtanh.f32 %v1146_v16  ;;  %v4422_v58 = vadd.f32 %v949_v50, %v744_v47  ;;  %v1198_v24 = vadd.f32 1.0, %v4366_v61 }
 0x3ad   :  { %v1085_v3 = vmul.f32 0.044715, %v1053_v39  ;;  %v4425_v9 = vpop.eup %3638  ;;  %v1086_v2 = vmul.f32 0.044715, %v1054_v35  ;;  %v1231_v31 = vmul.f32 %v1199_v60, %v4324_v52  ;;  %v1233_v49 = vmul.f32 %v1201_v55, %v977_v14 }
 0x3ae   :  { %v1087_v41 = vmul.f32 0.044715, %v1055_v10  ;;  %v1148_v34 = vmul.f32 0.7978846, %v1116_v28  ;;  %v1024_v37 = vmul.f32 %v4422_v58, %v4422_v58  ;;  %v1200_v0 = vadd.f32 1.0, %v4381_v57 }
 0x3af   :  { %v1117_v11 = vadd.f32 %v1085_v3, %v4397_v44  ;;  %v961_v16 = vpop.f32.mrb[34].mxu1  ;;  %v1118_v50 = vadd.f32 %v1086_v2, %v4399_v48  ;;  %v3352_v39 = vpack.c.bf16 %v1233_v49, %v1231_v31  ;;  %v1230_v35 = vmul.f32 %v1198_v24, %v4322_v12 }
 0x3b0   :  { %v1119_v61 = vadd.f32 %v1087_v41, %v4403_v22  ;;  %v963_v10 = vpop.f32.mrb[35].mxu1  ;;  %v1056_v28 = vmul.f32 %v1024_v37, %v4422_v58  ;;  %v1232_v60 = vmul.f32 %v1200_v0, %v4331_v7  ;;  %v4437_v14 = vadd.f32 %v951_v40, %v744_v47 }
 0x3b1   :  { %v1149_v52 = vmul.f32 0.7978846, %v1117_v11  ;;  %v3641_v55 = vpop.eup %3640  ;;  %3648 = vtanh.f32 %v1147_v54  ;;  %v1150_v57 = vmul.f32 0.7978846, %v1118_v50  ;;  %3353 = vmatprep.subr.bf16.mxu1 %v3352_v39  ;;  %v4439_v3 = vadd.f32 %v955_v23, %v749_v36 }
 0x3b2   :  { %v4441_v2 = vadd.f32 %v957_v19, %v749_v36  ;;  %3650 = vtanh.f32 %v1148_v34  ;;  %v1088_v41 = vmul.f32 0.044715, %v1056_v28  ;;  %v3354_v12 = vpack.c.bf16 %v1232_v60, %v1230_v35  ;;  %v754_v19 = vpop.permute.xlu1 %753 }
 0x3b3   :  { %v1025_v24 = vmul.f32 %v4437_v14, %v4437_v14  ;;  %v3643_v31 = vpop.eup %3642  ;;  %3652 = vtanh.f32 %v1149_v52  ;;  %v1151_v49 = vmul.f32 0.7978846, %v1119_v61  ;;  %v1026_v7 = vmul.f32 %v4439_v3, %v4439_v3 }
 0x3b4   :  { %v1027_v40 = vmul.f32 %v4441_v2, %v4441_v2  ;;  %v3645_v54 = vpop.eup %3644  ;;  %3654 = vtanh.f32 %v1150_v57  ;;  %v1120_v36 = vadd.f32 %v1088_v41, %v4422_v58  ;;  %3355 = vmatpush1.bf16.msra.mxu1 %v3354_v12  ;;  %v979_v47 = vmul.f32 0.5, %v4329_v56 }
 0x3b5   :  { %v1057_v23 = vmul.f32 %v1025_v24, %v4437_v14  ;;  %v1058_v34 = vmul.f32 %v1026_v7, %v4439_v3  ;;  %v981_v37 = vmul.f32 0.5, %v4340_v62  ;;  %v1203_v0 = vadd.f32 1.0, %v4394_v43 }
 0x3b6   :  { %v1059_v11 = vmul.f32 %v1027_v40, %v4441_v2  ;;  %v3647_v50 = vpop.eup %3646  ;;  %v1152_v61 = vmul.f32 0.7978846, %v1120_v36  ;;  %v1205_v35 = vadd.f32 1.0, %v4415_v5  ;;  %v4457_v52 = vadd.f32 %v961_v16, %v754_v19 }
 0x3b7   :  { %v1089_v39 = vmul.f32 0.044715, %v1057_v23  ;;  %3656 = vtanh.f32 %v1151_v49  ;;  %v1090_v28 = vmul.f32 0.044715, %v1058_v34  ;;  %v1202_v56 = vadd.f32 1.0, %v4388_v51 }
 0x3b8   :  { %v1091_v60 = vmul.f32 0.044715, %v1059_v11  ;;  %3658 = vtanh.f32 %v1152_v61  ;;  %v1235_v41 = vmul.f32 %v1203_v0, %v979_v47  ;;  %v1237_v12 = vmul.f32 %v1205_v35, %v981_v37 }
 0x3b9   :  { %v1121_v57 = vadd.f32 %v1089_v39, %v4437_v14  ;;  %v1122_v62 = vadd.f32 %v1090_v28, %v4439_v3  ;;  %v1028_v24 = vmul.f32 %v4457_v52, %v4457_v52  ;;  %v1204_v5 = vadd.f32 1.0, %v4409_v59 }
 0x3ba   :  { %v1123_v43 = vadd.f32 %v1091_v60, %v4441_v2  ;;  %v3356_v49 = vpack.c.bf16 %v1237_v12, %v1235_v41  ;;  %v1234_v7 = vmul.f32 %v1202_v56, %v4337_v53  ;;  %v4467_v40 = vadd.f32 %v963_v10, %v754_v19 }
 0x3bb   :  { %v1153_v16 = vmul.f32 0.7978846, %v1121_v57  ;;  %v3649_v51 = vpop.eup %3648  ;;  %v1154_v36 = vmul.f32 0.7978846, %v1122_v62  ;;  %v1060_v47 = vmul.f32 %v1028_v24, %v4457_v52  ;;  %v1236_v34 = vmul.f32 %v1204_v5, %v4351_v4 }
 0x3bc   :  { %v1155_v23 = vmul.f32 0.7978846, %v1123_v43  ;;  %v3651_v11 = vpop.eup %3650  ;;  %3357 = vmatprep.subr.bf16.mxu1 %v3356_v49  ;;  %v1029_v37 = vmul.f32 %v4467_v40, %v4467_v40  ;;  %v983_v59 = vmul.f32 0.5, %v4349_v6  ;;  %v985_v0 = vmul.f32 0.5, %v4368_v1 }
 0x3bd   :  { %3660 = vtanh.f32 %v1153_v16  ;;  %v3653_v53 = vpop.eup %3652  ;;  %v1092_v10 = vmul.f32 0.044715, %v1060_v47  ;;  %v3358_v19 = vpack.c.bf16 %v1236_v34, %v1234_v7  ;;  %v1207_v61 = vadd.f32 1.0, %v3641_v55 }
 0x3be   :  { %3662 = vtanh.f32 %v1154_v36  ;;  %v3655_v39 = vpop.eup %3654  ;;  %v1061_v35 = vmul.f32 %v1029_v37, %v4467_v40  ;;  %v1209_v4 = vadd.f32 1.0, %v3645_v54  ;;  %v1206_v28 = vadd.f32 1.0, %v4425_v9 }
 0x3bf   :  { %3664 = vtanh.f32 %v1155_v23  ;;  %v1124_v60 = vadd.f32 %v1092_v10, %v4457_v52  ;;  %3359 = vmatpush1.bf16.msra.mxu1 %v3358_v19  ;;  %v1239_v56 = vmul.f32 %v1207_v61, %v983_v59  ;;  %v1208_v57 = vadd.f32 1.0, %v3643_v31 }
 0x3c0   :  { %v987_v6 = vmul.f32 0.5, %v4371_v42  ;;  %v1093_v1 = vmul.f32 0.044715, %v1061_v35  ;;  %v1241_v41 = vmul.f32 %v1209_v4, %v985_v0  ;;  %v1238_v12 = vmul.f32 %v1206_v28, %v4361_v45 }
 0x3c1   :  { %v989_v55 = vmul.f32 0.5, %v4397_v44  ;;  %v3657_v62 = vpop.eup %3656  ;;  %v1156_v43 = vmul.f32 0.7978846, %v1124_v60  ;;  %v1240_v24 = vmul.f32 %v1208_v57, %v4375_v46  ;;  %v1211_v54 = vadd.f32 1.0, %v3649_v51 }
 0x3c2   :  { %v1213_v5 = vadd.f32 1.0, %v3653_v53  ;;  %v3659_v9 = vpop.eup %3658  ;;  %v1125_v16 = vadd.f32 %v1093_v1, %v4467_v40  ;;  %v3360_v49 = vpack.c.bf16 %v1241_v41, %v1239_v56  ;;  %v1210_v7 = vadd.f32 1.0, %v3647_v50 }
 0x3c3   :  { %v1212_v31 = vadd.f32 1.0, %v3651_v11  ;;  %3666 = vtanh.f32 %v1156_v43  ;;  %v3362_v42 = vpack.c.bf16 %v1240_v24, %v1238_v12  ;;  %v1243_v36 = vmul.f32 %v1211_v54, %v987_v6 }
 0x3c4   :  { %v1245_v23 = vmul.f32 %v1213_v5, %v989_v55  ;;  %v1157_v47 = vmul.f32 0.7978846, %v1125_v16  ;;  %3361 = vmatprep.subr.bf16.mxu1 %v3360_v49  ;;  %v1242_v45 = vmul.f32 %v1210_v7, %v4401_v38  ;;  %v990_v46 = vmul.f32 0.5, %v4399_v48  ;;  %v1358_v7 = vpop.permute.xlu0 %1357 }
 0x3c5   :  { %v1244_v44 = vmul.f32 %v1212_v31, %v4405_v25  ;;  %3363 = vmatpush1.bf16.msra.mxu1 %v3362_v42  ;;  %v1215_v34 = vadd.f32 1.0, %v3657_v62  ;;  %v1214_v37 = vadd.f32 1.0, %v3655_v39  ;;  %v992_v50 = vmul.f32 0.5, %v4422_v58 }
 0x3c6   :  { %v3364_v51 = vpack.c.bf16 %v1245_v23, %v1243_v36  ;;  %3668 = vtanh.f32 %v1157_v47  ;;  %v1216_v0 = vadd.f32 1.0, %v3659_v9  ;;  %v991_v10 = vmul.f32 0.5, %v4403_v22  ;;  %v1256_v9 = vld [vmem:[#allocation5 + $0x10] sm:$0xff] }
 0x3c7   :  { %v3661_v59 = vpop.eup %3660  ;;  %v3366_v11 = vpack.c.bf16 %v1244_v44, %v1242_v45  ;;  %v993_v38 = vmul.f32 0.5, %v4437_v14  ;;  %v1246_v61 = vmul.f32 %v1214_v37, %v990_v46  ;;  %v994_v56 = vmul.f32 0.5, %v4439_v3  ;;  %v1254_v3 = vld [vmem:[#allocation5] sm:$0xff]  ;;  %v1363_v44 = vpop.permute.xlu1 %1362 }
 0x3c8   :  { %v3663_v53 = vpop.eup %3662  ;;  %3365 = vmatprep.subr.bf16.mxu1 %v3364_v51  ;;  %v1217_v19 = vadd.f32 1.0, %v3661_v59  ;;  %v1248_v48 = vmul.f32 %v1216_v0, %v992_v50  ;;  %v1247_v35 = vmul.f32 %v1215_v34, %v991_v10  ;;  %v996_v57 = vmul.f32 0.5, %v4457_v52  ;;  %v1255_v52 = vld [vmem:[#allocation5 + $0x8] sm:$0xff]  ;;  %v1368_v50 = vpop.permute.xlu0 %1367 }
 0x3c9   :  { %v3665_v25 = vpop.eup %3664  ;;  %3367 = vmatpush1.bf16.msra.mxu1 %v3366_v11  ;;  %v1218_v60 = vadd.f32 1.0, %v3663_v53  ;;  %v995_v12 = vmul.f32 0.5, %v4441_v2  ;;  %v997_v55 = vmul.f32 0.5, %v4467_v40  ;;  %v1257_v2 = vld [vmem:[#allocation5 + $0x18] sm:$0xff] }
 0x3ca   :  { %v1249_v4 = vmul.f32 %v1217_v19, %v993_v38  ;;  %v3370_v39 = vpack.c.bf16 %v1248_v48, %v1246_v61  ;;  %v1219_v6 = vadd.f32 1.0, %v3665_v25 }
 0x3cb   :  { %v1250_v1 = vmul.f32 %v1218_v60, %v994_v56  ;;  %v1373_v19 = vpop.permute.xlu1 %1372  ;;  %v3417_v60 = vld [vmem:[%s5431_s4 + $0x2c] ss:$16 sps:$4 sm:$0xff]   ;;  %v3415_v56 = vld [vmem:[%s5431_s4 + $0x28] ss:$16 sps:$4 sm:$0xff]  }
 0x3cc   :  { %v3368_v28 = vpack.c.bf16 %v1249_v4, %v1247_v35  ;;  %v1251_v24 = vmul.f32 %v1219_v6, %v995_v12  ;;  %v3409_v35 = vld [vmem:[%s5431_s4 + $0x8] ss:$16 sps:$4 sm:$0xff]   ;;  %v3411_v4 = vld [vmem:[%s5431_s4 + $0xc] ss:$16 sps:$4 sm:$0xff]   ;;  %v3426_v6 = vld [vmem:[%s5431_s4 + $0x64] ss:$16 sps:$4 sm:$0xff]  }
 0x3cd   :  { %v3667_v58 = vpop.eup %3666  ;;  %v3432_v12 = vld [vmem:[%s5431_s4 + $0x84] ss:$16 sps:$4 sm:$0xff]  }
 0x3ce   :  { %3369 = vmatprep.subr.bf16.mxu1 %v3368_v28  ;;  %v1220_v22 = vadd.f32 1.0, %v3667_v58  ;;  %v3414_v28 = vld [vmem:[%s5431_s4 + $0x24] ss:$16 sps:$4 sm:$0xff]  }
 0x3cf   :  { %3371 = vmatpush1.bf16.msra.mxu1 %v3370_v39  ;;  %v3412_v39 = vld [vmem:[%s5431_s4 + $0x20] ss:$16 sps:$4 sm:$0xff]   ;;  %v3420_v58 = vld [vmem:[%s5431_s4 + $0x44] ss:$16 sps:$4 sm:$0xff]  }
 0x3d0   :  { %v3669_v14 = vpop.eup %3668  ;;  %v1252_v41 = vmul.f32 %v1220_v22, %v996_v57  ;;  %v3418_v57 = vld [vmem:[%s5431_s4 + $0x40] ss:$16 sps:$4 sm:$0xff]   ;;  %v3423_v22 = vld [vmem:[%s5431_s4 + $0x4c] ss:$16 sps:$4 sm:$0xff]  }
 0x3d1   :  { %v1221_v62 = vadd.f32 1.0, %v3669_v14  ;;  %v3421_v14 = vld [vmem:[%s5431_s4 + $0x48] ss:$16 sps:$4 sm:$0xff]  }
 0x3d2   :  { %v3374_v43 = vpack.c.bf16 %v1252_v41, %v1250_v1  ;;  %v3424_v1 = vld [vmem:[%s5431_s4 + $0x60] ss:$16 sps:$4 sm:$0xff]   ;;  %v3429_v41 = vld [vmem:[%s5431_s4 + $0x6c] ss:$16 sps:$4 sm:$0xff]  }
 0x3d3   :  { %v1253_v54 = vmul.f32 %v1221_v62, %v997_v55  ;;  %v3427_v55 = vld [vmem:[%s5431_s4 + $0x68] ss:$16 sps:$4 sm:$0xff]   ;;  %v3430_v62 = vld [vmem:[%s5431_s4 + $0x80] ss:$16 sps:$4 sm:$0xff]  }
 0x3d5   :  { %v3372_v5 = vpack.c.bf16 %v1253_v54, %v1251_v24  ;;  %v3438_v24 = vld [vmem:[%s5431_s4 + $0xa4] ss:$16 sps:$4 sm:$0xff]  }
 0x3d7   :  { %3373 = vmatprep.subr.bf16.mxu1 %v3372_v5 }
 0x3d8   :  { %3375 = vmatpush1.bf16.msra.mxu1 %v3374_v43  ;;  %v3435_v43 = vld [vmem:[%s5431_s4 + $0x8c] ss:$16 sps:$4 sm:$0xff]  }
 0x3d9   :  { %1947 = vmatprep.subr.bf16.mxu1 %v3411_v4 }
 0x3db   :  { %1323 = vmatmul.mubr.f32.vlgmr.msra.gmra.mrb[36].mxu1 %v1254_v3  ;;  %v3433_v3 = vld [vmem:[%s5431_s4 + $0x88] ss:$16 sps:$4 sm:$0xff]  }
 0x3dc   :  { %1328 = vmatprep.mubr.f32.mxu1 %v5469_v63  ;;  %1948 = vmatpush1.bf16.msra.mxu1 %v3409_v35 }
 0x3dd   :  { %1949 = vmatprep.subr.bf16.mxu1 %v3417_v60  ;;  %v3459_v60 = vld [vmem:[%s5431_s4 + $0x10c] ss:$16 sps:$4 sm:$0xff]  }
 0x3df   :  { %1329 = vmatmul.mubr.f32.gmra.mrb[38].mxu1 %v1255_v52  ;;  %v3436_v52 = vld [vmem:[%s5431_s4 + $0xa0] ss:$16 sps:$4 sm:$0xff]  }
 0x3e0   :  { %1334 = vmatprep.mubr.f32.mxu1 %v5469_v63  ;;  %1950 = vmatpush1.bf16.msra.mxu1 %v3415_v56 }
 0x3e1   :  { %1951 = vmatprep.subr.bf16.mxu1 %v3423_v22 }
 0x3e3   :  { %1335 = vmatmul.mubr.f32.gmra.mrb[40].mxu1 %v1256_v9  ;;  %v3441_v9 = vld [vmem:[%s5431_s4 + $0xac] ss:$16 sps:$4 sm:$0xff]  }
 0x3e4   :  { %1340 = vmatprep.mubr.f32.mxu1 %v5469_v63  ;;  %1952 = vmatpush1.bf16.msra.mxu1 %v3421_v14  ;;  %v3457_v14 = vld [vmem:[%s5431_s4 + $0x108] ss:$16 sps:$4 sm:$0xff]  }
 0x3e5   :  { %1953 = vmatprep.subr.bf16.mxu1 %v3429_v41  ;;  %v112_v41 = vld [vmem:[%s5434_s7 + $0x140] sm:$0xff] }
 0x3e7   :  { %1341 = vmatmul.mubr.f32.gmra.mrb[42].mxu1 %v1257_v2 }
 0x3e8   :  { %1954 = vmatpush1.bf16.msra.mxu1 %v3427_v55  ;;  %v117_v55 = vld [vmem:[%s5434_s7 + $0x168] sm:$0xff] }
 0x3e9   :  { %1955 = vmatprep.subr.bf16.mxu1 %v3435_v43  ;;  %v3460_v43 = vld [vmem:[%s5431_s4 + $0x120] ss:$16 sps:$4 sm:$0xff]  }
 0x3ec   :  { %1956 = vmatpush1.bf16.msra.mxu1 %v3433_v3  ;;  %v115_v3 = vld [vmem:[%s5434_s7 + $0x158] sm:$0xff] }
 0x3ed   :  { %1957 = vmatprep.subr.bf16.mxu1 %v3441_v9  ;;  %v3466_v9 = vld [vmem:[%s5431_s4 + $0x140] ss:$16 sps:$4 sm:$0xff]  }
 0x4ae   :  { %v1324_v40 = vpop.f32.mrb[36].mxu1 }
 0x4af   :  { %v1347_v16 = vadd.f32 %v1324_v40, %v4080_v13  ;;  %v1326_v49 = vpop.f32.mrb[37].mxu1 }
 0x4b0   :  { %v1348_v31 = vadd.f32 %v1326_v49, %v4082_v15 }
 0x4b1   :  { %v4498_v42 = vadd.f32 %v1358_v7, %v1347_v16  ;;  %v3444_v16 = vld [vmem:[%s5431_s4 + $0xc4] ss:$16 sps:$4 sm:$0xff]  }
 0x4b2   :  { %v4500_v36 = vadd.f32 %v1358_v7, %v1348_v31  ;;  %v1330_v23 = vpop.f32.mrb[38].mxu1 }
 0x4b3   :  { %v1349_v47 = vadd.f32 %v1330_v23, %v4090_v26  ;;  %v1332_v45 = vpop.f32.mrb[39].mxu1 }
 0x4b4   :  { %v1350_v46 = vadd.f32 %v1332_v45, %v4092_v27  ;;  %v1383_v51 = vadd.f32 %v4500_v36, %v4498_v42  ;;  %v3442_v45 = vld [vmem:[%s5431_s4 + $0xc0] ss:$16 sps:$4 sm:$0xff]  }
 0x4b5   :  { %v4506_v34 = vadd.f32 %v1363_v44, %v1349_v47  ;;  %v3439_v47 = vld [vmem:[%s5431_s4 + $0xa8] ss:$16 sps:$4 sm:$0xff]  }
 0x4b6   :  { %v4508_v13 = vadd.f32 %v1363_v44, %v1350_v46  ;;  %v1336_v37 = vpop.f32.mrb[40].mxu1  ;;  %1384 = vadd.xlane.f32.xlu0 %v1383_v51  ;;  %v3447_v44 = vld [vmem:[%s5431_s4 + $0xcc] ss:$16 sps:$4 sm:$0xff]   ;;  %1958 = vmatpush1.bf16.msra.mxu1 %v3439_v47 }
 0x4b7   :  { %v1351_v15 = vadd.f32 %v1336_v37, %v4084_v17  ;;  %v1338_v59 = vpop.f32.mrb[41].mxu1  ;;  %1959 = vmatprep.subr.bf16.mxu1 %v3447_v44  ;;  %v119_v47 = vld [vmem:[%s5434_s7 + $0x178] sm:$0xff]  ;;  %v3472_v44 = vld [vmem:[%s5431_s4 + $0x160] ss:$16 sps:$4 sm:$0xff]  }
 0x4b8   :  { %v1352_v11 = vadd.f32 %v1338_v59, %v4086_v18  ;;  %v1386_v26 = vadd.f32 %v4508_v13, %v4506_v34 }
 0x4b9   :  { %v4514_v0 = vadd.f32 %v1368_v50, %v1351_v15  ;;  %v3450_v15 = vld [vmem:[%s5431_s4 + $0xe4] ss:$16 sps:$4 sm:$0xff]  }
 0x4ba   :  { %v4516_v27 = vadd.f32 %v1368_v50, %v1352_v11  ;;  %1387 = vadd.xlane.f32.xlu1 %v1386_v26  ;;  %v1342_v53 = vpop.f32.mrb[42].mxu1 }
 0x4bb   :  { %v1353_v10 = vadd.f32 %v1342_v53, %v4096_v29  ;;  %v1344_v38 = vpop.f32.mrb[43].mxu1  ;;  %v3406_v29 = vld [vmem:[%s5431_s4] ss:$16 sps:$4 sm:$0xff]   ;;  %v3445_v53 = vld [vmem:[%s5431_s4 + $0xc8] ss:$16 sps:$4 sm:$0xff]  }
 0x4bc   :  { %v1354_v25 = vadd.f32 %v1344_v38, %v4098_v30  ;;  %v1389_v17 = vadd.f32 %v4516_v27, %v4514_v0  ;;  %v3408_v30 = vld [vmem:[%s5431_s4 + $0x4] ss:$16 sps:$4 sm:$0xff]   ;;  %v3453_v38 = vld [vmem:[%s5431_s4 + $0xec] ss:$16 sps:$4 sm:$0xff]   ;;  %1960 = vmatpush1.bf16.msra.mxu1 %v3445_v53  ;;  %v3481_v53 = vld [vmem:[%s5431_s4 + $0x188] ss:$16 sps:$4 sm:$0xff]  }
 0x4bd   :  { %v4522_v61 = vadd.f32 %v1373_v19, %v1353_v10  ;;  %1894 = vmatprep.subr.bf16.mxu0 %v3408_v30  ;;  %v3448_v10 = vld [vmem:[%s5431_s4 + $0xe0] ss:$16 sps:$4 sm:$0xff]   ;;  %1961 = vmatprep.subr.bf16.mxu1 %v3453_v38  ;;  %v3489_v38 = vld [vmem:[%s5431_s4 + $0x1ac] ss:$16 sps:$4 sm:$0xff]  }
 0x4be   :  { %v4524_v18 = vadd.f32 %v1373_v19, %v1354_v25  ;;  %1390 = vadd.xlane.f32.xlu0 %v1389_v17  ;;  %1895 = vmatpush1.bf16.msra.mxu0 %v3406_v29 }
 0x4bf   :  { %1896 = vmatprep.subr.bf16.mxu0 %v3414_v28  ;;  %v3454_v28 = vld [vmem:[%s5431_s4 + $0x100] ss:$16 sps:$4 sm:$0xff]  }
 0x4c0   :  { %v1392_v48 = vadd.f32 %v4524_v18, %v4522_v61 }
 0x4c2   :  { %1393 = vadd.xlane.f32.xlu0 %v1392_v48  ;;  %1897 = vmatpush1.bf16.msra.mxu0 %v3412_v39  ;;  %v3456_v48 = vld [vmem:[%s5431_s4 + $0x104] ss:$16 sps:$4 sm:$0xff]   ;;  %v3451_v39 = vld [vmem:[%s5431_s4 + $0xe8] ss:$16 sps:$4 sm:$0xff]  }
 0x4c3   :  { %1898 = vmatprep.subr.bf16.mxu0 %v3420_v58  ;;  %1962 = vmatpush1.bf16.msra.mxu1 %v3451_v39  ;;  %v77_v39 = vld [vmem:[%s5434_s7 + $0x28] sm:$0xff] }
 0x4c4   :  { %1963 = vmatprep.subr.bf16.mxu1 %v3459_v60  ;;  %v3490_v60 = vld [vmem:[%s5431_s4 + $0x1c0] ss:$16 sps:$4 sm:$0xff]  }
 0x4c6   :  { %1899 = vmatpush1.bf16.msra.mxu0 %v3418_v57 }
 0x4c7   :  { %1900 = vmatprep.subr.bf16.mxu0 %v3426_v6  ;;  %1964 = vmatpush1.bf16.msra.mxu1 %v3457_v14  ;;  %v79_v14 = vld [vmem:[%s5434_s7 + $0x38] sm:$0xff] }
 0x4ca   :  { %1901 = vmatpush1.bf16.msra.mxu0 %v3424_v1 }
 0x4cb   :  { %1902 = vmatprep.subr.bf16.mxu0 %v3432_v12  ;;  %v116_v12 = vld [vmem:[%s5434_s7 + $0x160] sm:$0xff] }
 0x4ce   :  { %1903 = vmatpush1.bf16.msra.mxu0 %v3430_v62  ;;  %v113_v62 = vld [vmem:[%s5434_s7 + $0x148] sm:$0xff] }
 0x4cf   :  { %1904 = vmatprep.subr.bf16.mxu0 %v3438_v24  ;;  %v3462_v24 = vld [vmem:[%s5431_s4 + $0x124] ss:$16 sps:$4 sm:$0xff]  }
 0x4d2   :  { %1905 = vmatpush1.bf16.msra.mxu0 %v3436_v52  ;;  %v114_v52 = vld [vmem:[%s5434_s7 + $0x150] sm:$0xff] }
 0x4d3   :  { %1906 = vmatprep.subr.bf16.mxu0 %v3444_v16  ;;  %v3468_v16 = vld [vmem:[%s5431_s4 + $0x144] ss:$16 sps:$4 sm:$0xff]  }
 0x4d6   :  { %1907 = vmatpush1.bf16.msra.mxu0 %v3442_v45  ;;  %v118_v45 = vld [vmem:[%s5434_s7 + $0x170] sm:$0xff] }
 0x4d7   :  { %1908 = vmatprep.subr.bf16.mxu0 %v3450_v15  ;;  %v3480_v15 = vld [vmem:[%s5431_s4 + $0x184] ss:$16 sps:$4 sm:$0xff]  }
 0x4da   :  { %1909 = vmatpush1.bf16.msra.mxu0 %v3448_v10  ;;  %v3486_v10 = vld [vmem:[%s5431_s4 + $0x1a4] ss:$16 sps:$4 sm:$0xff]  }
 0x4db   :  { %1910 = vmatprep.subr.bf16.mxu0 %v3456_v48  ;;  %v74_v48 = vld [vmem:[%s5434_s7 + $0x10] sm:$0xff] }
 0x4de   :  { %1911 = vmatpush1.bf16.msra.mxu0 %v3454_v28  ;;  %v76_v28 = vld [vmem:[%s5434_s7 + $0x20] sm:$0xff] }
 0x4df   :  { %1912 = vmatprep.subr.bf16.mxu0 %v3462_v24  ;;  %v82_v24 = vld [vmem:[%s5434_s7 + $0x50] sm:$0xff] }
 0x4e2   :  { %1913 = vmatpush1.bf16.msra.mxu0 %v3460_v43  ;;  %v83_v43 = vld [vmem:[%s5434_s7 + $0x58] sm:$0xff] }
 0x4e3   :  { %1914 = vmatprep.subr.bf16.mxu0 %v3468_v16  ;;  %v120_v16 = vld [vmem:[%s5434_s7 + $0x180] sm:$0xff] }
 0x4e6   :  { %1915 = vmatpush1.bf16.msra.mxu0 %v3466_v9  ;;  %v121_v9 = vld [vmem:[%s5434_s7 + $0x188] sm:$0xff] }
 0x543   :  { %v1385_v54 = vpop.xlane.xlu0 %1384 }
 0x544   :  { %v1395_v5 = vmul.f32 0.00390625, %v1385_v54  ;;  %v3463_v54 = vld [vmem:[%s5431_s4 + $0x128] ss:$16 sps:$4 sm:$0xff]  }
 0x546   :  { %v4598_v2 = vsub.f32 %v4498_v42, %v1395_v5  ;;  %v4601_v40 = vsub.f32 %v4500_v36, %v1395_v5  ;;  %v3465_v5 = vld [vmem:[%s5431_s4 + $0x12c] ss:$16 sps:$4 sm:$0xff]  }
 0x547   :  { %v1388_v49 = vpop.xlane.xlu1 %1387  ;;  %1965 = vmatprep.subr.bf16.mxu1 %v3465_v5  ;;  %v84_v5 = vld [vmem:[%s5434_s7 + $0x60] sm:$0xff] }
 0x548   :  { %v1396_v7 = vmul.f32 0.00390625, %v1388_v49  ;;  %v1407_v31 = vmul.f32 %v4598_v2, %v4598_v2  ;;  %v1408_v23 = vmul.f32 %v4601_v40, %v4601_v40  ;;  %1966 = vmatpush1.bf16.msra.mxu1 %v3463_v54  ;;  %v3469_v49 = vld [vmem:[%s5431_s4 + $0x148] ss:$16 sps:$4 sm:$0xff]  }
 0x549   :  { %v85_v54 = vld [vmem:[%s5434_s7 + $0x68] sm:$0xff] }
 0x54a   :  { %v4620_v46 = vsub.f32 %v4506_v34, %v1396_v7  ;;  %v4623_v51 = vsub.f32 %v4508_v13, %v1396_v7  ;;  %v1415_v37 = vadd.f32 %v1408_v23, %v1407_v31  ;;  %v3471_v7 = vld [vmem:[%s5431_s4 + $0x14c] ss:$16 sps:$4 sm:$0xff]   ;;  %v3474_v31 = vld [vmem:[%s5431_s4 + $0x164] ss:$16 sps:$4 sm:$0xff]  }
 0x54b   :  { %v1391_v59 = vpop.xlane.xlu0 %1390  ;;  %v3477_v23 = vld [vmem:[%s5431_s4 + $0x16c] ss:$16 sps:$4 sm:$0xff]   ;;  %1967 = vmatprep.subr.bf16.mxu1 %v3471_v7  ;;  %1916 = vmatprep.subr.bf16.mxu0 %v3474_v31  ;;  %v122_v7 = vld [vmem:[%s5434_s7 + $0x190] sm:$0xff] }
 0x54c   :  { %v1397_v50 = vmul.f32 0.00390625, %v1391_v59  ;;  %1416 = vadd.xlane.f32.xlu1 %v1415_v37  ;;  %v1409_v11 = vmul.f32 %v4620_v46, %v4620_v46  ;;  %v1410_v26 = vmul.f32 %v4623_v51, %v4623_v51  ;;  %1968 = vmatpush1.bf16.msra.mxu1 %v3469_v49  ;;  %v3475_v37 = vld [vmem:[%s5431_s4 + $0x168] ss:$16 sps:$4 sm:$0xff]   ;;  %v3483_v59 = vld [vmem:[%s5431_s4 + $0x18c] ss:$16 sps:$4 sm:$0xff]  }
 0x54d   :  { %1969 = vmatprep.subr.bf16.mxu1 %v3477_v23  ;;  %1917 = vmatpush1.bf16.msra.mxu0 %v3472_v44  ;;  %v123_v49 = vld [vmem:[%s5434_s7 + $0x198] sm:$0xff]  ;;  %v125_v31 = vld [vmem:[%s5434_s7 + $0x1a8] sm:$0xff]  ;;  %v124_v23 = vld [vmem:[%s5434_s7 + $0x1a0] sm:$0xff] }
 0x54e   :  { %v4642_v19 = vsub.f32 %v4514_v0, %v1397_v50  ;;  %v4645_v25 = vsub.f32 %v4516_v27, %v1397_v50  ;;  %v1418_v17 = vadd.f32 %v1410_v26, %v1409_v11  ;;  %v73_v50 = vld [vmem:[%s5434_s7 + $0x8] sm:$0xff]  ;;  %v72_v11 = vld [vmem:[%s5434_s7] sm:$0xff]  ;;  %1918 = vmatprep.subr.bf16.mxu0 %v3480_v15  ;;  %v131_v15 = vld [vmem:[%s5434_s7 + $0x1d8] sm:$0xff] }
 0x54f   :  { %v1394_v29 = vpop.xlane.xlu0 %1393  ;;  %v3478_v26 = vld [vmem:[%s5431_s4 + $0x180] ss:$16 sps:$4 sm:$0xff]   ;;  %v129_v44 = vld [vmem:[%s5434_s7 + $0x1c8] sm:$0xff] }
 0x550   :  { %v1398_v30 = vmul.f32 0.00390625, %v1394_v29  ;;  %1419 = vadd.xlane.f32.xlu0 %v1418_v17  ;;  %v1411_v35 = vmul.f32 %v4642_v19, %v4642_v19  ;;  %v1412_v4 = vmul.f32 %v4645_v25, %v4645_v25  ;;  %1970 = vmatpush1.bf16.msra.mxu1 %v3475_v37  ;;  %v75_v17 = vld [vmem:[%s5434_s7 + $0x18] sm:$0xff]  ;;  %v3484_v29 = vld [vmem:[%s5431_s4 + $0x1a0] ss:$16 sps:$4 sm:$0xff]  }
 0x551   :  { %1971 = vmatprep.subr.bf16.mxu1 %v3483_v59  ;;  %1919 = vmatpush1.bf16.msra.mxu0 %v3478_v26  ;;  %v128_v37 = vld [vmem:[%s5434_s7 + $0x1c0] sm:$0xff]  ;;  %v130_v59 = vld [vmem:[%s5434_s7 + $0x1d0] sm:$0xff]  ;;  %v135_v26 = vld [vmem:[%s5434_s7 + $0x1f8] sm:$0xff] }
 0x552   :  { %v4664_v58 = vsub.f32 %v4522_v61, %v1398_v30  ;;  %v4667_v56 = vsub.f32 %v4524_v18, %v1398_v30  ;;  %v1421_v57 = vadd.f32 %v1412_v4, %v1411_v35  ;;  %v3487_v30 = vld [vmem:[%s5431_s4 + $0x1a8] ss:$16 sps:$4 sm:$0xff]   ;;  %1920 = vmatprep.subr.bf16.mxu0 %v3486_v10  ;;  %v3492_v35 = vld [vmem:[%s5431_s4 + $0x1c4] ss:$16 sps:$4 sm:$0xff]   ;;  %v3495_v4 = vld [vmem:[%s5431_s4 + $0x1cc] ss:$16 sps:$4 sm:$0xff]  }
 0x553   :  { %v3504_v10 = vld [vmem:[%s5432_s5 + $0x4] ss:$8 sps:$4 sm:$0xff]  }
 0x554   :  { %1422 = vadd.xlane.f32.xlu1 %v1421_v57  ;;  %v1413_v22 = vmul.f32 %v4664_v58, %v4664_v58  ;;  %v1414_v6 = vmul.f32 %v4667_v56, %v4667_v56  ;;  %1972 = vmatpush1.bf16.msra.mxu1 %v3481_v53  ;;  %v3493_v57 = vld [vmem:[%s5431_s4 + $0x1c8] ss:$16 sps:$4 sm:$0xff]   ;;  %v134_v53 = vld [vmem:[%s5434_s7 + $0x1f0] sm:$0xff] }
 0x555   :  { %1973 = vmatprep.subr.bf16.mxu1 %v3489_v38  ;;  %1921 = vmatpush1.bf16.msra.mxu0 %v3484_v29 }
 0x556   :  { %v1424_v1 = vadd.f32 %v1414_v6, %v1413_v22  ;;  %1922 = vmatprep.subr.bf16.mxu0 %v3492_v35  ;;  %v3498_v22 = vld [vmem:[%s5431_s4 + $0x1e4] ss:$16 sps:$4 sm:$0xff]   ;;  %v3501_v6 = vld [vmem:[%s5431_s4 + $0x1ec] ss:$16 sps:$4 sm:$0xff]  }
 0x558   :  { %1425 = vadd.xlane.f32.xlu0 %v1424_v1  ;;  %1974 = vmatpush1.bf16.msra.mxu1 %v3487_v30  ;;  %v78_v1 = vld [vmem:[%s5434_s7 + $0x30] sm:$0xff] }
 0x559   :  { %1975 = vmatprep.subr.bf16.mxu1 %v3495_v4  ;;  %1923 = vmatpush1.bf16.msra.mxu0 %v3490_v60  ;;  %v140_v60 = vld [vmem:[#allocation7 + $0x2] ss:$8 sm:$0x3] }
 0x55a   :  { %1924 = vmatprep.subr.bf16.mxu0 %v3498_v22 }
 0x55c   :  { %1976 = vmatpush1.bf16.msra.mxu1 %v3493_v57 }
 0x55d   :  { %1977 = vmatprep.subr.bf16.mxu1 %v3501_v6 }
 0x565   :  { %2671 = vperm.xlu1 %3405, %v112_v41   ;;  %v3496_v41 = vld [vmem:[%s5431_s4 + $0x1e0] ss:$16 sps:$4 sm:$0xff]  }
 0x566   :  { %1925 = vmatpush1.bf16.msra.mxu0 %v3496_v41  ;;  %v1455_v41 = vrot.slane %v140_v60, %v4210_v21 }
 0x567   :  { %2536 = vmatprep.subr.bf16.mxu0 %v3504_v10  ;;  %v3510_v10 = vld [vmem:[%s5432_s5 + $0x24] ss:$8 sps:$4 sm:$0xff]  }
 0x569   :  { %2699 = vperm.xlu1 %3405, %v116_v12   ;;  %v3499_v12 = vld [vmem:[%s5431_s4 + $0x1e8] ss:$16 sps:$4 sm:$0xff]  }
 0x56a   :  { %1978 = vmatpush1.bf16.msra.mxu1 %v3499_v12 }
 0x56d   :  { %2704 = vperm.xlu1 %3405, %v117_v55   ;;  %v81_v55 = vld [vmem:[%s5434_s7 + $0x48] sm:$0xff] }
 0x56e   :  { %2676 = vperm.xlu0 %3404, %v113_v62   ;;  %v80_v62 = vld [vmem:[%s5434_s7 + $0x40] sm:$0xff] }
 0x571   :  { %2686 = vperm.xlu1 %3405, %v115_v3   ;;  %v87_v3 = vld [vmem:[%s5434_s7 + $0x78] sm:$0xff] }
 0x572   :  { %2681 = vperm.xlu0 %3404, %v114_v52   ;;  %v86_v52 = vld [vmem:[%s5434_s7 + $0x70] sm:$0xff] }
 0x575   :  { %2714 = vperm.xlu1 %3405, %v119_v47   ;;  %v127_v47 = vld [vmem:[%s5434_s7 + $0x1b8] sm:$0xff] }
 0x576   :  { %2709 = vperm.xlu0 %3404, %v118_v45   ;;  %v126_v45 = vld [vmem:[%s5434_s7 + $0x1b0] sm:$0xff] }
 0x579   :  { %178 = vperm.xlu1 %3405, %v73_v50   ;;  %v133_v50 = vld [vmem:[%s5434_s7 + $0x1e8] sm:$0xff] }
 0x57a   :  { %173 = vperm.xlu0 %3404, %v72_v11   ;;  %v132_v11 = vld [vmem:[%s5434_s7 + $0x1e0] sm:$0xff] }
 0x57d   :  { %188 = vperm.xlu1 %3405, %v75_v17  }
 0x57e   :  { %183 = vperm.xlu0 %3404, %v74_v48  }
 0x581   :  { %198 = vperm.xlu1 %3405, %v77_v39  }
 0x582   :  { %193 = vperm.xlu0 %3404, %v76_v28  }
 0x585   :  { %208 = vperm.xlu1 %3405, %v79_v14   ;;  %v1451_v14 = vrot.slane %v140_v60, %v4207_v20  ;;  %v3519_v60 = vld [vmem:[%s5432_s5 + $0x54] ss:$8 sps:$4 sm:$0xff]  }
 0x586   :  { %203 = vperm.xlu0 %3404, %v78_v1  }
 0x589   :  { %218 = vperm.xlu1 %3405, %v81_v55   ;;  %v142_v55 = vld [vmem:[#allocation7 + $0x3] ss:$8 sm:$0x3] }
 0x58a   :  { %213 = vperm.xlu0 %3404, %v80_v62  }
 0x58d   :  { %228 = vperm.xlu1 %3405, %v83_v43  }
 0x58e   :  { %223 = vperm.xlu0 %3404, %v82_v24  }
 0x591   :  { %238 = vperm.xlu1 %3405, %v85_v54  }
 0x592   :  { %233 = vperm.xlu0 %3404, %v84_v5   ;;  %v1470_v5 = vrot.slane %v142_v55, %v4207_v20 }
 0x595   :  { %248 = vperm.xlu1 %3405, %v87_v3   ;;  %v1474_v3 = vrot.slane %v142_v55, %v4210_v21  ;;  %v3529_v55 = vld [vmem:[%s5432_s5 + $0x90] ss:$8 sps:$4 sm:$0xff]  }
 0x596   :  { %243 = vperm.xlu0 %3404, %v86_v52  }
 0x599   :  { %2756 = vperm.xlu1 %3405, %v121_v9  }
 0x59a   :  { %2751 = vperm.xlu0 %3404, %v120_v16  }
 0x59d   :  { %2766 = vperm.xlu1 %3405, %v123_v49  }
 0x59e   :  { %2761 = vperm.xlu0 %3404, %v122_v7  }
 0x5a1   :  { %2776 = vperm.xlu1 %3405, %v125_v31  }
 0x5a2   :  { %2771 = vperm.xlu0 %3404, %v124_v23  }
 0x5a5   :  { %2786 = vperm.xlu1 %3405, %v127_v47  }
 0x5a6   :  { %2781 = vperm.xlu0 %3404, %v126_v45  }
 0x5a9   :  { %2796 = vperm.xlu1 %3405, %v129_v44  }
 0x5aa   :  { %2791 = vperm.xlu0 %3404, %v128_v37  }
 0x5ad   :  { %2806 = vperm.xlu1 %3405, %v131_v15   ;;  %v3502_v15 = vld [vmem:[%s5432_s5] ss:$8 sps:$4 sm:$0xff]  }
 0x5ae   :  { %2801 = vperm.xlu0 %3404, %v130_v59  }
 0x5b1   :  { %2816 = vperm.xlu1 %3405, %v133_v50  }
 0x5b2   :  { %2811 = vperm.xlu0 %3404, %v132_v11  }
 0x5b5   :  { %2826 = vperm.xlu1 %3405, %v135_v26  }
 0x5b6   :  { %2821 = vperm.xlu0 %3404, %v134_v53   ;;  %v3505_v53 = vld [vmem:[%s5432_s5 + $0x10] ss:$8 sps:$4 sm:$0xff]  }
 0x5d9   :  { %v1417_v38 = vpop.xlane.xlu1 %1416 }
 0x5da   :  { %v1427_v17 = vmul.f32 0.00390625, %v1417_v38 }
 0x5dc   :  { %v1431_v48 = vadd.f32 1e-05, %v1427_v17 }
 0x5dd   :  { %v1420_v29 = vpop.xlane.xlu0 %1419 }
 0x5de   :  { %3670 = vrsqrt.f32 %v1431_v48  ;;  %v1428_v30 = vmul.f32 0.00390625, %v1420_v29 }
 0x5e0   :  { %v1432_v35 = vadd.f32 1e-05, %v1428_v30  ;;  %v3508_v30 = vld [vmem:[%s5432_s5 + $0x20] ss:$8 sps:$4 sm:$0xff]  }
 0x5e1   :  { %v1423_v4 = vpop.xlane.xlu1 %1422 }
 0x5e2   :  { %3672 = vrsqrt.f32 %v1432_v35  ;;  %v1429_v39 = vmul.f32 0.00390625, %v1423_v4  ;;  %v3513_v35 = vld [vmem:[%s5432_s5 + $0x34] ss:$8 sps:$4 sm:$0xff]   ;;  %v3511_v4 = vld [vmem:[%s5432_s5 + $0x30] ss:$8 sps:$4 sm:$0xff]  }
 0x5e4   :  { %v1433_v28 = vadd.f32 1e-05, %v1429_v39  ;;  %v3516_v39 = vld [vmem:[%s5432_s5 + $0x44] ss:$8 sps:$4 sm:$0xff]  }
 0x5e5   :  { %v1426_v57 = vpop.xlane.xlu0 %1425 }
 0x5e6   :  { %3674 = vrsqrt.f32 %v1433_v28  ;;  %v1430_v22 = vmul.f32 0.00390625, %v1426_v57  ;;  %v3514_v28 = vld [vmem:[%s5432_s5 + $0x40] ss:$8 sps:$4 sm:$0xff]   ;;  %v3517_v57 = vld [vmem:[%s5432_s5 + $0x50] ss:$8 sps:$4 sm:$0xff]  }
 0x5e8   :  { %v3671_v6 = vpop.eup %3670  ;;  %v1434_v1 = vadd.f32 1e-05, %v1430_v22  ;;  %v3522_v22 = vld [vmem:[%s5432_s5 + $0x64] ss:$8 sps:$4 sm:$0xff]  }
 0x5e9   :  { %v1439_v12 = vmul.f32 %v3671_v6, %v4598_v2  ;;  %v1440_v62 = vmul.f32 %v3671_v6, %v4601_v40  ;;  %v3520_v6 = vld [vmem:[%s5432_s5 + $0x60] ss:$8 sps:$4 sm:$0xff]  }
 0x5ea   :  { %3676 = vrsqrt.f32 %v1434_v1  ;;  %v3523_v1 = vld [vmem:[%s5432_s5 + $0x70] ss:$8 sps:$4 sm:$0xff]  }
 0x5eb   :  { %v1458_v24 = vmul.f32 %v1451_v14, %v1439_v12  ;;  %v1459_v54 = vmul.f32 %v1455_v41, %v1440_v62  ;;  %v3528_v12 = vld [vmem:[%s5432_s5 + $0x84] ss:$8 sps:$4 sm:$0xff]   ;;  %v3531_v62 = vld [vmem:[%s5432_s5 + $0x94] ss:$8 sps:$4 sm:$0xff]  }
 0x5ec   :  { %v3673_v43 = vpop.eup %3672 }
 0x5ed   :  { %v1441_v52 = vmul.f32 %v3673_v43, %v4620_v46  ;;  %v1442_v9 = vmul.f32 %v3673_v43, %v4623_v51  ;;  %v1478_v31 = vadd.f32 %v1474_v3, %v1459_v54  ;;  %v1477_v2 = vadd.f32 %v1470_v5, %v1458_v24  ;;  %v3507_v51 = vld [vmem:[%s5432_s5 + $0x14] ss:$8 sps:$4 sm:$0xff]   ;;  %v3534_v43 = vld [vmem:[%s5432_s5 + $0xa4] ss:$8 sps:$4 sm:$0xff]   ;;  %v3532_v24 = vld [vmem:[%s5432_s5 + $0xa0] ss:$8 sps:$4 sm:$0xff]  }
 0x5ee   :  { %v3535_v54 = vld [vmem:[%s5432_s5 + $0xb0] ss:$8 sps:$4 sm:$0xff]  }
 0x5ef   :  { %v1460_v16 = vmul.f32 %v1451_v14, %v1441_v52  ;;  %v1461_v49 = vmul.f32 %v1455_v41, %v1442_v9  ;;  %v3538_v52 = vld [vmem:[%s5432_s5 + $0xc0] ss:$8 sps:$4 sm:$0xff]   ;;  %v3543_v9 = vld [vmem:[%s5432_s5 + $0xd4] ss:$8 sps:$4 sm:$0xff]  }
 0x5f0   :  { %v3675_v7 = vpop.eup %3674 }
 0x5f1   :  { %v1480_v23 = vadd.f32 %v1474_v3, %v1461_v49  ;;  %v1479_v47 = vadd.f32 %v1470_v5, %v1460_v16  ;;  %v1444_v40 = vmul.f32 %v3675_v7, %v4645_v25  ;;  %v1443_v45 = vmul.f32 %v3675_v7, %v4642_v19  ;;  %v3541_v16 = vld [vmem:[%s5432_s5 + $0xd0] ss:$8 sps:$4 sm:$0xff]   ;;  %v3546_v49 = vld [vmem:[%s5432_s5 + $0xe4] ss:$8 sps:$4 sm:$0xff]   ;;  %v3544_v7 = vld [vmem:[%s5432_s5 + $0xe0] ss:$8 sps:$4 sm:$0xff]  }
 0x5f3   :  { %v1486_v44 = vpack.c.bf16 %v1480_v23, %v1478_v31  ;;  %v1485_v37 = vpack.c.bf16 %v1479_v47, %v1477_v2  ;;  %v1463_v59 = vmul.f32 %v1455_v41, %v1444_v40  ;;  %v1462_v11 = vmul.f32 %v1451_v14, %v1443_v45  ;;  %v3549_v31 = vld [vmem:[%s5432_s5 + $0xf4] ss:$8 sps:$4 sm:$0xff]   ;;  %v3547_v2 = vld [vmem:[%s5432_s5 + $0xf0] ss:$8 sps:$4 sm:$0xff]   ;;  %v3552_v23 = vld [vmem:[%s5432_s5 + $0x104] ss:$8 sps:$4 sm:$0xff]  }
 0x5f4   :  { %v3677_v46 = vpop.eup %3676  ;;  %v1564_v47 = vsub.s32 2, %v4204_v8  ;;  %v146_v40 = vld [vmem:[#allocation7 + $0x5] ss:$8 sm:$0xf]  ;;  %v1568_v45 = vsub.s32 3, %v4204_v8 }
 0x5f5   :  { %1926 = vmatprep.mubr.bf16.mxu0 %v1486_v44  ;;  %1979 = vmatprep.mubr.bf16.mxu1 %v1486_v44  ;;  %v1446_v50 = vmul.f32 %v3677_v46, %v4667_v56  ;;  %v1445_v25 = vmul.f32 %v3677_v46, %v4664_v58  ;;  %v1482_v38 = vadd.f32 %v1474_v3, %v1463_v59 }
 0x5f6   :  { %1927 = vmatmul.mubr.bf16.vlgmr.msra.gmra.mrb[36].mxu0 %v1485_v37  ;;  %1980 = vmatmul.mubr.bf16.vlgmr.msra.gmra.mrb[44].mxu1 %v1485_v37  ;;  %v1481_v56 = vadd.f32 %v1470_v5, %v1462_v11  ;;  %v4995_v44 = vrot.slane %v146_v40, %v4207_v20  ;;  %v4997_v37 = vrot.slane %v146_v40, %v1564_v47 }
 0x5f7   :  { %v1465_v19 = vmul.f32 %v1455_v41, %v1446_v50  ;;  %v1464_v26 = vmul.f32 %v1451_v14, %v1445_v25  ;;  %2537 = vmatpush1.bf16.msra.mxu0 %v3502_v15  ;;  %v3525_v14 = vld [vmem:[%s5432_s5 + $0x74] ss:$8 sps:$4 sm:$0xff]   ;;  %v3526_v41 = vld [vmem:[%s5432_s5 + $0x80] ss:$8 sps:$4 sm:$0xff]   ;;  %v5000_v15 = vrot.slane %v146_v40, %v4210_v21  ;;  %v5002_v46 = vrot.slane %v146_v40, %v1568_v45 }
 0x5f8   :  { %2538 = vmatprep.subr.bf16.mxu0 %v3507_v51 }
 0x5f9   :  { %v1484_v17 = vadd.f32 %v1474_v3, %v1465_v19  ;;  %v1483_v48 = vadd.f32 %v1470_v5, %v1464_v26  ;;  %v3537_v5 = vld [vmem:[%s5432_s5 + $0xb4] ss:$8 sps:$4 sm:$0xff]   ;;  %v3540_v3 = vld [vmem:[%s5432_s5 + $0xc4] ss:$8 sps:$4 sm:$0xff]  }
 0x5fb   :  { %v1488_v58 = vpack.c.bf16 %v1484_v17, %v1482_v38  ;;  %v1487_v29 = vpack.c.bf16 %v1483_v48, %v1481_v56  ;;  %2539 = vmatpush1.bf16.msra.mxu0 %v3505_v53 }
 0x5fc   :  { %2540 = vmatprep.subr.bf16.mxu0 %v3510_v10 }
 0x5fd   :  { %1936 = vmatprep.mubr.bf16.mxu0 %v1488_v58  ;;  %1989 = vmatprep.mubr.bf16.mxu1 %v1488_v58 }
 0x5fe   :  { %1937 = vmatmul.mubr.bf16.gmra.mrb[40].mxu0 %v1487_v29  ;;  %1990 = vmatmul.mubr.bf16.gmra.mrb[48].mxu1 %v1487_v29 }
 0x5ff   :  { %2541 = vmatpush1.bf16.msra.mxu0 %v3508_v30  ;;  %2941 = vmatprep.mubr.f32.mxu1 %v5469_v63 }
 0x600   :  { %2542 = vmatprep.subr.bf16.mxu0 %v3513_v35 }
 0x603   :  { %2543 = vmatpush1.bf16.msra.mxu0 %v3511_v4 }
 0x604   :  { %2544 = vmatprep.subr.bf16.mxu0 %v3516_v39 }
 0x607   :  { %2545 = vmatpush1.bf16.msra.mxu0 %v3514_v28 }
 0x608   :  { %2546 = vmatprep.subr.bf16.mxu0 %v3519_v60 }
 0x60b   :  { %2547 = vmatpush1.bf16.msra.mxu0 %v3517_v57 }
 0x60c   :  { %2548 = vmatprep.subr.bf16.mxu0 %v3522_v22 }
 0x60f   :  { %2549 = vmatpush1.bf16.msra.mxu0 %v3520_v6 }
 0x610   :  { %2550 = vmatprep.subr.bf16.mxu0 %v3525_v14 }
 0x613   :  { %2551 = vmatpush1.bf16.msra.mxu0 %v3523_v1 }
 0x614   :  { %2552 = vmatprep.subr.bf16.mxu0 %v3528_v12 }
 0x617   :  { %2553 = vmatpush1.bf16.msra.mxu0 %v3526_v41 }
 0x618   :  { %2554 = vmatprep.subr.bf16.mxu0 %v3531_v62 }
 0x61b   :  { %2555 = vmatpush1.bf16.msra.mxu0 %v3529_v55 }
 0x61c   :  { %2556 = vmatprep.subr.bf16.mxu0 %v3534_v43 }
 0x61f   :  { %2557 = vmatpush1.bf16.msra.mxu0 %v3532_v24 }
 0x620   :  { %2558 = vmatprep.subr.bf16.mxu0 %v3537_v5 }
 0x623   :  { %2559 = vmatpush1.bf16.msra.mxu0 %v3535_v54 }
 0x624   :  { %2560 = vmatprep.subr.bf16.mxu0 %v3540_v3 }
 0x627   :  { %2561 = vmatpush1.bf16.msra.mxu0 %v3538_v52 }
 0x628   :  { %2562 = vmatprep.subr.bf16.mxu0 %v3543_v9 }
 0x62b   :  { %2563 = vmatpush1.bf16.msra.mxu0 %v3541_v16 }
 0x62c   :  { %2564 = vmatprep.subr.bf16.mxu0 %v3546_v49 }
 0x62f   :  { %2565 = vmatpush1.bf16.msra.mxu0 %v3544_v7 }
 0x630   :  { %2566 = vmatprep.subr.bf16.mxu0 %v3549_v31 }
 0x633   :  { %2567 = vmatpush1.bf16.msra.mxu0 %v3547_v2 }
 0x634   :  { %2589 = vmatprep.subr.bf16.mxu0 %v3552_v23 }
 0x6c9   :  { %v1928_v59 = vpop.f32.mrb[36].mxu0  ;;  %v1981_v51 = vpop.f32.mrb[44].mxu1 }
 0x6ca   :  { %v5005_v50 = vadd.f32 %v1928_v59, %v4995_v44  ;;  %v5008_v25 = vadd.f32 %v1981_v51, %v4997_v37  ;;  %v1930_v11 = vpop.f32.mrb[37].mxu0  ;;  %v1983_v8 = vpop.f32.mrb[45].mxu1 }
 0x6cb   :  { %v5011_v19 = vadd.f32 %v1930_v11, %v5000_v15  ;;  %v5014_v26 = vadd.f32 %v1983_v8, %v5002_v46  ;;  %v1932_v53 = vpop.f32.mrb[38].mxu0  ;;  %v1985_v10 = vpop.f32.mrb[46].mxu1 }
 0x6cc   :  { %v2016_v38 = vmul.f32 %v5005_v50, %v5005_v50  ;;  %v2018_v17 = vmul.f32 %v5008_v25, %v5008_v25  ;;  %v1934_v56 = vpop.f32.mrb[39].mxu0  ;;  %v1987_v48 = vpop.f32.mrb[47].mxu1  ;;  %v5025_v30 = vadd.f32 %v1932_v53, %v4995_v44  ;;  %v5028_v35 = vadd.f32 %v1985_v10, %v4997_v37 }
 0x6cd   :  { %v2017_v58 = vmul.f32 %v5011_v19, %v5011_v19  ;;  %v2019_v29 = vmul.f32 %v5014_v26, %v5014_v26  ;;  %v5033_v28 = vadd.f32 %v1934_v56, %v5000_v15  ;;  %v5036_v60 = vadd.f32 %v1987_v48, %v5002_v46 }
 0x6ce   :  { %v2032_v4 = vmul.f32 %v2016_v38, %v5005_v50  ;;  %v2034_v39 = vmul.f32 %v2018_v17, %v5008_v25  ;;  %v2020_v6 = vmul.f32 %v5025_v30, %v5025_v30  ;;  %v2022_v41 = vmul.f32 %v5028_v35, %v5028_v35 }
 0x6cf   :  { %v2033_v57 = vmul.f32 %v2017_v58, %v5011_v19  ;;  %v2035_v22 = vmul.f32 %v2019_v29, %v5014_v26  ;;  %v2021_v43 = vmul.f32 %v5033_v28, %v5033_v28  ;;  %v2023_v52 = vmul.f32 %v5036_v60, %v5036_v60 }
 0x6d0   :  { %v2048_v14 = vmul.f32 0.044715, %v2032_v4  ;;  %v2050_v1 = vmul.f32 0.044715, %v2034_v39  ;;  %v2036_v62 = vmul.f32 %v2020_v6, %v5025_v30  ;;  %v2038_v3 = vmul.f32 %v2022_v41, %v5028_v35 }
 0x6d1   :  { %v2049_v12 = vmul.f32 0.044715, %v2033_v57  ;;  %v2051_v55 = vmul.f32 0.044715, %v2035_v22  ;;  %v1938_v24 = vpop.f32.mrb[40].mxu0  ;;  %v1991_v9 = vpop.f32.mrb[48].mxu1  ;;  %v2037_v2 = vmul.f32 %v2021_v43, %v5033_v28  ;;  %v2039_v51 = vmul.f32 %v2023_v52, %v5036_v60 }
 0x6d2   :  { %v2064_v54 = vadd.f32 %v2048_v14, %v5005_v50  ;;  %v2066_v5 = vadd.f32 %v2050_v1, %v5008_v25  ;;  %v1940_v16 = vpop.f32.mrb[41].mxu0  ;;  %v2052_v31 = vmul.f32 0.044715, %v2036_v62  ;;  %v1993_v23 = vpop.f32.mrb[49].mxu1  ;;  %v2054_v59 = vmul.f32 0.044715, %v2038_v3 }
 0x6d3   :  { %v2065_v49 = vadd.f32 %v2049_v12, %v5011_v19  ;;  %v2067_v7 = vadd.f32 %v2051_v55, %v5014_v26  ;;  %v1942_v47 = vpop.f32.mrb[42].mxu0  ;;  %v2053_v10 = vmul.f32 0.044715, %v2037_v2  ;;  %v2055_v17 = vmul.f32 0.044715, %v2039_v51  ;;  %v1995_v48 = vpop.f32.mrb[50].mxu1 }
 0x6d4   :  { %v2080_v40 = vmul.f32 0.7978846, %v2064_v54  ;;  %v2082_v45 = vmul.f32 0.7978846, %v2066_v5  ;;  %v2068_v53 = vadd.f32 %v2052_v31, %v5025_v30  ;;  %v2070_v38 = vadd.f32 %v2054_v59, %v5028_v35  ;;  %v1944_v58 = vpop.f32.mrb[43].mxu0  ;;  %v1997_v57 = vpop.f32.mrb[51].mxu1 }
 0x6d5   :  { %v2081_v11 = vmul.f32 0.7978846, %v2065_v49  ;;  %v2083_v8 = vmul.f32 0.7978846, %v2067_v7  ;;  %v5059_v56 = vadd.f32 %v1938_v24, %v4995_v44  ;;  %v2069_v4 = vadd.f32 %v2053_v10, %v5033_v28 }
 0x6d6   :  { %3678 = vtanh.f32 %v2080_v40  ;;  %v2084_v29 = vmul.f32 0.7978846, %v2068_v53  ;;  %v5063_v39 = vadd.f32 %v1991_v9, %v4997_v37  ;;  %v2086_v22 = vmul.f32 0.7978846, %v2070_v38 }
 0x6d7   :  { %3680 = vtanh.f32 %v2082_v45  ;;  %v2071_v6 = vadd.f32 %v2055_v17, %v5036_v60  ;;  %v2024_v14 = vmul.f32 %v5059_v56, %v5059_v56  ;;  %v2085_v1 = vmul.f32 0.7978846, %v2069_v4 }
 0x6d8   :  { %3682 = vtanh.f32 %v2081_v11  ;;  %v2026_v41 = vmul.f32 %v5063_v39, %v5063_v39  ;;  %v5071_v12 = vadd.f32 %v1940_v16, %v5000_v15  ;;  %v5075_v43 = vadd.f32 %v1993_v23, %v5002_v46 }
 0x6d9   :  { %3684 = vtanh.f32 %v2083_v8  ;;  %v2087_v55 = vmul.f32 0.7978846, %v2071_v6  ;;  %v2040_v62 = vmul.f32 %v2024_v14, %v5059_v56  ;;  %v5081_v5 = vadd.f32 %v1942_v47, %v4995_v44 }
 0x6da   :  { %3686 = vtanh.f32 %v2084_v29  ;;  %v2042_v24 = vmul.f32 %v2026_v41, %v5063_v39  ;;  %v2025_v54 = vmul.f32 %v5071_v12, %v5071_v12  ;;  %v2027_v52 = vmul.f32 %v5075_v43, %v5075_v43 }
 0x6db   :  { %3688 = vtanh.f32 %v2086_v22  ;;  %v2056_v3 = vmul.f32 0.044715, %v2040_v62  ;;  %v5086_v9 = vadd.f32 %v1995_v48, %v4997_v37  ;;  %v2028_v7 = vmul.f32 %v5081_v5, %v5081_v5 }
 0x6dc   :  { %3690 = vtanh.f32 %v2085_v1  ;;  %v2058_v16 = vmul.f32 0.044715, %v2042_v24  ;;  %v2041_v49 = vmul.f32 %v2025_v54, %v5071_v12  ;;  %v2043_v44 = vmul.f32 %v2027_v52, %v5075_v43 }
 0x6dd   :  { %3692 = vtanh.f32 %v2087_v55  ;;  %v2072_v31 = vadd.f32 %v2056_v3, %v5059_v56  ;;  %v2030_v2 = vmul.f32 %v5086_v9, %v5086_v9  ;;  %v5096_v23 = vadd.f32 %v1944_v58, %v5000_v15 }
 0x6de   :  { %v2074_v37 = vadd.f32 %v2058_v16, %v5063_v39  ;;  %v2057_v47 = vmul.f32 0.044715, %v2041_v49  ;;  %v2044_v40 = vmul.f32 %v2028_v7, %v5081_v5  ;;  %v5101_v45 = vadd.f32 %v1997_v57, %v5002_v46 }
 0x6df   :  { %v2088_v51 = vmul.f32 0.7978846, %v2072_v31  ;;  %v2059_v11 = vmul.f32 0.044715, %v2043_v44  ;;  %v2046_v8 = vmul.f32 %v2030_v2, %v5086_v9  ;;  %v2029_v53 = vmul.f32 %v5096_v23, %v5096_v23 }
 0x6e0   :  { %v3679_v59 = vpop.eup %3678  ;;  %v2090_v15 = vmul.f32 0.7978846, %v2074_v37  ;;  %v2073_v17 = vadd.f32 %v2057_v47, %v5071_v12  ;;  %v2060_v48 = vmul.f32 0.044715, %v2044_v40  ;;  %v2000_v29 = vmul.f32 0.5, %v5005_v50 }
 0x6e1   :  { %v3681_v10 = vpop.eup %3680  ;;  %v2112_v38 = vadd.f32 1.0, %v3679_v59  ;;  %v2004_v46 = vmul.f32 0.5, %v5025_v30  ;;  %v2006_v4 = vmul.f32 0.5, %v5028_v35  ;;  %v2062_v57 = vmul.f32 0.044715, %v2046_v8 }
 0x6e2   :  { %v3683_v58 = vpop.eup %3682  ;;  %3694 = vtanh.f32 %v2088_v51  ;;  %v2089_v6 = vmul.f32 0.7978846, %v2073_v17  ;;  %v2075_v14 = vadd.f32 %v2059_v11, %v5075_v43  ;;  %v2076_v1 = vadd.f32 %v2060_v48, %v5081_v5 }
 0x6e3   :  { %v3685_v22 = vpop.eup %3684  ;;  %v2114_v55 = vadd.f32 1.0, %v3681_v10  ;;  %3696 = vtanh.f32 %v2090_v15  ;;  %v2078_v62 = vadd.f32 %v2062_v57, %v5086_v9  ;;  %v2045_v24 = vmul.f32 %v2029_v53, %v5096_v23 }
 0x6e4   :  { %v3687_v41 = vpop.eup %3686  ;;  %v2128_v54 = vmul.f32 %v2112_v38, %v2000_v29  ;;  %v2092_v3 = vmul.f32 0.7978846, %v2076_v1  ;;  %v2031_v35 = vmul.f32 %v5101_v45, %v5101_v45  ;;  %3698 = vtanh.f32 %v2089_v6 }
 0x6e5   :  { %v3689_v50 = vpop.eup %3688  ;;  %v2116_v30 = vadd.f32 1.0, %v3687_v41  ;;  %v2094_v49 = vmul.f32 0.7978846, %v2078_v62  ;;  %v2061_v7 = vmul.f32 0.044715, %v2045_v24  ;;  %v2001_v40 = vmul.f32 0.5, %v5011_v19 }
 0x6e6   :  { %v3691_v52 = vpop.eup %3690  ;;  %v2118_v16 = vadd.f32 1.0, %v3689_v50  ;;  %v2091_v2 = vmul.f32 0.7978846, %v2075_v14  ;;  %3700 = vtanh.f32 %v2092_v3  ;;  %v2047_v37 = vmul.f32 %v2031_v35, %v5101_v45  ;;  %v3555_v41 = vld [vmem:[%s5432_s5 + $0x114] ss:$8 sps:$4 sm:$0xff]  }
 0x6e7   :  { %v3693_v31 = vpop.eup %3692  ;;  %v2132_v44 = vmul.f32 %v2116_v30, %v2004_v46  ;;  %3702 = vtanh.f32 %v2094_v49  ;;  %v2077_v47 = vadd.f32 %v2061_v7, %v5096_v23  ;;  %v2005_v59 = vmul.f32 0.5, %v5033_v28  ;;  %v3558_v35 = vld [vmem:[%s5432_s5 + $0x124] ss:$8 sps:$4 sm:$0xff]  }
 0x6e8   :  { %v2063_v51 = vmul.f32 0.044715, %v2047_v37  ;;  %v2113_v11 = vadd.f32 1.0, %v3683_v58  ;;  %v2117_v8 = vadd.f32 1.0, %v3691_v52  ;;  %v2002_v10 = vmul.f32 0.5, %v5008_v25 }
 0x6e9   :  { %v2144_v53 = vpack.c.bf16 %v2132_v44, %v2128_v54  ;;  %v5121_v38 = vmul.f32 %v2118_v16, %v2006_v4  ;;  %v2093_v15 = vmul.f32 0.7978846, %v2077_v47  ;;  %3704 = vtanh.f32 %v2091_v2  ;;  %v3550_v25 = vld [vmem:[%s5432_s5 + $0x100] ss:$8 sps:$4 sm:$0xff]  }
 0x6ea   :  { %v2079_v17 = vadd.f32 %v2063_v51, %v5101_v45  ;;  %v2129_v48 = vmul.f32 %v2113_v11, %v2001_v40  ;;  %v2133_v29 = vmul.f32 %v2117_v8, %v2005_v59  ;;  %v5124_v46 = vmul.f32 %v2114_v55, %v2002_v10  ;;  %v3556_v59 = vld [vmem:[%s5432_s5 + $0x120] ss:$8 sps:$4 sm:$0xff]  }
 0x6eb   :  { %3706 = vtanh.f32 %v2093_v15  ;;  %v2003_v19 = vmul.f32 0.5, %v5014_v26  ;;  %v2115_v28 = vadd.f32 1.0, %v3685_v22  ;;  %v2007_v4 = vmul.f32 0.5, %v5036_v60  ;;  %v3553_v60 = vld [vmem:[%s5432_s5 + $0x110] ss:$8 sps:$4 sm:$0xff]  }
 0x6ec   :  { %v3695_v57 = vpop.eup %3694  ;;  %v2095_v58 = vmul.f32 0.7978846, %v2079_v17  ;;  %v2145_v6 = vpack.c.bf16 %v2133_v29, %v2129_v48  ;;  %v2119_v14 = vadd.f32 1.0, %v3693_v31  ;;  %v2146_v55 = vpack.c.bf16 %v5121_v38, %v5124_v46 }
 0x6ed   :  { %v3697_v1 = vpop.eup %3696  ;;  %v2131_v26 = vmul.f32 %v2115_v28, %v2003_v19  ;;  %v2120_v24 = vadd.f32 1.0, %v3695_v57  ;;  %v2008_v52 = vmul.f32 0.5, %v5059_v56  ;;  %v2012_v16 = vmul.f32 0.5, %v5081_v5  ;;  %v3559_v19 = vld [vmem:[%s5432_s5 + $0x130] ss:$8 sps:$4 sm:$0xff]  }
 0x6ee   :  { %3708 = vtanh.f32 %v2095_v58  ;;  %2568 = vmatprep.mubr.bf16.mxu0 %v2145_v6  ;;  %v2135_v22 = vmul.f32 %v2119_v14, %v2007_v4  ;;  %v3699_v62 = vpop.eup %3698  ;;  %v2122_v30 = vadd.f32 1.0, %v3697_v1  ;;  %v2010_v7 = vmul.f32 0.5, %v5063_v39  ;;  %v3561_v39 = vld [vmem:[%s5432_s5 + $0x134] ss:$8 sps:$4 sm:$0xff]   ;;  %v3562_v4 = vld [vmem:[%s5432_s5 + $0x140] ss:$8 sps:$4 sm:$0xff]  }
 0x6ef   :  { %2569 = vmatmul.mubr.bf16.vlgmr.msra.gmra.mrb[44].mxu0 %v2144_v53  ;;  %v2014_v31 = vmul.f32 0.5, %v5086_v9  ;;  %v2136_v2 = vmul.f32 %v2120_v24, %v2008_v52  ;;  %v2121_v40 = vadd.f32 1.0, %v3699_v62  ;;  %v2009_v9 = vmul.f32 0.5, %v5071_v12  ;;  %v3564_v12 = vld [vmem:[%s5432_s5 + $0x144] ss:$8 sps:$4 sm:$0xff]  }
 0x6f0   :  { %v3701_v50 = vpop.eup %3700  ;;  %2590 = vmatpush1.bf16.msra.mxu0 %v3550_v25  ;;  %v2147_v54 = vpack.c.bf16 %v2135_v22, %v2131_v26  ;;  %v5149_v51 = vmul.f32 %v2122_v30, %v2010_v7  ;;  %v2013_v8 = vmul.f32 0.5, %v5096_v23  ;;  %v2011_v23 = vmul.f32 0.5, %v5075_v43  ;;  %v3567_v14 = vld [vmem:[%s5432_s5 + $0x154] ss:$8 sps:$4 sm:$0xff]   ;;  %v3565_v43 = vld [vmem:[%s5432_s5 + $0x150] ss:$8 sps:$4 sm:$0xff]  }
 0x6f1   :  { %v3703_v3 = vpop.eup %3702  ;;  %2591 = vmatprep.subr.bf16.mxu0 %v3555_v41  ;;  %v2124_v49 = vadd.f32 1.0, %v3701_v50  ;;  %v2137_v48 = vmul.f32 %v2121_v40, %v2009_v9  ;;  %v2015_v28 = vmul.f32 0.5, %v5101_v45  ;;  %v3570_v45 = vld [vmem:[%s5432_s5 + $0x164] ss:$8 sps:$4 sm:$0xff]   ;;  %v3568_v41 = vld [vmem:[%s5432_s5 + $0x160] ss:$8 sps:$4 sm:$0xff]  }
 0x6f2   :  { %v2126_v44 = vadd.f32 1.0, %v3703_v3  ;;  %v3573_v26 = vld [vmem:[%s5432_s5 + $0x174] ss:$8 sps:$4 sm:$0xff]   ;;  %v3571_v22 = vld [vmem:[%s5432_s5 + $0x170] ss:$8 sps:$4 sm:$0xff]  }
 0x6f3   :  { %v2140_v37 = vmul.f32 %v2124_v49, %v2012_v16  ;;  %v3705_v47 = vpop.eup %3704  ;;  %v3576_v62 = vld [vmem:[%s5432_s5 + $0x184] ss:$8 sps:$4 sm:$0xff]   ;;  %v3574_v24 = vld [vmem:[%s5432_s5 + $0x180] ss:$8 sps:$4 sm:$0xff]   ;;  %v3579_v50 = vld [vmem:[%s5432_s5 + $0x194] ss:$8 sps:$4 sm:$0xff]  }
 0x6f4   :  { %2592 = vmatpush1.bf16.msra.mxu0 %v3553_v60  ;;  %v5151_v56 = vmul.f32 %v2126_v44, %v2014_v31  ;;  %v2123_v15 = vadd.f32 1.0, %v3705_v47  ;;  %v3577_v60 = vld [vmem:[%s5432_s5 + $0x190] ss:$8 sps:$4 sm:$0xff]   ;;  %v3580_v30 = vld [vmem:[%s5432_s5 + $0x1a0] ss:$8 sps:$4 sm:$0xff]   ;;  %v2672_v47 = vpop.permute.xlu1 %2671 }
 0x6f5   :  { %v3707_v5 = vpop.eup %3706  ;;  %2593 = vmatprep.subr.bf16.mxu0 %v3558_v35  ;;  %v2148_v11 = vpack.c.bf16 %v2140_v37, %v2136_v2  ;;  %v3585_v3 = vld [vmem:[%s5432_s5 + $0x1b4] ss:$8 sps:$4 sm:$0xff]   ;;  %v3583_v35 = vld [vmem:[%s5432_s5 + $0x1b0] ss:$8 sps:$4 sm:$0xff]   ;;  %v3588_v52 = vld [vmem:[%s5432_s5 + $0x1c4] ss:$8 sps:$4 sm:$0xff]  }
 0x6f6   :  { %v2125_v53 = vadd.f32 1.0, %v3707_v5  ;;  %v2150_v10 = vpack.c.bf16 %v5151_v56, %v5149_v51  ;;  %v2139_v6 = vmul.f32 %v2123_v15, %v2011_v23  ;;  %v3586_v16 = vld [vmem:[%s5432_s5 + $0x1c0] ss:$8 sps:$4 sm:$0xff]   ;;  %v3591_v49 = vld [vmem:[%s5432_s5 + $0x1d4] ss:$8 sps:$4 sm:$0xff]  }
 0x6f7   :  { %v3589_v7 = vld [vmem:[%s5432_s5 + $0x1d0] ss:$8 sps:$4 sm:$0xff]   ;;  %v3594_v31 = vld [vmem:[%s5432_s5 + $0x1e4] ss:$8 sps:$4 sm:$0xff]   ;;  %v3592_v44 = vld [vmem:[%s5432_s5 + $0x1e0] ss:$8 sps:$4 sm:$0xff]  }
 0x6f8   :  { %v3709_v17 = vpop.eup %3708  ;;  %v2141_v29 = vmul.f32 %v2125_v53, %v2013_v8  ;;  %2594 = vmatpush1.bf16.msra.mxu0 %v3556_v59  ;;  %v3597_v2 = vld [vmem:[%s5432_s5 + $0x1f4] ss:$8 sps:$4 sm:$0xff]   ;;  %v3595_v37 = vld [vmem:[%s5432_s5 + $0x1f0] ss:$8 sps:$4 sm:$0xff]   ;;  %v2700_v59 = vpop.permute.xlu1 %2699 }
 0x6f9   :  { %2595 = vmatprep.subr.bf16.mxu0 %v3561_v39  ;;  %v2127_v57 = vadd.f32 1.0, %v3709_v17  ;;  %v144_v40 = vld [vmem:[#allocation7 + $0x4] ss:$8 sm:$0x3]  ;;  %v2677_v53 = vpop.permute.xlu0 %2676 }
 0x6fa   :  { %v2149_v58 = vpack.c.bf16 %v2141_v29, %v2137_v48  ;;  %v2654_v5 = vrot.slane %v144_v40, %v4207_v20  ;;  %v2658_v39 = vrot.slane %v144_v40, %v4210_v21 }
 0x6fb   :  { %v2143_v25 = vmul.f32 %v2127_v57, %v2015_v28 }
 0x6fc   :  { %2578 = vmatprep.mubr.bf16.mxu0 %v2149_v58  ;;  %2596 = vmatpush1.bf16.msra.mxu0 %v3559_v19  ;;  %v2705_v56 = vpop.permute.xlu1 %2704 }
 0x6fd   :  { %2579 = vmatmul.mubr.bf16.gmra.mrb[48].mxu0 %v2148_v11  ;;  %2597 = vmatprep.subr.bf16.mxu0 %v3564_v12  ;;  %v2151_v1 = vpack.c.bf16 %v2143_v25, %v2139_v6 }
 0x6fe   :  { %2621 = vmatprep.mubr.bf16.mxu0 %v2147_v54  ;;  %v3582_v54 = vld [vmem:[%s5432_s5 + $0x1a4] ss:$8 sps:$4 sm:$0xff]  }
 0x700   :  { %2598 = vmatpush1.bf16.msra.mxu0 %v3562_v4 }
 0x701   :  { %2599 = vmatprep.subr.bf16.mxu0 %v3567_v14 }
 0x704   :  { %2600 = vmatpush1.bf16.msra.mxu0 %v3565_v43 }
 0x705   :  { %2601 = vmatprep.subr.bf16.mxu0 %v3570_v45 }
 0x708   :  { %2602 = vmatpush1.bf16.msra.mxu0 %v3568_v41 }
 0x709   :  { %2603 = vmatprep.subr.bf16.mxu0 %v3573_v26 }
 0x70c   :  { %2604 = vmatpush1.bf16.msra.mxu0 %v3571_v22 }
 0x70d   :  { %2605 = vmatprep.subr.bf16.mxu0 %v3576_v62 }
 0x710   :  { %2606 = vmatpush1.bf16.msra.mxu0 %v3574_v24 }
 0x711   :  { %2607 = vmatprep.subr.bf16.mxu0 %v3579_v50 }
 0x714   :  { %2608 = vmatpush1.bf16.msra.mxu0 %v3577_v60 }
 0x715   :  { %2609 = vmatprep.subr.bf16.mxu0 %v3582_v54 }
 0x718   :  { %2610 = vmatpush1.bf16.msra.mxu0 %v3580_v30 }
 0x719   :  { %2611 = vmatprep.subr.bf16.mxu0 %v3585_v3 }
 0x71c   :  { %2612 = vmatpush1.bf16.msra.mxu0 %v3583_v35 }
 0x71d   :  { %2613 = vmatprep.subr.bf16.mxu0 %v3588_v52 }
 0x720   :  { %2614 = vmatpush1.bf16.msra.mxu0 %v3586_v16 }
 0x721   :  { %2615 = vmatprep.subr.bf16.mxu0 %v3591_v49 }
 0x724   :  { %2616 = vmatpush1.bf16.msra.mxu0 %v3589_v7 }
 0x725   :  { %2617 = vmatprep.subr.bf16.mxu0 %v3594_v31 }
 0x728   :  { %2618 = vmatpush1.bf16.msra.mxu0 %v3592_v44 }
 0x729   :  { %2619 = vmatprep.subr.bf16.mxu0 %v3597_v2 }
 0x72c   :  { %2620 = vmatpush1.bf16.msra.mxu0 %v3595_v37 }
 0x72f   :  { %2622 = vmatmul.mubr.bf16.vlgmr.msra.gmra.mrb[44].mxu0 %v2146_v55 }
 0x730   :  { %2631 = vmatprep.mubr.bf16.mxu0 %v2151_v1 }
 0x737   :  { %2632 = vmatmul.mubr.bf16.gmra.mrb[48].mxu0 %v2150_v10 }
 0x802   :  { %v2623_v11 = vpop.f32.mrb[44].mxu0 }
 0x803   :  { %v2642_v9 = vadd.f32 %v2623_v11, %v4498_v42  ;;  %v2625_v8 = vpop.f32.mrb[45].mxu0  ;;  %v2682_v42 = vpop.permute.xlu0 %2681  ;;  %v2735_v11 = vld [vmem:[%s5433_s6 + $0x10] sm:$0xff] }
 0x804   :  { %v2643_v38 = vadd.f32 %v2625_v8, %v4500_v36  ;;  %v2627_v46 = vpop.f32.mrb[46].mxu0  ;;  %v2738_v8 = vld [vmem:[%s5433_s6 + $0x28] sm:$0xff] }
 0x805   :  { %v2661_v55 = vadd.f32 %v2654_v5, %v2642_v9  ;;  %v2644_v15 = vadd.f32 %v2627_v46, %v4506_v34  ;;  %v2629_v51 = vpop.f32.mrb[47].mxu0  ;;  %v2687_v34 = vpop.permute.xlu1 %2686  ;;  %v2737_v9 = vld [vmem:[%s5433_s6 + $0x20] sm:$0xff] }
 0x806   :  { %v2662_v10 = vadd.f32 %v2658_v39, %v2643_v38  ;;  %v2645_v17 = vadd.f32 %v2629_v51, %v4508_v13  ;;  %v2740_v38 = vld [vmem:[%s5433_s6 + $0x38] sm:$0xff]  ;;  %v2741_v46 = vld [vmem:[%s5433_s6 + $0x40] sm:$0xff] }
 0x807   :  { %v2689_v48 = vmul.f32 %v2672_v47, %v2661_v55  ;;  %v2663_v20 = vadd.f32 %v2654_v5, %v2644_v15  ;;  %v2710_v54 = vpop.permute.xlu0 %2709  ;;  %v2742_v55 = vld [vmem:[%s5433_s6 + $0x48] sm:$0xff]  ;;  %v2743_v15 = vld [vmem:[%s5433_s6 + $0x50] sm:$0xff]  ;;  %v2744_v51 = vld [vmem:[%s5433_s6 + $0x58] sm:$0xff] }
 0x808   :  { %v2690_v29 = vmul.f32 %v2672_v47, %v2662_v10  ;;  %v2664_v19 = vadd.f32 %v2658_v39, %v2645_v17  ;;  %v2746_v10 = vld [vmem:[%s5433_s6 + $0x68] sm:$0xff]  ;;  %v2747_v17 = vld [vmem:[%s5433_s6 + $0x70] sm:$0xff] }
 0x809   :  { %v2717_v21 = vadd.f32 %v2700_v59, %v2689_v48  ;;  %v2691_v12 = vmul.f32 %v2677_v53, %v2663_v20  ;;  %v2715_v16 = vpop.permute.xlu1 %2714  ;;  %v2748_v48 = vld [vmem:[%s5433_s6 + $0x78] sm:$0xff] }
 0x80a   :  { %v2692_v23 = vmul.f32 %v2677_v53, %v2664_v19  ;;  %v2633_v28 = vpop.f32.mrb[48].mxu0  ;;  %v2718_v57 = vadd.f32 %v2700_v59, %v2690_v29  ;;  %v2733_v59 = vld [vmem:[%s5433_s6] sm:$0xff]  ;;  %v2739_v53 = vld [vmem:[%s5433_s6 + $0x30] sm:$0xff] }
 0x80b   :  { %v2719_v36 = vadd.f32 %v2705_v56, %v2691_v12  ;;  %v2646_v58 = vadd.f32 %v2633_v28, %v4514_v0  ;;  %v2635_v6 = vpop.f32.mrb[49].mxu0  ;;  %v2725_v13 = vmax.f32 %v2717_v21, 0.0  ;;  %v174_v20 = vpop.permute.xlu0 %173 }
 0x80c   :  { %v2647_v25 = vadd.f32 %v2635_v6, %v4516_v27  ;;  %v2637_v4 = vpop.f32.mrb[50].mxu0  ;;  %v2720_v14 = vadd.f32 %v2705_v56, %v2692_v23  ;;  %v2726_v62 = vmax.f32 %v2718_v57, 0.0  ;;  %v2745_v56 = vld [vmem:[%s5433_s6 + $0x60] sm:$0xff] }
 0x80d   :  { %v2727_v1 = vmax.f32 %v2719_v36, 0.0  ;;  %v2665_v43 = vadd.f32 %v2654_v5, %v2646_v58  ;;  %v2648_v45 = vadd.f32 %v2637_v4, %v4522_v61  ;;  %v2639_v41 = vpop.f32.mrb[51].mxu0  ;;  %v179_v29 = vpop.permute.xlu1 %178  ;;  %v399_v4 = vadd.f32 %v4016_v32, %v174_v20 }
 0x80e   :  { %v2666_v26 = vadd.f32 %v2658_v39, %v2647_v25  ;;  %v2649_v22 = vadd.f32 %v2639_v41, %v4524_v18  ;;  %v2728_v24 = vmax.f32 %v2720_v14, 0.0  ;;  %v401_v14 = vadd.f32 %v4018_v33, %v174_v20  ;;  %v5476_v20 = vld [vmem:[#allocation18_spill] sm:$0xff] }
 0x80f   :  { %v2693_v50 = vmul.f32 %v2682_v42, %v2665_v43  ;;  %v2667_v60 = vadd.f32 %v2654_v5, %v2648_v45  ;;  %v3378_v0 = vpack.c.bf16 %v2727_v1, %v2725_v13  ;;  %v2734_v5 = vld [vmem:[%s5433_s6 + $0x8] sm:$0xff]  ;;  %v184_v19 = vpop.permute.xlu0 %183  ;;  %v5470_v45 = vld [vmem:[#allocation12_spill] sm:$0xff] }
 0x810   :  { %v2694_v30 = vmul.f32 %v2682_v42, %v2666_v26  ;;  %v2668_v3 = vadd.f32 %v2658_v39, %v2649_v22  ;;  %v3376_v27 = vpack.c.bf16 %v2728_v24, %v2726_v62  ;;  %v2736_v39 = vld [vmem:[%s5433_s6 + $0x18] sm:$0xff]  ;;  %v405_v41 = vadd.f32 %v5470_v45, %v179_v29  ;;  %v5471_v24 = vld [vmem:[#allocation13_spill] sm:$0xff]  ;;  %s3813_s6 = smov [#allocation8]  }
 0x811   :  { %v2721_v35 = vadd.f32 %v2710_v54, %v2693_v50  ;;  %v2695_v52 = vmul.f32 %v2687_v34, %v2667_v60  ;;  %v189_v21 = vpop.permute.xlu1 %188  ;;  %v517_v26 = vmax.f32 %v399_v4, 0.0  ;;  %v407_v50 = vadd.f32 %v5471_v24, %v179_v29  ;;  %s3139_s7 = sshll.u32 %s3813_s6, 4  ;;  %s3140_s7 = int_to_ptr.vmem [resolvable:$true] %s3139_s7 }
 0x812   :  { %v2696_v49 = vmul.f32 %v2687_v34, %v2668_v3  ;;  %3377 = vmatprep.subr.bf16.mxu1 %v3376_v27  ;;  %v2722_v7 = vadd.f32 %v2710_v54, %v2694_v30  ;;  %v518_v60 = vmax.f32 %v401_v14, 0.0  ;;  %v519_v32 = vmax.f32 %v405_v41, 0.0  ;;  %s3776_s24 = scalar_lea.vmem %s3140_s7, 4096  ;;  %p3781_p11 = scmp.lt.s32.totalorder %s3140_s7, %s3140_s7 }
 0x813   :  { %v2723_v61 = vadd.f32 %v2715_v16, %v2695_v52  ;;  %3379 = vmatpush1.bf16.msra.mxu1 %v3378_v0  ;;  %v2729_v44 = vmax.f32 %v2721_v35, 0.0  ;;  %v5332_v12 = vpop.permute.xlu0 %193  ;;  %v5472_v35 = vld [vmem:[#allocation14_spill] sm:$0xff]  ;;  %p3777_p10 = scmp.ne.s32.totalorder %s3140_s7, %s3776_s24  ;;  %p3782_p12 = scmp.lt.s32.totalorder %s3776_s24, %s3776_s24 }
 0x814   :  { %v2724_v31 = vadd.f32 %v2715_v16, %v2696_v49  ;;  %v2730_v2 = vmax.f32 %v2722_v7, 0.0  ;;  %v411_v33 = vadd.f32 %v5472_v35, %v184_v19  ;;  %v520_v7 = vmax.f32 %v407_v50, 0.0  ;;  %v5478_v50 = vld [vmem:[#allocation20_spill] sm:$0xff] }
 0x815   :  { %v2731_v18 = vmax.f32 %v2723_v61, 0.0  ;;  %v5334_v42 = vpop.permute.xlu1 %198  ;;  %v5473_v61 = vld [vmem:[#allocation15_spill] sm:$0xff]  ;;  %v423_v29 = vadd.f32 %v5476_v20, %v5332_v12  ;;  %p3783_p13 = por %p3782_p12, %p3781_p11 }
 0x816   :  { %v2732_v37 = vmax.f32 %v2724_v31, 0.0  ;;  %v413_v31 = vadd.f32 %v5473_v61, %v184_v19 }
 0x817   :  { %v3382_v47 = vpack.c.bf16 %v2731_v18, %v2729_v44  ;;  %v5336_v23 = vpop.permute.xlu0 %203  ;;  %p3784_p0 = pnand %p3783_p13, %p3777_p10 }
 0x818   :  { %v3380_v40 = vpack.c.bf16 %v2732_v37, %v2730_v2 }
 0x819   :  { %v5338_v28 = vpop.permute.xlu1 %208 }
 0x81a   :  { %3381 = vmatprep.subr.bf16.mxu1 %v3380_v40 }
 0x81b   :  { %3383 = vmatpush1.bf16.msra.mxu1 %v3382_v47  ;;  %v5340_v57 = vpop.permute.xlu0 %213 }
 0x81e   :  { %3316 = vmatmul.mubr.msk.f32.vlgmr.msra.gmra.mrb[52].mxu1 %vm756_vm1, %v2733_v59  ;;  %v5474_v59 = vld [vmem:[#allocation16_spill] sm:$0xff] }
 0x81f   :  { %2947 = vmatprep.mubr.f32.mxu1 %v5469_v63  ;;  %v5344_v36 = vpop.permute.xlu0 %223 }
 0x822   :  { %3317 = vmatmul.mubr.msk.f32.gmra.mrb[54].mxu1 %vm756_vm1, %v2734_v5  ;;  %v417_v5 = vadd.f32 %v5474_v59, %v189_v21 }
 0x823   :  { %2953 = vmatprep.mubr.f32.mxu1 %v5469_v63  ;;  %v5348_v6 = vpop.permute.xlu0 %233 }
 0x826   :  { %3318 = vmatmul.mubr.msk.f32.gmra.mrb[56].mxu1 %vm756_vm1, %v2735_v11  ;;  %v521_v11 = vmax.f32 %v411_v33, 0.0 }
 0x827   :  { %2959 = vmatprep.mubr.f32.mxu1 %v5469_v63  ;;  %v5352_v25 = vpop.permute.xlu0 %243 }
 0x82a   :  { %3319 = vmatmul.mubr.msk.f32.gmra.mrb[58].mxu1 %vm756_vm1, %v2736_v39 }
 0x82b   :  { %2965 = vmatprep.mubr.f32.mxu1 %v5469_v63  ;;  %v2752_v1 = vpop.permute.xlu0 %2751 }
 0x82e   :  { %3320 = vmatmul.mubr.msk.f32.gmra.mrb[60].mxu1 %vm756_vm1, %v2737_v9 }
 0x82f   :  { %2971 = vmatprep.mubr.f32.mxu1 %v5469_v63  ;;  %v2762_v37 = vpop.permute.xlu0 %2761 }
 0x832   :  { %3321 = vmatmul.mubr.msk.f32.gmra.mrb[62].mxu1 %vm756_vm1, %v2738_v8 }
 0x833   :  { %2977 = vmatprep.mubr.f32.mxu1 %v5469_v63 }
 0x836   :  { %3322 = vmatmul.mubr.msk.f32.gmra.mrb[64].mxu1 %vm756_vm1, %v2739_v53  ;;  %v5475_v53 = vld [vmem:[#allocation17_spill] sm:$0xff] }
 0x837   :  { %2983 = vmatprep.mubr.f32.mxu1 %v5469_v63 }
 0x83a   :  { %3323 = vmatmul.mubr.msk.f32.gmra.mrb[66].mxu1 %vm756_vm1, %v2740_v38  ;;  %v419_v38 = vadd.f32 %v5475_v53, %v189_v21  ;;  %v5482_v53 = vld [vmem:[#allocation24_spill] sm:$0xff] }
 0x83b   :  { %2989 = vmatprep.mubr.f32.mxu1 %v5469_v63 }
 0x83e   :  { %3324 = vmatmul.mubr.msk.f32.gmra.mrb[68].mxu1 %vm756_vm1, %v2741_v46  ;;  %v522_v46 = vmax.f32 %v413_v31, 0.0  ;;  %v5480_v31 = vld [vmem:[#allocation22_spill] sm:$0xff] }
 0x83f   :  { %2995 = vmatprep.mubr.f32.mxu1 %v5469_v63 }
 0x842   :  { %3325 = vmatmul.mubr.msk.f32.gmra.mrb[70].mxu1 %vm756_vm1, %v2742_v55 }
 0x843   :  { %3001 = vmatprep.mubr.f32.mxu1 %v5469_v63 }
 0x846   :  { %3326 = vmatmul.mubr.msk.f32.gmra.mrb[72].mxu1 %vm756_vm1, %v2743_v15 }
 0x847   :  { %3007 = vmatprep.mubr.f32.mxu1 %v5469_v63 }
 0x84a   :  { %3327 = vmatmul.mubr.msk.f32.gmra.mrb[74].mxu1 %vm756_vm1, %v2744_v51 }
 0x84b   :  { %3013 = vmatprep.mubr.f32.mxu1 %v5469_v63 }
 0x84e   :  { %3328 = vmatmul.mubr.msk.f32.gmra.mrb[76].mxu1 %vm756_vm1, %v2745_v56 }
 0x84f   :  { %3019 = vmatprep.mubr.f32.mxu1 %v5469_v63 }
 0x852   :  { %3329 = vmatmul.mubr.msk.f32.gmra.mrb[78].mxu1 %vm756_vm1, %v2746_v10 }
 0x853   :  { %3025 = vmatprep.mubr.f32.mxu1 %v5469_v63 }
 0x856   :  { %3330 = vmatmul.mubr.msk.f32.gmra.mrb[80].mxu1 %vm756_vm1, %v2747_v17 }
 0x857   :  { %3031 = vmatprep.mubr.f32.mxu1 %v5469_v63  ;;  %v5342_v63 = vpop.permute.xlu1 %218 }
 0x85a   :  { %3331 = vmatmul.mubr.msk.f32.gmra.mrb[82].mxu1 %vm756_vm1, %v2748_v48  ;;  %v523_v48 = vmax.f32 %v417_v5, 0.0 }
 0x85b   :  { %v5346_v58 = vpop.permute.xlu1 %228 }
 0x85f   :  { %v5350_v34 = vpop.permute.xlu1 %238 }
 0x863   :  { %v5356_v13 = vpop.permute.xlu1 %248 }
 0x867   :  { %v2757_v30 = vpop.permute.xlu1 %2756 }
 0x86b   :  { %v2767_v56 = vpop.permute.xlu1 %2766 }
 0x8f1   :  { %v2943_v43 = vpop.f32.mrb[52].mxu1 }
 0x8f2   :  { %v2944_v22 = vadd.f32 %v2943_v43, %v2752_v1  ;;  %v2945_v62 = vpop.f32.mrb[53].mxu1  ;;  %v5477_v43 = vld [vmem:[#allocation19_spill] sm:$0xff] }
 0x8f3   :  { %v2946_v0 = vadd.f32 %v2945_v62, %v2752_v1  ;;  %v524_v1 = vmax.f32 %v419_v38, 0.0  ;;  %v425_v21 = vadd.f32 %v5477_v43, %v5332_v12  ;;  %v441_v38 = vadd.f32 %v5482_v53, %v5338_v28 }
 0x8f4   :  { %v3038_v54 = vadd.f32 %v2944_v22, %v517_v26  ;;  %v2772_v22 = vpop.permute.xlu0 %2771 }
 0x8f5   :  { %v3039_v3 = vadd.f32 %v2946_v0, %v518_v60  ;;  %v2949_v27 = vpop.f32.mrb[54].mxu1  ;;  %v429_v60 = vadd.f32 %v5478_v50, %v5334_v42  ;;  %v525_v0 = vmax.f32 %v423_v29, 0.0  ;;  %v526_v35 = vmax.f32 %v425_v21, 0.0 }
 0x8f6   :  { %v3070_v52 = vmax.f32 %v3038_v54, 0.0  ;;  %v2950_v16 = vadd.f32 %v2949_v27, %v2757_v30  ;;  %v2951_v49 = vpop.f32.mrb[55].mxu1  ;;  %v5479_v27 = vld [vmem:[#allocation21_spill] sm:$0xff] }
 0x8f7   :  { %v3071_v44 = vmax.f32 %v3039_v3, 0.0  ;;  %v2952_v18 = vadd.f32 %v2951_v49, %v2757_v30  ;;  %v527_v61 = vmax.f32 %v429_v60, 0.0 }
 0x8f8   :  { %3102 = vst [vmem:[#allocation8] sm:$0xff] %v3070_v52  ;;  %v3040_v2 = vadd.f32 %v2950_v16, %v519_v32  ;;  %v431_v32 = vadd.f32 %v5479_v27, %v5334_v42  ;;  %v2777_v16 = vpop.permute.xlu1 %2776 }
 0x8f9   :  { %3103 = vst [vmem:[#allocation8 + $0x8] sm:$0xff] %v3071_v44  ;;  %v3041_v47 = vadd.f32 %v2952_v18, %v520_v7  ;;  %v2955_v40 = vpop.f32.mrb[56].mxu1  ;;  %v435_v44 = vadd.f32 %v5480_v31, %v5336_v23 }
 0x8fa   :  { %v3072_v39 = vmax.f32 %v3040_v2, 0.0  ;;  %v2956_v9 = vadd.f32 %v2955_v40, %v2762_v37  ;;  %v2957_v8 = vpop.f32.mrb[57].mxu1  ;;  %v5481_v40 = vld [vmem:[#allocation23_spill] sm:$0xff] }
 0x8fb   :  { %v3073_v55 = vmax.f32 %v3041_v47, 0.0  ;;  %v2958_v15 = vadd.f32 %v2957_v8, %v2762_v37  ;;  %v528_v47 = vmax.f32 %v431_v32, 0.0  ;;  %v437_v42 = vadd.f32 %v5481_v40, %v5336_v23 }
 0x8fc   :  { %3104 = vst [vmem:[#allocation8 + $0x10] sm:$0xff] %v3072_v39  ;;  %v3042_v51 = vadd.f32 %v2956_v9, %v521_v11  ;;  %v2782_v39 = vpop.permute.xlu0 %2781  ;;  %v2787_v29 = vpop.permute.xlu1 %2786 }
 0x8fd   :  { %3105 = vst [vmem:[#allocation8 + $0x18] sm:$0xff] %v3073_v55  ;;  %v3043_v10 = vadd.f32 %v2958_v15, %v522_v46  ;;  %v2961_v17 = vpop.f32.mrb[58].mxu1  ;;  %v529_v46 = vmax.f32 %v435_v44, 0.0 }
 0x8fe   :  { %v3074_v19 = vmax.f32 %v3042_v51, 0.0  ;;  %v2962_v4 = vadd.f32 %v2961_v17, %v2767_v56  ;;  %v2963_v14 = vpop.f32.mrb[59].mxu1  ;;  %v530_v17 = vmax.f32 %v437_v42, 0.0 }
 0x8ff   :  { %v3075_v45 = vmax.f32 %v3043_v10, 0.0  ;;  %v2964_v41 = vadd.f32 %v2963_v14, %v2767_v56  ;;  %v5483_v56 = vld [vmem:[#allocation25_spill] sm:$0xff]  ;;  %v531_v14 = vmax.f32 %v441_v38, 0.0 }
 0x900   :  { %3106 = vst [vmem:[#allocation8 + $0x20] sm:$0xff] %v3074_v19  ;;  %v3044_v26 = vadd.f32 %v2962_v4, %v523_v48  ;;  %v443_v10 = vadd.f32 %v5483_v56, %v5338_v28  ;;  %v2792_v60 = vpop.permute.xlu0 %2791 }
 0x901   :  { %3107 = vst [vmem:[#allocation8 + $0x28] sm:$0xff] %v3075_v45  ;;  %v3045_v62 = vadd.f32 %v2964_v41, %v524_v1  ;;  %v2967_v24 = vpop.f32.mrb[60].mxu1  ;;  %v5484_v1 = vld [vmem:[#allocation26_spill] sm:$0xff] }
 0x902   :  { %v3076_v54 = vmax.f32 %v3044_v26, 0.0  ;;  %v2968_v30 = vadd.f32 %v2967_v24, %v2772_v22  ;;  %v2969_v3 = vpop.f32.mrb[61].mxu1  ;;  %v447_v43 = vadd.f32 %v5484_v1, %v5340_v57  ;;  %v532_v26 = vmax.f32 %v443_v10, 0.0 }
 0x903   :  { %v3077_v12 = vmax.f32 %v3045_v62, 0.0  ;;  %v2970_v33 = vadd.f32 %v2969_v3, %v2772_v22  ;;  %v5485_v22 = vld [vmem:[#allocation27_spill] sm:$0xff] }
 0x904   :  { %3108 = vst [vmem:[#allocation8 + $0x30] sm:$0xff] %v3076_v54  ;;  %v3046_v52 = vadd.f32 %v2968_v30, %v525_v0  ;;  %v449_v28 = vadd.f32 %v5485_v22, %v5340_v57  ;;  %v5486_v30 = vld [vmem:[#allocation28_spill] sm:$0xff]  ;;  %v533_v27 = vmax.f32 %v447_v43, 0.0  ;;  %v5492_v43 = vld [vmem:[#allocation34_spill] sm:$0xff] }
 0x905   :  { %3109 = vst [vmem:[#allocation8 + $0x38] sm:$0xff] %v3077_v12  ;;  %v3047_v49 = vadd.f32 %v2970_v33, %v526_v35  ;;  %v2973_v7 = vpop.f32.mrb[62].mxu1  ;;  %v453_v3 = vadd.f32 %v5486_v30, %v5342_v63  ;;  %v5487_v33 = vld [vmem:[#allocation29_spill] sm:$0xff]  ;;  %v5494_v30 = vld [vmem:[#allocation36_spill] sm:$0xff] }
 0x906   :  { %v3078_v18 = vmax.f32 %v3046_v52, 0.0  ;;  %v2974_v2 = vadd.f32 %v2973_v7, %v2777_v16  ;;  %v2975_v37 = vpop.f32.mrb[63].mxu1  ;;  %v455_v52 = vadd.f32 %v5487_v33, %v5342_v63  ;;  %v5495_v33 = vld [vmem:[#allocation37_spill] sm:$0xff] }
 0x907   :  { %v3079_v59 = vmax.f32 %v3047_v49, 0.0  ;;  %v2976_v5 = vadd.f32 %v2975_v37, %v2777_v16  ;;  %v534_v16 = vmax.f32 %v449_v28, 0.0  ;;  %v5493_v28 = vld [vmem:[#allocation35_spill] sm:$0xff] }
 0x908   :  { %3110 = vst [vmem:[#allocation8 + $0x40] sm:$0xff] %v3078_v18  ;;  %v3048_v11 = vadd.f32 %v2974_v2, %v527_v61  ;;  %v2797_v61 = vpop.permute.xlu1 %2796  ;;  %v535_v18 = vmax.f32 %v453_v3, 0.0  ;;  %v5488_v2 = vld [vmem:[#allocation30_spill] sm:$0xff]  ;;  %v477_v3 = vadd.f32 %v5494_v30, %v5350_v34 }
 0x909   :  { %3111 = vst [vmem:[#allocation8 + $0x48] sm:$0xff] %v3079_v59  ;;  %v3049_v9 = vadd.f32 %v2976_v5, %v528_v47  ;;  %v2979_v8 = vpop.f32.mrb[64].mxu1  ;;  %v459_v37 = vadd.f32 %v5488_v2, %v5344_v36  ;;  %v536_v59 = vmax.f32 %v455_v52, 0.0  ;;  %v5489_v5 = vld [vmem:[#allocation31_spill] sm:$0xff]  ;;  %v479_v52 = vadd.f32 %v5495_v33, %v5350_v34 }
 0x90a   :  { %v3080_v55 = vmax.f32 %v3048_v11, 0.0  ;;  %v2980_v15 = vadd.f32 %v2979_v8, %v2782_v39  ;;  %v2981_v51 = vpop.f32.mrb[65].mxu1  ;;  %v461_v63 = vadd.f32 %v5489_v5, %v5344_v36  ;;  %v2802_v8 = vpop.permute.xlu0 %2801 }
 0x90b   :  { %v3081_v23 = vmax.f32 %v3049_v9, 0.0  ;;  %v2982_v48 = vadd.f32 %v2981_v51, %v2782_v39 }
 0x90c   :  { %3112 = vst [vmem:[#allocation8 + $0x50] sm:$0xff] %v3080_v55  ;;  %v3050_v20 = vadd.f32 %v2980_v15, %v529_v46  ;;  %v5490_v46 = vld [vmem:[#allocation32_spill] sm:$0xff]  ;;  %v537_v15 = vmax.f32 %v459_v37, 0.0 }
 0x90d   :  { %3113 = vst [vmem:[#allocation8 + $0x58] sm:$0xff] %v3081_v23  ;;  %v3051_v19 = vadd.f32 %v2982_v48, %v530_v17  ;;  %v2985_v4 = vpop.f32.mrb[66].mxu1  ;;  %v465_v55 = vadd.f32 %v5490_v46, %v5346_v58  ;;  %v5491_v17 = vld [vmem:[#allocation33_spill] sm:$0xff]  ;;  %v538_v48 = vmax.f32 %v461_v63, 0.0 }
 0x90e   :  { %v3082_v21 = vmax.f32 %v3050_v20, 0.0  ;;  %v2986_v45 = vadd.f32 %v2985_v4, %v2787_v29  ;;  %v2987_v41 = vpop.f32.mrb[67].mxu1  ;;  %v467_v23 = vadd.f32 %v5491_v17, %v5346_v58  ;;  %v473_v58 = vadd.f32 %v5493_v28, %v5348_v6 }
 0x90f   :  { %v3083_v62 = vmax.f32 %v3051_v19, 0.0  ;;  %v2988_v24 = vadd.f32 %v2987_v41, %v2787_v29  ;;  %v2807_v19 = vpop.permute.xlu1 %2806  ;;  %v539_v1 = vmax.f32 %v465_v55, 0.0 }
 0x910   :  { %3114 = vst [vmem:[#allocation8 + $0x60] sm:$0xff] %v3082_v21  ;;  %v3052_v50 = vadd.f32 %v2986_v45, %v531_v14  ;;  %v471_v21 = vadd.f32 %v5492_v43, %v5348_v6  ;;  %v540_v22 = vmax.f32 %v467_v23, 0.0 }
 0x911   :  { %3115 = vst [vmem:[#allocation8 + $0x68] sm:$0xff] %v3083_v62  ;;  %v3053_v0 = vadd.f32 %v2988_v24, %v532_v26  ;;  %v2991_v54 = vpop.f32.mrb[68].mxu1 }
 0x912   :  { %v3084_v32 = vmax.f32 %v3052_v50, 0.0  ;;  %v2992_v35 = vadd.f32 %v2991_v54, %v2792_v60  ;;  %v2993_v12 = vpop.f32.mrb[69].mxu1 }
 0x913   :  { %v3085_v57 = vmax.f32 %v3053_v0, 0.0  ;;  %v2994_v49 = vadd.f32 %v2993_v12, %v2792_v60  ;;  %v2812_v60 = vpop.permute.xlu0 %2811 }
 0x914   :  { %3116 = vst [vmem:[#allocation8 + $0x70] sm:$0xff] %v3084_v32  ;;  %v3054_v7 = vadd.f32 %v2992_v35, %v533_v27  ;;  %v541_v27 = vmax.f32 %v471_v21, 0.0 }
 0x915   :  { %3117 = vst [vmem:[#allocation8 + $0x78] sm:$0xff] %v3085_v57  ;;  %v3055_v31 = vadd.f32 %v2994_v49, %v534_v16  ;;  %v2997_v44 = vpop.f32.mrb[70].mxu1  ;;  %v542_v16 = vmax.f32 %v473_v58, 0.0 }
 0x916   :  { %v3086_v47 = vmax.f32 %v3054_v7, 0.0  ;;  %v2998_v40 = vadd.f32 %v2997_v44, %v2797_v61  ;;  %v2999_v42 = vpop.f32.mrb[71].mxu1  ;;  %v2817_v7 = vpop.permute.xlu1 %2816  ;;  %v543_v44 = vmax.f32 %v477_v3, 0.0 }
 0x917   :  { %v3087_v11 = vmax.f32 %v3055_v31, 0.0  ;;  %v3000_v39 = vadd.f32 %v2999_v42, %v2797_v61  ;;  %v544_v42 = vmax.f32 %v479_v52, 0.0 }
 0x918   :  { %3118 = vst [vmem:[#allocation8 + $0x80] sm:$0xff] %v3086_v47  ;;  %v3056_v9 = vadd.f32 %v2998_v40, %v535_v18  ;;  %v5496_v18 = vld [vmem:[#allocation38_spill] sm:$0xff] }
 0x919   :  { %3119 = vst [vmem:[#allocation8 + $0x88] sm:$0xff] %v3087_v11  ;;  %v3057_v53 = vadd.f32 %v3000_v39, %v536_v59  ;;  %v3003_v38 = vpop.f32.mrb[72].mxu1  ;;  %v483_v2 = vadd.f32 %v5496_v18, %v5352_v25  ;;  %v5497_v59 = vld [vmem:[#allocation39_spill] sm:$0xff]  ;;  %v2822_v39 = vpop.permute.xlu0 %2821 }
 0x91a   :  { %v3088_v51 = vmax.f32 %v3056_v9, 0.0  ;;  %v3004_v56 = vadd.f32 %v3003_v38, %v2802_v8  ;;  %v3005_v10 = vpop.f32.mrb[73].mxu1  ;;  %v485_v34 = vadd.f32 %v5497_v59, %v5352_v25 }
 0x91b   :  { %v3089_v36 = vmax.f32 %v3057_v53, 0.0  ;;  %v3006_v20 = vadd.f32 %v3005_v10, %v2802_v8  ;;  %v5498_v53 = vld [vmem:[#allocation40_spill] sm:$0xff]  ;;  %v545_v46 = vmax.f32 %v483_v2, 0.0 }
 0x91c   :  { %3120 = vst [vmem:[#allocation8 + $0x90] sm:$0xff] %v3088_v51  ;;  %v3058_v29 = vadd.f32 %v3004_v56, %v537_v15  ;;  %v489_v38 = vadd.f32 %v5498_v53, %v5356_v13  ;;  %v5499_v56 = vld [vmem:[#allocation41_spill] sm:$0xff]  ;;  %v546_v17 = vmax.f32 %v485_v34, 0.0 }
 0x91d   :  { %3121 = vst [vmem:[#allocation8 + $0x98] sm:$0xff] %v3089_v36  ;;  %v3059_v4 = vadd.f32 %v3006_v20, %v538_v48  ;;  %v3009_v14 = vpop.f32.mrb[74].mxu1  ;;  %v491_v10 = vadd.f32 %v5499_v56, %v5356_v13  ;;  %v2827_v36 = vpop.permute.xlu1 %2826 }
 0x91e   :  { %v3090_v45 = vmax.f32 %v3058_v29, 0.0  ;;  %v3010_v41 = vadd.f32 %v3009_v14, %v2807_v19  ;;  %v3011_v26 = vpop.f32.mrb[75].mxu1 }
 0x91f   :  { %v3091_v62 = vmax.f32 %v3059_v4, 0.0  ;;  %v3012_v24 = vadd.f32 %v3011_v26, %v2807_v19  ;;  %v547_v19 = vmax.f32 %v489_v38, 0.0  ;;  %v548_v43 = vmax.f32 %v491_v10, 0.0 }
 0x920   :  { %3122 = vst [vmem:[#allocation8 + $0xa0] sm:$0xff] %v3090_v45  ;;  %v3060_v50 = vadd.f32 %v3010_v41, %v539_v1 }
 0x921   :  { %3123 = vst [vmem:[#allocation8 + $0xa8] sm:$0xff] %v3091_v62  ;;  %v3061_v0 = vadd.f32 %v3012_v24, %v540_v22  ;;  %v3015_v54 = vpop.f32.mrb[76].mxu1 }
 0x922   :  { %v3092_v32 = vmax.f32 %v3060_v50, 0.0  ;;  %v3016_v35 = vadd.f32 %v3015_v54, %v2812_v60  ;;  %v3017_v12 = vpop.f32.mrb[77].mxu1 }
 0x923   :  { %v3093_v6 = vmax.f32 %v3061_v0, 0.0  ;;  %v3018_v57 = vadd.f32 %v3017_v12, %v2812_v60 }
 0x924   :  { %3124 = vst [vmem:[#allocation8 + $0xb0] sm:$0xff] %v3092_v32  ;;  %v3062_v49 = vadd.f32 %v3016_v35, %v541_v27 }
 0x925   :  { %3125 = vst [vmem:[#allocation8 + $0xb8] sm:$0xff] %v3093_v6  ;;  %v3063_v61 = vadd.f32 %v3018_v57, %v542_v16  ;;  %v3021_v31 = vpop.f32.mrb[78].mxu1 }
 0x926   :  { %v3094_v37 = vmax.f32 %v3062_v49, 0.0  ;;  %v3022_v47 = vadd.f32 %v3021_v31, %v2817_v7  ;;  %v3023_v40 = vpop.f32.mrb[79].mxu1 }
 0x927   :  { %v3095_v5 = vmax.f32 %v3063_v61, 0.0  ;;  %v3024_v63 = vadd.f32 %v3023_v40, %v2817_v7 }
 0x928   :  { %3126 = vst [vmem:[#allocation8 + $0xc0] sm:$0xff] %v3094_v37  ;;  %v3064_v11 = vadd.f32 %v3022_v47, %v543_v44 }
 0x929   :  { %3127 = vst [vmem:[#allocation8 + $0xc8] sm:$0xff] %v3095_v5  ;;  %v3065_v9 = vadd.f32 %v3024_v63, %v544_v42  ;;  %v3027_v8 = vpop.f32.mrb[80].mxu1 }
 0x92a   :  { %v3096_v55 = vmax.f32 %v3064_v11, 0.0  ;;  %v3028_v15 = vadd.f32 %v3027_v8, %v2822_v39  ;;  %v3029_v51 = vpop.f32.mrb[81].mxu1 }
 0x92b   :  { %v3097_v25 = vmax.f32 %v3065_v9, 0.0  ;;  %v3030_v23 = vadd.f32 %v3029_v51, %v2822_v39 }
 0x92c   :  { %3128 = vst [vmem:[#allocation8 + $0xd0] sm:$0xff] %v3096_v55  ;;  %v3066_v48 = vadd.f32 %v3028_v15, %v545_v46 }
 0x92d   :  { %3129 = vst [vmem:[#allocation8 + $0xd8] sm:$0xff] %v3097_v25  ;;  %v3067_v20 = vadd.f32 %v3030_v23, %v546_v17  ;;  %v3033_v29 = vpop.f32.mrb[82].mxu1 }
 0x92e   :  { %v3098_v4 = vmax.f32 %v3066_v48, 0.0  ;;  %v3034_v14 = vadd.f32 %v3033_v29, %v2827_v36  ;;  %v3035_v1 = vpop.f32.mrb[83].mxu1 }
 0x92f   :  { %v3099_v21 = vmax.f32 %v3067_v20, 0.0  ;;  %v3036_v45 = vadd.f32 %v3035_v1, %v2827_v36 }
 0x930   :  { %3130 = vst [vmem:[#allocation8 + $0xe0] sm:$0xff] %v3098_v4  ;;  %v3068_v41 = vadd.f32 %v3034_v14, %v547_v19 }
 0x931   :  { %3131 = vst [vmem:[#allocation8 + $0xe8] sm:$0xff] %v3099_v21  ;;  %v3069_v13 = vadd.f32 %v3036_v45, %v548_v43 }
 0x932   :  { %v3100_v26 = vmax.f32 %v3068_v41, 0.0 }
 0x933   :  { %v3101_v22 = vmax.f32 %v3069_v13, 0.0 }
 0x934   :  { %3132 = vst [vmem:[#allocation8 + $0xf0] sm:$0xff] %v3100_v26 }
 0x935   :  { %3133 = vst [vmem:[#allocation8 + $0xf8] sm:$0xff] %v3101_v22 }
 0x936   :  { %3787 = shalt.err (!%p3784_p0)
}
 0x937   :  { %s3788_s27 = scalar_lea.hbm %s5436_s9, 4096 }
 0x938   :  { %p3789_p1 = scmp.ne.s32.totalorder %s5436_s9, %s3788_s27  ;;  %p3792_p2 = scmp.lt.u32.totalorder %s3788_s27, %s5436_s9 }
 0x93a   :  { %p3794_p3 = pnand %p3792_p2, %p3789_p1 }
 0x93c   :  { %3797 = shalt.err (!%p3794_p3)
}
 0x93d   :  { %3145 = dma.vmem_to_hbm [thread:$0]  %s3140_s7, 4096, %s5436_s9, [#allocation4], %s3808_s3, %s3808_s3, %s3809_s10  }
 0x93e   :  { %3802 = dma.done.wait [#allocation4], 4096  }
 0x93f   :  { %3803 = vsyncadd [#allocation4], 4294963200 }
 0x940   :  { %3149 = vsyncpa [#allocation3], 1 }
 0x941   :  { %3150 = vsyncpa [#allocation6], 1 }
 0x942   :  { %3151 = vsyncpa [#allocation4], 1 }

</bundles_post_ra>
